<compile_context>
chip_gen: v6e
topology: v6e:2x2x1
jax: 0.10.0
libtpu: 0.0.40
codegen_flags: <defaults>
</compile_context>

<pallas_src>
import itertools
import math

import numpy as np
import jax
import jax.numpy as jnp
from jax.experimental import pallas as pl
from jax.experimental.pallas import tpu as pltpu

COO_COMBS = list(itertools.combinations(range(4), 2))  # the 6 plane combos
_PTS_COLS = 8                                           # pts padded 4 -> 8 cols


# ---------------------------------------------------------------------------
# Deterministic parameter init (mirrors init_composite_grid shapes)
# ---------------------------------------------------------------------------
def init_composite_grid(key, out_dim, reso, a=0.1, b=0.5):
    params = []
    keys = jax.random.split(key, 64)
    k = [0]

    def nxt():
        k[0] += 1
        return keys[k[0] - 1]

    # block 1: 6 plane grids  [1, C, reso[d1], reso[d0]]
    for dims in COO_COMBS:
        shape = (1, out_dim, reso[dims[1]], reso[dims[0]])
        if 3 in dims:
            params.append(jnp.ones(shape, jnp.float32))
        else:
            params.append(jax.random.uniform(nxt(), shape, jnp.float32, a, b))
    # block 2: 4 vector grids [1, C, reso[d], 1]
    for dim in range(4):
        shape = (1, out_dim, reso[dim], 1)
        if dim == 3:
            params.append(jnp.ones(shape, jnp.float32))
        else:
            params.append(jax.random.uniform(nxt(), shape, jnp.float32, a, b))
    # block 3: per combo -> plane + the two complementary vectors
    # TODO(synk): torch leaves these plane coefs uninitialized (init applied to
    # the wrong variable in the original code); we use a deterministic uniform.
    for dims in COO_COMBS:
        shape = (1, out_dim, reso[dims[1]], reso[dims[0]])
        params.append(jax.random.uniform(nxt(), shape, jnp.float32, a, b))
        for i in range(4):
            if i not in dims:
                vshape = (1, out_dim, reso[i], 1)
                if i == 3:
                    params.append(jnp.ones(vshape, jnp.float32))
                else:
                    params.append(jax.random.uniform(nxt(), vshape, jnp.float32, a, b))
    return params


def init_mlp(key, in_dim, hid_dim, out_dim):
    k1, k2, k3, k4 = jax.random.split(key, 4)
    bnd1 = 1.0 / math.sqrt(in_dim)
    bnd2 = 1.0 / math.sqrt(hid_dim)
    w1 = jax.random.uniform(k1, (in_dim, hid_dim), jnp.float32, -bnd1, bnd1)
    b1 = jax.random.uniform(k2, (1, hid_dim), jnp.float32, -bnd1, bnd1)
    w2 = jax.random.uniform(k3, (hid_dim, out_dim), jnp.float32, -bnd2, bnd2)
    b2 = jax.random.uniform(k4, (1, out_dim), jnp.float32, -bnd2, bnd2)
    return w1, b1, w2, b2


def sample_1d_const(vec_grid):
    """Exact value of grid_sample_wrapper on a [1,C,R,1] grid.

    The appended zero coordinate maps to the height axis -> constant sample at
    position (R-1)/2, independent of the query point.
    """
    C, H = vec_grid.shape[1], vec_grid.shape[2]
    fy = 0.5 * (H - 1)
    iy0 = int(math.floor(fy))
    iy1 = min(iy0 + 1, H - 1)
    wy1 = fy - iy0
    wy0 = 1.0 - wy1
    v = vec_grid[0, :, iy0, 0] * wy0 + vec_grid[0, :, iy1, 0] * wy1
    return v.reshape(1, C)


# ---------------------------------------------------------------------------
# Pallas kernel
# ---------------------------------------------------------------------------
def _make_kernel(combo_refs, NE, NP, L):
    """Fused multi-level kernel.

    refs layout (after the 4 leading one-hot constants):
        [0, NE)                unique 0/1 expansion matrices   (LW, H*W)
        [NE, NE+NP)            packed plane grids (H*W, 2C), 6 per level
        [NE+NP, NE+NP+L)       per-level first-layer column blocks (2C, 3C*L)
        [NE+NP+L, NE+NP+L+3)   fused b1, w2 (0.5**lvl folded), b2
        [-1]                   output (TN, F)
    """

    def kernel(pts_ref, sel_ref, bias_ref, fmax_ref, loc_ref, *refs):
        out_ref = refs[-1]
        exp_refs = refs[:NE]
        plane_refs = refs[NE:NE + NP]
        w1_refs = refs[NE + NP:NE + NP + L]
        b1_ref, w2_ref, b2_ref = refs[NE + NP + L:NE + NP + L + 3]

        # ---- bilinear "tent" weights for every (axis, resolution) segment ----
        #   f[n,l]      = clip((c_axis(l) + 1) * 0.5 * (R_l - 1), 0, R_l - 1)
        #   onehot[n,l] = max(0, 1 - |f[n,l] - local_index(l)|)
        # (exactly the border / align_corners bilinear taps; unused lanes have
        #  local_index = -2 and all-zero constants, so they produce 0.)
        f = jnp.dot(pts_ref[...], sel_ref[...],
                    preferred_element_type=jnp.float32) + bias_ref[...]
        f = jnp.clip(f, 0.0, fmax_ref[...])
        onehot = jnp.maximum(1.0 - jnp.abs(f - loc_ref[...]), 0.0)   # (TN, LW)

        h_pre = None
        for lvl in range(L):
            pp = None                                   # (TN, 2C) = [prod1 | prod3]
            for ci in range(6):
                ey, ex = combo_refs[lvl][ci]
                # Expand the packed tent weights to the flattened plane layout
                # on the MXU (constant 0/1 matrices), multiply row*col weights
                # once, then one matmul samples [block1 | block3] of the combo.
                wy = jnp.dot(onehot, exp_refs[ey][...],
                             preferred_element_type=jnp.float32)     # (TN, H*W)
                wx = jnp.dot(onehot, exp_refs[ex][...],
                             preferred_element_type=jnp.float32)     # (TN, H*W)
                s = jnp.dot(wy * wx, plane_refs[lvl * 6 + ci][...],
                            preferred_element_type=jnp.float32)      # (TN, 2C)
                pp = s if pp is None else pp * s
            hl = jnp.dot(pp, w1_refs[lvl][...],
                         preferred_element_type=jnp.float32)         # (TN, 3C*L)
            h_pre = hl if h_pre is None else h_pre + hl

        h = jnp.maximum(h_pre + b1_ref[...], 0.0)
        out_ref[...] = jnp.dot(h, w2_ref[...],
                               preferred_element_type=jnp.float32) + b2_ref[...]

    return kernel


def _hexplane_pallas(pts_pad, packed, TN):
    N = pts_pad.shape[0]
    F = packed['F']
    kernel = _make_kernel(packed['combo_refs'], packed['NE'], packed['NP'],
                          packed['L'])

    const_args = ([packed['sel'], packed['bias'], packed['fmax'], packed['loc']]
                  + packed['exp_mats'] + packed['planes'] + packed['w1_cols']
                  + [packed['b1'], packed['w2'], packed['b2']])

    in_specs = [pl.BlockSpec((TN, pts_pad.shape[1]), lambda n: (n, 0))]
    # Grid-invariant constants: full-shape blocks, index map pinned at (0, 0)
    # (Pallas skips re-DMA when the block index does not change).
    in_specs += [pl.BlockSpec(a.shape, lambda n: (0, 0)) for a in const_args]

    return pl.pallas_call(
        kernel,
        out_shape=jax.ShapeDtypeStruct((N, F), jnp.float32),
        grid_spec=pltpu.PrefetchScalarGridSpec(
            num_scalar_prefetch=0,
            grid=(N // TN,),
            in_specs=in_specs,
            out_specs=pl.BlockSpec((TN, F), lambda n: (n, 0))),
        compiler_params=pltpu.CompilerParams(
            dimension_semantics=("parallel",)),
    )(pts_pad, *const_args)


# ---------------------------------------------------------------------------
# HexPlaneField wrapper
# ---------------------------------------------------------------------------
class HexPlaneField:
    def __init__(self, bounds, planeconfig, multires, key, tile_n=128):
        self.aabb = jnp.asarray([[bounds] * 3, [-bounds] * 3], jnp.float32)
        self.tile_n = tile_n
        C = planeconfig['output_coordinate_dim']
        self.C = C
        self.feat_dim = C * len(multires)
        self.levels = []
        self.resolutions = []
        keys = jax.random.split(key, 2 * len(multires))
        for li, res_mul in enumerate(multires):
            reso = ([r * res_mul for r in planeconfig['resolution'][:3]]
                    + list(planeconfig['resolution'][3:]))
            self.resolutions.append(reso)
            gp = init_composite_grid(keys[2 * li], C, reso)
            mlp = init_mlp(keys[2 * li + 1], 3 * C, 3 * C, self.feat_dim)
            self.levels.append(self._prepare_level(gp, reso, mlp))
        self.packed = self._pack_kernel_constants()

    # --- per-level constant folding -----------------------------------------
    def _prepare_level(self, gp, reso, mlp):
        C = self.C
        planes, meta = [], []
        for ci, (d0, d1) in enumerate(COO_COMBS):             # block-1 planes
            H, W = reso[d1], reso[d0]
            planes.append(gp[ci][0].reshape(C, H * W).T)
            meta.append((d0, d1, H, W))
        for ci, (d0, d1) in enumerate(COO_COMBS):             # block-3 planes
            H, W = reso[d1], reso[d0]
            planes.append(gp[10 + 3 * ci][0].reshape(C, H * W).T)
            meta.append((d0, d1, H, W))
        vec2 = jnp.ones((1, C), jnp.float32)                  # block-2 constant
        for ci in range(4):
            vec2 = vec2 * sample_1d_const(gp[6 + ci])
        vec3 = jnp.ones((1, C), jnp.float32)                  # block-3 vector consts
        for ci in range(6):
            vec3 = vec3 * sample_1d_const(gp[10 + 3 * ci + 1])
            vec3 = vec3 * sample_1d_const(gp[10 + 3 * ci + 2])
        w1, b1, w2, b2 = mlp

        # pair block-1 / block-3 planes of the same combo: (H*W, 2C)
        planes_packed = [jnp.concatenate([planes[ci], planes[6 + ci]], axis=1)
                         for ci in range(6)]
        # fold the point-independent 1-D samples into the first MLP layer:
        #   h = prod1 @ w1[0:C] + prod3 @ (vec3^T * w1[2C:3C]) + (b1 + vec2 @ w1[C:2C])
        w1p = jnp.concatenate([w1[0:C, :], w1[2 * C:3 * C, :] * vec3.T], axis=0)
        b1e = b1 + vec2 @ w1[C:2 * C, :]

        return dict(planes=planes, meta=meta, vec2=vec2, vec3=vec3,
                    w1=w1, b1=b1, w2=w2, b2=b2,
                    planes_packed=planes_packed, w1p=w1p, b1e=b1e)

    # --- cross-level constant packing for the kernel -------------------------
    def _pack_kernel_constants(self):
        C, F, L = self.C, self.feat_dim, len(self.levels)

        # lane-packed segment layout for the one-hot tile, keyed by (axis, R)
        # (shared across levels when the resolution matches, e.g. the time axis)
        seg_off, cursor = {}, 0
        for reso in self.resolutions:
            for d in range(4):
                key = (d, reso[d])
                if key not in seg_off:
                    seg_off[key] = cursor
                    cursor += reso[d]
        LW = ((cursor + 127) // 128) * 128
        # TODO(synk): for very large multires configs the packed width could
        # exceed a few hundred lanes; a per-level split would bound it.

        sel = np.zeros((_PTS_COLS, LW), np.float32)   # pts @ sel -> per-lane c*0.5*(R-1)
        bias = np.zeros((1, LW), np.float32)
        fmax = np.zeros((1, LW), np.float32)
        loc = np.full((1, LW), -2.0, np.float32)      # -2 never matches a tap
        for (d, R), off in seg_off.items():
            sel[d, off:off + R] = 0.5 * (R - 1)
            bias[0, off:off + R] = 0.5 * (R - 1)
            fmax[0, off:off + R] = R - 1
            loc[0, off:off + R] = np.arange(R)

        # constant 0/1 expansion matrices (deduplicated across combos/levels)
        exp_mats, exp_idx = [], {}

        def get_exp(role, d, H, W):
            key = (role, d, H, W)
            if key not in exp_idx:
                off = seg_off[(d, H if role == 'y' else W)]
                m = np.zeros((LW, H * W), np.float32)
                if role == 'y':
                    for i in range(H):
                        m[off + i, i * W:(i + 1) * W] = 1.0
                else:
                    for j in range(W):
                        m[off + j, j::W] = 1.0
                exp_idx[key] = len(exp_mats)
                exp_mats.append(jnp.asarray(m))
            return exp_idx[key]

        combo_refs, planes = [], []
        for lv, reso in zip(self.levels, self.resolutions):
            refs = []
            for ci, (d0, d1) in enumerate(COO_COMBS):
                H, W = reso[d1], reso[d0]
                refs.append((get_exp('y', d1, H, W), get_exp('x', d0, H, W)))
                planes.append(lv['planes_packed'][ci])
            combo_refs.append(tuple(refs))

        # fused epilogue: fold 0.5**lvl into w2/b2, block-structure the MLPs so
        # the kernel does L first-layer matmuls + one relu + one second-layer
        # matmul (no concatenate needed inside the kernel).
        hid = 3 * C
        w1_cols = []
        for lvl, lv in enumerate(self.levels):
            w = jnp.zeros((2 * C, hid * L), jnp.float32)
            w1_cols.append(w.at[:, lvl * hid:(lvl + 1) * hid].set(lv['w1p']))
        b1 = jnp.concatenate([lv['b1e'] for lv in self.levels], axis=1)
        w2 = jnp.concatenate([lv['w2'] * (0.5 ** lvl)
                              for lvl, lv in enumerate(self.levels)], axis=0)
        b2 = sum(lv['b2'] * (0.5 ** lvl) for lvl, lv in enumerate(self.levels))

        return dict(sel=jnp.asarray(sel), bias=jnp.asarray(bias),
                    fmax=jnp.asarray(fmax), loc=jnp.asarray(loc),
                    exp_mats=exp_mats, planes=planes,
                    w1_cols=w1_cols, b1=b1, w2=w2, b2=b2,
                    combo_refs=tuple(combo_refs),
                    NE=len(exp_mats), NP=len(planes), L=L, F=F)

    def __call__(self, pts, timestamps):
        aabb0, aabb1 = self.aabb[0], self.aabb[1]
        ptsn = (pts - aabb0) * (2.0 / (aabb1 - aabb0)) - 1.0
        p = jnp.concatenate([ptsn, timestamps], axis=-1).reshape(-1, 4)
        p = p.astype(jnp.float32)
        N = p.shape[0]
        TN = self.tile_n
        npad = ((N + TN - 1) // TN) * TN
        # pad rows to a tile multiple and columns 4 -> 8 (aligned contraction
        # for the selection matmul).  Padded rows produce garbage that is
        # sliced off below.
        p_pad = jnp.pad(p, ((0, npad - N), (0, _PTS_COLS - 4)))
        out = _hexplane_pallas(p_pad, self.packed, TN)
        return out[:N]


# ---------------------------------------------------------------------------
# Pure-JAX reference (gather-based grid_sample, unfused/unfolded) for validation
# ---------------------------------------------------------------------------
def _ref_bilinear(pts4, plane_chw, d0, d1):
    C, H, W = plane_chw.shape
    x, y = pts4[:, d0], pts4[:, d1]
    fx = jnp.clip((x + 1.0) * 0.5 * (W - 1), 0.0, W - 1.0)
    fy = jnp.clip((y + 1.0) * 0.5 * (H - 1), 0.0, H - 1.0)
    ix0 = jnp.clip(jnp.floor(fx), 0, max(W - 2, 0)).astype(jnp.int32)
    iy0 = jnp.clip(jnp.floor(fy), 0, max(H - 2, 0)).astype(jnp.int32)
    ix1, iy1 = ix0 + 1, iy0 + 1
    wx1 = fx - ix0
    wx0 = 1.0 - wx1
    wy1 = fy - iy0
    wy0 = 1.0 - wy1

    def g(iy, ix):
        return plane_chw[:, iy, ix].T

    return (g(iy0, ix0) * (wy0 * wx0)[:, None] + g(iy0, ix1) * (wy0 * wx1)[:, None]
            + g(iy1, ix0) * (wy1 * wx0)[:, None] + g(iy1, ix1) * (wy1 * wx1)[:, None])


def hexplane_reference(field, pts, timestamps):
    aabb0, aabb1 = field.aabb[0], field.aabb[1]
    ptsn = (pts - aabb0) * (2.0 / (aabb1 - aabb0)) - 1.0
    p = jnp.concatenate([ptsn, timestamps], axis=-1).reshape(-1, 4)
    N, C = p.shape[0], field.C
    out = jnp.zeros((N, field.feat_dim), jnp.float32)
    for level, lv in enumerate(field.levels):
        prod1 = jnp.ones((N, C), jnp.float32)
        prod3 = jnp.ones((N, C), jnp.float32)
        for i in range(6):
            d0, d1, H, W = lv['meta'][i]
            prod1 = prod1 * _ref_bilinear(p, lv['planes'][i].T.reshape(C, H, W), d0, d1)
        for i in range(6, 12):
            d0, d1, H, W = lv['meta'][i]
            prod3 = prod3 * _ref_bilinear(p, lv['planes'][i].T.reshape(C, H, W), d0, d1)
        feat2 = jnp.broadcast_to(lv['vec2'], (N, C))
        feat3 = prod3 * lv['vec3']
        level_feat = jnp.concatenate([prod1, feat2, feat3], axis=-1)
        h = jnp.maximum(level_feat @ lv['w1'] + lv['b1'], 0.0)
        out = out + (h @ lv['w2'] + lv['b2']) * (0.5 ** level)
    return out


if __name__ == "__main__":
    planeconfig = dict(grid_dimensions=2, input_coordinate_dim=4,
                       output_coordinate_dim=8, resolution=[8, 8, 8, 4])
    multires = [1, 2]
    bounds = 1.6

    key = jax.random.PRNGKey(0)
    kp, kt, kf = jax.random.split(key, 3)
    # TN=128, N=1024 -> 8 parallel grid steps (>= 4 per core on v7x megacore).
    field = HexPlaneField(bounds, planeconfig, multires, kf, tile_n=128)

    N = 1024
    pts = jax.random.uniform(kp, (N, 3), jnp.float32, -bounds, bounds)
    timestamps = jax.random.uniform(kt, (N, 1), jnp.float32, -1.0, 1.0)

    out = jax.block_until_ready(field(pts, timestamps))
    assert out.shape == (N, field.feat_dim), out.shape

    ref = hexplane_reference(field, pts, timestamps)
    if not jnp.allclose(out, ref, rtol=1e-3, atol=1e-4):
        raise AssertionError(
            f"mismatch vs reference, max abs err={float(jnp.max(jnp.abs(out - ref)))}")

    print("KERNEL_OK")
</pallas_src>

<mosaic_0001>
module attributes {stable_mosaic.version = 11 : i64} {
  func.func @kernel(%arg0: i32, %arg1: memref<128x8xf32, #tpu.memory_space<vmem>>, %arg2: memref<8x128xf32, #tpu.memory_space<vmem>>, %arg3: memref<1x128xf32, #tpu.memory_space<vmem>>, %arg4: memref<1x128xf32, #tpu.memory_space<vmem>>, %arg5: memref<1x128xf32, #tpu.memory_space<vmem>>, %arg6: memref<128x64xf32, #tpu.memory_space<vmem>>, %arg7: memref<128x64xf32, #tpu.memory_space<vmem>>, %arg8: memref<128x64xf32, #tpu.memory_space<vmem>>, %arg9: memref<128x32xf32, #tpu.memory_space<vmem>>, %arg10: memref<128x32xf32, #tpu.memory_space<vmem>>, %arg11: memref<128x64xf32, #tpu.memory_space<vmem>>, %arg12: memref<128x32xf32, #tpu.memory_space<vmem>>, %arg13: memref<128x32xf32, #tpu.memory_space<vmem>>, %arg14: memref<128x256xf32, #tpu.memory_space<vmem>>, %arg15: memref<128x256xf32, #tpu.memory_space<vmem>>, %arg16: memref<128x256xf32, #tpu.memory_space<vmem>>, %arg17: memref<128x64xf32, #tpu.memory_space<vmem>>, %arg18: memref<128x64xf32, #tpu.memory_space<vmem>>, %arg19: memref<128x256xf32, #tpu.memory_space<vmem>>, %arg20: memref<128x64xf32, #tpu.memory_space<vmem>>, %arg21: memref<128x64xf32, #tpu.memory_space<vmem>>, %arg22: memref<64x16xf32, #tpu.memory_space<vmem>>, %arg23: memref<64x16xf32, #tpu.memory_space<vmem>>, %arg24: memref<32x16xf32, #tpu.memory_space<vmem>>, %arg25: memref<64x16xf32, #tpu.memory_space<vmem>>, %arg26: memref<32x16xf32, #tpu.memory_space<vmem>>, %arg27: memref<32x16xf32, #tpu.memory_space<vmem>>, %arg28: memref<256x16xf32, #tpu.memory_space<vmem>>, %arg29: memref<256x16xf32, #tpu.memory_space<vmem>>, %arg30: memref<64x16xf32, #tpu.memory_space<vmem>>, %arg31: memref<256x16xf32, #tpu.memory_space<vmem>>, %arg32: memref<64x16xf32, #tpu.memory_space<vmem>>, %arg33: memref<64x16xf32, #tpu.memory_space<vmem>>, %arg34: memref<16x48xf32, #tpu.memory_space<vmem>>, %arg35: memref<16x48xf32, #tpu.memory_space<vmem>>, %arg36: memref<1x48xf32, #tpu.memory_space<vmem>>, %arg37: memref<48x16xf32, #tpu.memory_space<vmem>>, %arg38: memref<1x16xf32, #tpu.memory_space<vmem>>, %arg39: memref<128x16xf32, #tpu.memory_space<vmem>>) attributes {dimension_semantics = [#tpu.dimension_semantics<parallel>], iteration_bounds = array<i64: 8>, scalar_prefetch = 0 : i64, scratch_operands = 0 : i64, tpu.core_type = #tpu.core_type<tc>, window_params = [{transform_indices = @transform_0, window_bounds = array<i64: 128, 8>}, {pipeline_mode = #tpu.pipeline_mode<synchronous>, transform_indices = @transform_1, window_bounds = array<i64: 8, 128>}, {pipeline_mode = #tpu.pipeline_mode<synchronous>, transform_indices = @transform_2, window_bounds = array<i64: 1, 128>}, {pipeline_mode = #tpu.pipeline_mode<synchronous>, transform_indices = @transform_3, window_bounds = array<i64: 1, 128>}, {pipeline_mode = #tpu.pipeline_mode<synchronous>, transform_indices = @transform_4, window_bounds = array<i64: 1, 128>}, {pipeline_mode = #tpu.pipeline_mode<synchronous>, transform_indices = @transform_5, window_bounds = array<i64: 128, 64>}, {pipeline_mode = #tpu.pipeline_mode<synchronous>, transform_indices = @transform_6, window_bounds = array<i64: 128, 64>}, {pipeline_mode = #tpu.pipeline_mode<synchronous>, transform_indices = @transform_7, window_bounds = array<i64: 128, 64>}, {pipeline_mode = #tpu.pipeline_mode<synchronous>, transform_indices = @transform_8, window_bounds = array<i64: 128, 32>}, {pipeline_mode = #tpu.pipeline_mode<synchronous>, transform_indices = @transform_9, window_bounds = array<i64: 128, 32>}, {pipeline_mode = #tpu.pipeline_mode<synchronous>, transform_indices = @transform_10, window_bounds = array<i64: 128, 64>}, {pipeline_mode = #tpu.pipeline_mode<synchronous>, transform_indices = @transform_11, window_bounds = array<i64: 128, 32>}, {pipeline_mode = #tpu.pipeline_mode<synchronous>, transform_indices = @transform_12, window_bounds = array<i64: 128, 32>}, {pipeline_mode = #tpu.pipeline_mode<synchronous>, transform_indices = @transform_13, window_bounds = array<i64: 128, 256>}, {pipeline_mode = #tpu.pipeline_mode<synchronous>, transform_indices = @transform_14, window_bounds = array<i64: 128, 256>}, {pipeline_mode = #tpu.pipeline_mode<synchronous>, transform_indices = @transform_15, window_bounds = array<i64: 128, 256>}, {pipeline_mode = #tpu.pipeline_mode<synchronous>, transform_indices = @transform_16, window_bounds = array<i64: 128, 64>}, {pipeline_mode = #tpu.pipeline_mode<synchronous>, transform_indices = @transform_17, window_bounds = array<i64: 128, 64>}, {pipeline_mode = #tpu.pipeline_mode<synchronous>, transform_indices = @transform_18, window_bounds = array<i64: 128, 256>}, {pipeline_mode = #tpu.pipeline_mode<synchronous>, transform_indices = @transform_19, window_bounds = array<i64: 128, 64>}, {pipeline_mode = #tpu.pipeline_mode<synchronous>, transform_indices = @transform_20, window_bounds = array<i64: 128, 64>}, {pipeline_mode = #tpu.pipeline_mode<synchronous>, transform_indices = @transform_21, window_bounds = array<i64: 64, 16>}, {pipeline_mode = #tpu.pipeline_mode<synchronous>, transform_indices = @transform_22, window_bounds = array<i64: 64, 16>}, {pipeline_mode = #tpu.pipeline_mode<synchronous>, transform_indices = @transform_23, window_bounds = array<i64: 32, 16>}, {pipeline_mode = #tpu.pipeline_mode<synchronous>, transform_indices = @transform_24, window_bounds = array<i64: 64, 16>}, {pipeline_mode = #tpu.pipeline_mode<synchronous>, transform_indices = @transform_25, window_bounds = array<i64: 32, 16>}, {pipeline_mode = #tpu.pipeline_mode<synchronous>, transform_indices = @transform_26, window_bounds = array<i64: 32, 16>}, {pipeline_mode = #tpu.pipeline_mode<synchronous>, transform_indices = @transform_27, window_bounds = array<i64: 256, 16>}, {pipeline_mode = #tpu.pipeline_mode<synchronous>, transform_indices = @transform_28, window_bounds = array<i64: 256, 16>}, {pipeline_mode = #tpu.pipeline_mode<synchronous>, transform_indices = @transform_29, window_bounds = array<i64: 64, 16>}, {pipeline_mode = #tpu.pipeline_mode<synchronous>, transform_indices = @transform_30, window_bounds = array<i64: 256, 16>}, {pipeline_mode = #tpu.pipeline_mode<synchronous>, transform_indices = @transform_31, window_bounds = array<i64: 64, 16>}, {pipeline_mode = #tpu.pipeline_mode<synchronous>, transform_indices = @transform_32, window_bounds = array<i64: 64, 16>}, {pipeline_mode = #tpu.pipeline_mode<synchronous>, transform_indices = @transform_33, window_bounds = array<i64: 16, 48>}, {pipeline_mode = #tpu.pipeline_mode<synchronous>, transform_indices = @transform_34, window_bounds = array<i64: 16, 48>}, {pipeline_mode = #tpu.pipeline_mode<synchronous>, transform_indices = @transform_35, window_bounds = array<i64: 1, 48>}, {pipeline_mode = #tpu.pipeline_mode<synchronous>, transform_indices = @transform_36, window_bounds = array<i64: 48, 16>}, {pipeline_mode = #tpu.pipeline_mode<synchronous>, transform_indices = @transform_37, window_bounds = array<i64: 1, 16>}, {transform_indices = @transform_38, window_bounds = array<i64: 128, 16>}]} {
    %c0 = arith.constant 0 : index
    %c0_0 = arith.constant 0 : index
    %0 = vector.load %arg1[%c0, %c0_0] : memref<128x8xf32, #tpu.memory_space<vmem>>, vector<128x8xf32>
    %c0_1 = arith.constant 0 : index
    %c0_2 = arith.constant 0 : index
    %1 = vector.load %arg2[%c0_1, %c0_2] : memref<8x128xf32, #tpu.memory_space<vmem>>, vector<8x128xf32>
    %cst = arith.constant dense<0.000000e+00> : vector<128x128xf32>
    %2 = tpu.matmul %0, %1, %cst {dimension_numbers = #tpu.dot_dimension_numbers<[1], [0], [0], [1], [0, 0, 1, 1], [], []>} : vector<128x8xf32>, vector<8x128xf32>, vector<128x128xf32> -> vector<128x128xf32>
    %c0_3 = arith.constant 0 : index
    %c0_4 = arith.constant 0 : index
    %3 = vector.load %arg3[%c0_3, %c0_4] : memref<1x128xf32, #tpu.memory_space<vmem>>, vector<1x128xf32>
    %4 = vector.broadcast %3 : vector<1x128xf32> to vector<128x128xf32>
    %5 = arith.addf %2, %4 : vector<128x128xf32>
    %c0_5 = arith.constant 0 : index
    %c0_6 = arith.constant 0 : index
    %6 = vector.load %arg4[%c0_5, %c0_6] : memref<1x128xf32, #tpu.memory_space<vmem>>, vector<1x128xf32>
    %cst_7 = arith.constant 0.000000e+00 : f32
    %7 = vector.broadcast %cst_7 : f32 to vector<128x128xf32>
    %8 = arith.maximumf %7, %5 : vector<128x128xf32>
    %9 = vector.broadcast %6 : vector<1x128xf32> to vector<128x128xf32>
    %10 = arith.minimumf %9, %8 : vector<128x128xf32>
    %c0_8 = arith.constant 0 : index
    %c0_9 = arith.constant 0 : index
    %11 = vector.load %arg5[%c0_8, %c0_9] : memref<1x128xf32, #tpu.memory_space<vmem>>, vector<1x128xf32>
    %12 = vector.broadcast %11 : vector<1x128xf32> to vector<128x128xf32>
    %13 = arith.subf %10, %12 : vector<128x128xf32>
    %14 = math.absf %13 : vector<128x128xf32>
    %cst_10 = arith.constant 1.000000e+00 : f32
    %15 = vector.broadcast %cst_10 : f32 to vector<128x128xf32>
    %16 = arith.subf %15, %14 : vector<128x128xf32>
    %cst_11 = arith.constant 0.000000e+00 : f32
    %17 = vector.broadcast %cst_11 : f32 to vector<128x128xf32>
    %18 = arith.maximumf %16, %17 : vector<128x128xf32>
    %c0_12 = arith.constant 0 : index
    %c0_13 = arith.constant 0 : index
    %19 = vector.load %arg6[%c0_12, %c0_13] : memref<128x64xf32, #tpu.memory_space<vmem>>, vector<128x64xf32>
    %cst_14 = arith.constant dense<0.000000e+00> : vector<128x64xf32>
    %20 = tpu.matmul %18, %19, %cst_14 {dimension_numbers = #tpu.dot_dimension_numbers<[1], [0], [0], [1], [0, 0, 1, 1], [], []>} : vector<128x128xf32>, vector<128x64xf32>, vector<128x64xf32> -> vector<128x64xf32>
    %c0_15 = arith.constant 0 : index
    %c0_16 = arith.constant 0 : index
    %21 = vector.load %arg7[%c0_15, %c0_16] : memref<128x64xf32, #tpu.memory_space<vmem>>, vector<128x64xf32>
    %cst_17 = arith.constant dense<0.000000e+00> : vector<128x64xf32>
    %22 = tpu.matmul %18, %21, %cst_17 {dimension_numbers = #tpu.dot_dimension_numbers<[1], [0], [0], [1], [0, 0, 1, 1], [], []>} : vector<128x128xf32>, vector<128x64xf32>, vector<128x64xf32> -> vector<128x64xf32>
    %23 = arith.mulf %20, %22 : vector<128x64xf32>
    %c0_18 = arith.constant 0 : index
    %c0_19 = arith.constant 0 : index
    %24 = vector.load %arg22[%c0_18, %c0_19] : memref<64x16xf32, #tpu.memory_space<vmem>>, vector<64x16xf32>
    %cst_20 = arith.constant dense<0.000000e+00> : vector<128x16xf32>
    %25 = tpu.matmul %23, %24, %cst_20 {dimension_numbers = #tpu.dot_dimension_numbers<[1], [0], [0], [1], [0, 0, 1, 1], [], []>} : vector<128x64xf32>, vector<64x16xf32>, vector<128x16xf32> -> vector<128x16xf32>
    %c0_21 = arith.constant 0 : index
    %c0_22 = arith.constant 0 : index
    %26 = vector.load %arg8[%c0_21, %c0_22] : memref<128x64xf32, #tpu.memory_space<vmem>>, vector<128x64xf32>
    %cst_23 = arith.constant dense<0.000000e+00> : vector<128x64xf32>
    %27 = tpu.matmul %18, %26, %cst_23 {dimension_numbers = #tpu.dot_dimension_numbers<[1], [0], [0], [1], [0, 0, 1, 1], [], []>} : vector<128x128xf32>, vector<128x64xf32>, vector<128x64xf32> -> vector<128x64xf32>
    %c0_24 = arith.constant 0 : index
    %c0_25 = arith.constant 0 : index
    %28 = vector.load %arg7[%c0_24, %c0_25] : memref<128x64xf32, #tpu.memory_space<vmem>>, vector<128x64xf32>
    %cst_26 = arith.constant dense<0.000000e+00> : vector<128x64xf32>
    %29 = tpu.matmul %18, %28, %cst_26 {dimension_numbers = #tpu.dot_dimension_numbers<[1], [0], [0], [1], [0, 0, 1, 1], [], []>} : vector<128x128xf32>, vector<128x64xf32>, vector<128x64xf32> -> vector<128x64xf32>
    %30 = arith.mulf %27, %29 : vector<128x64xf32>
    %c0_27 = arith.constant 0 : index
    %c0_28 = arith.constant 0 : index
    %31 = vector.load %arg23[%c0_27, %c0_28] : memref<64x16xf32, #tpu.memory_space<vmem>>, vector<64x16xf32>
    %cst_29 = arith.constant dense<0.000000e+00> : vector<128x16xf32>
    %32 = tpu.matmul %30, %31, %cst_29 {dimension_numbers = #tpu.dot_dimension_numbers<[1], [0], [0], [1], [0, 0, 1, 1], [], []>} : vector<128x64xf32>, vector<64x16xf32>, vector<128x16xf32> -> vector<128x16xf32>
    %33 = arith.mulf %25, %32 : vector<128x16xf32>
    %c0_30 = arith.constant 0 : index
    %c0_31 = arith.constant 0 : index
    %34 = vector.load %arg9[%c0_30, %c0_31] : memref<128x32xf32, #tpu.memory_space<vmem>>, vector<128x32xf32>
    %cst_32 = arith.constant dense<0.000000e+00> : vector<128x32xf32>
    %35 = tpu.matmul %18, %34, %cst_32 {dimension_numbers = #tpu.dot_dimension_numbers<[1], [0], [0], [1], [0, 0, 1, 1], [], []>} : vector<128x128xf32>, vector<128x32xf32>, vector<128x32xf32> -> vector<128x32xf32>
    %c0_33 = arith.constant 0 : index
    %c0_34 = arith.constant 0 : index
    %36 = vector.load %arg10[%c0_33, %c0_34] : memref<128x32xf32, #tpu.memory_space<vmem>>, vector<128x32xf32>
    %cst_35 = arith.constant dense<0.000000e+00> : vector<128x32xf32>
    %37 = tpu.matmul %18, %36, %cst_35 {dimension_numbers = #tpu.dot_dimension_numbers<[1], [0], [0], [1], [0, 0, 1, 1], [], []>} : vector<128x128xf32>, vector<128x32xf32>, vector<128x32xf32> -> vector<128x32xf32>
    %38 = arith.mulf %35, %37 : vector<128x32xf32>
    %c0_36 = arith.constant 0 : index
    %c0_37 = arith.constant 0 : index
    %39 = vector.load %arg24[%c0_36, %c0_37] : memref<32x16xf32, #tpu.memory_space<vmem>>, vector<32x16xf32>
    %cst_38 = arith.constant dense<0.000000e+00> : vector<128x16xf32>
    %40 = tpu.matmul %38, %39, %cst_38 {dimension_numbers = #tpu.dot_dimension_numbers<[1], [0], [0], [1], [0, 0, 1, 1], [], []>} : vector<128x32xf32>, vector<32x16xf32>, vector<128x16xf32> -> vector<128x16xf32>
    %41 = arith.mulf %33, %40 : vector<128x16xf32>
    %c0_39 = arith.constant 0 : index
    %c0_40 = arith.constant 0 : index
    %42 = vector.load %arg8[%c0_39, %c0_40] : memref<128x64xf32, #tpu.memory_space<vmem>>, vector<128x64xf32>
    %cst_41 = arith.constant dense<0.000000e+00> : vector<128x64xf32>
    %43 = tpu.matmul %18, %42, %cst_41 {dimension_numbers = #tpu.dot_dimension_numbers<[1], [0], [0], [1], [0, 0, 1, 1], [], []>} : vector<128x128xf32>, vector<128x64xf32>, vector<128x64xf32> -> vector<128x64xf32>
    %c0_42 = arith.constant 0 : index
    %c0_43 = arith.constant 0 : index
    %44 = vector.load %arg11[%c0_42, %c0_43] : memref<128x64xf32, #tpu.memory_space<vmem>>, vector<128x64xf32>
    %cst_44 = arith.constant dense<0.000000e+00> : vector<128x64xf32>
    %45 = tpu.matmul %18, %44, %cst_44 {dimension_numbers = #tpu.dot_dimension_numbers<[1], [0], [0], [1], [0, 0, 1, 1], [], []>} : vector<128x128xf32>, vector<128x64xf32>, vector<128x64xf32> -> vector<128x64xf32>
    %46 = arith.mulf %43, %45 : vector<128x64xf32>
    %c0_45 = arith.constant 0 : index
    %c0_46 = arith.constant 0 : index
    %47 = vector.load %arg25[%c0_45, %c0_46] : memref<64x16xf32, #tpu.memory_space<vmem>>, vector<64x16xf32>
    %cst_47 = arith.constant dense<0.000000e+00> : vector<128x16xf32>
    %48 = tpu.matmul %46, %47, %cst_47 {dimension_numbers = #tpu.dot_dimension_numbers<[1], [0], [0], [1], [0, 0, 1, 1], [], []>} : vector<128x64xf32>, vector<64x16xf32>, vector<128x16xf32> -> vector<128x16xf32>
    %49 = arith.mulf %41, %48 : vector<128x16xf32>
    %c0_48 = arith.constant 0 : index
    %c0_49 = arith.constant 0 : index
    %50 = vector.load %arg9[%c0_48, %c0_49] : memref<128x32xf32, #tpu.memory_space<vmem>>, vector<128x32xf32>
    %cst_50 = arith.constant dense<0.000000e+00> : vector<128x32xf32>
    %51 = tpu.matmul %18, %50, %cst_50 {dimension_numbers = #tpu.dot_dimension_numbers<[1], [0], [0], [1], [0, 0, 1, 1], [], []>} : vector<128x128xf32>, vector<128x32xf32>, vector<128x32xf32> -> vector<128x32xf32>
    %c0_51 = arith.constant 0 : index
    %c0_52 = arith.constant 0 : index
    %52 = vector.load %arg12[%c0_51, %c0_52] : memref<128x32xf32, #tpu.memory_space<vmem>>, vector<128x32xf32>
    %cst_53 = arith.constant dense<0.000000e+00> : vector<128x32xf32>
    %53 = tpu.matmul %18, %52, %cst_53 {dimension_numbers = #tpu.dot_dimension_numbers<[1], [0], [0], [1], [0, 0, 1, 1], [], []>} : vector<128x128xf32>, vector<128x32xf32>, vector<128x32xf32> -> vector<128x32xf32>
    %54 = arith.mulf %51, %53 : vector<128x32xf32>
    %c0_54 = arith.constant 0 : index
    %c0_55 = arith.constant 0 : index
    %55 = vector.load %arg26[%c0_54, %c0_55] : memref<32x16xf32, #tpu.memory_space<vmem>>, vector<32x16xf32>
    %cst_56 = arith.constant dense<0.000000e+00> : vector<128x16xf32>
    %56 = tpu.matmul %54, %55, %cst_56 {dimension_numbers = #tpu.dot_dimension_numbers<[1], [0], [0], [1], [0, 0, 1, 1], [], []>} : vector<128x32xf32>, vector<32x16xf32>, vector<128x16xf32> -> vector<128x16xf32>
    %57 = arith.mulf %49, %56 : vector<128x16xf32>
    %c0_57 = arith.constant 0 : index
    %c0_58 = arith.constant 0 : index
    %58 = vector.load %arg9[%c0_57, %c0_58] : memref<128x32xf32, #tpu.memory_space<vmem>>, vector<128x32xf32>
    %cst_59 = arith.constant dense<0.000000e+00> : vector<128x32xf32>
    %59 = tpu.matmul %18, %58, %cst_59 {dimension_numbers = #tpu.dot_dimension_numbers<[1], [0], [0], [1], [0, 0, 1, 1], [], []>} : vector<128x128xf32>, vector<128x32xf32>, vector<128x32xf32> -> vector<128x32xf32>
    %c0_60 = arith.constant 0 : index
    %c0_61 = arith.constant 0 : index
    %60 = vector.load %arg13[%c0_60, %c0_61] : memref<128x32xf32, #tpu.memory_space<vmem>>, vector<128x32xf32>
    %cst_62 = arith.constant dense<0.000000e+00> : vector<128x32xf32>
    %61 = tpu.matmul %18, %60, %cst_62 {dimension_numbers = #tpu.dot_dimension_numbers<[1], [0], [0], [1], [0, 0, 1, 1], [], []>} : vector<128x128xf32>, vector<128x32xf32>, vector<128x32xf32> -> vector<128x32xf32>
    %62 = arith.mulf %59, %61 : vector<128x32xf32>
    %c0_63 = arith.constant 0 : index
    %c0_64 = arith.constant 0 : index
    %63 = vector.load %arg27[%c0_63, %c0_64] : memref<32x16xf32, #tpu.memory_space<vmem>>, vector<32x16xf32>
    %cst_65 = arith.constant dense<0.000000e+00> : vector<128x16xf32>
    %64 = tpu.matmul %62, %63, %cst_65 {dimension_numbers = #tpu.dot_dimension_numbers<[1], [0], [0], [1], [0, 0, 1, 1], [], []>} : vector<128x32xf32>, vector<32x16xf32>, vector<128x16xf32> -> vector<128x16xf32>
    %65 = arith.mulf %57, %64 : vector<128x16xf32>
    %c0_66 = arith.constant 0 : index
    %c0_67 = arith.constant 0 : index
    %66 = vector.load %arg34[%c0_66, %c0_67] : memref<16x48xf32, #tpu.memory_space<vmem>>, vector<16x48xf32>
    %cst_68 = arith.constant dense<0.000000e+00> : vector<128x48xf32>
    %67 = tpu.matmul %65, %66, %cst_68 {dimension_numbers = #tpu.dot_dimension_numbers<[1], [0], [0], [1], [0, 0, 1, 1], [], []>} : vector<128x16xf32>, vector<16x48xf32>, vector<128x48xf32> -> vector<128x48xf32>
    %c0_69 = arith.constant 0 : index
    %c0_70 = arith.constant 0 : index
    %68 = vector.load %arg14[%c0_69, %c0_70] : memref<128x256xf32, #tpu.memory_space<vmem>>, vector<128x256xf32>
    %cst_71 = arith.constant dense<0.000000e+00> : vector<128x256xf32>
    %69 = tpu.matmul %18, %68, %cst_71 {dimension_numbers = #tpu.dot_dimension_numbers<[1], [0], [0], [1], [0, 0, 1, 1], [], []>} : vector<128x128xf32>, vector<128x256xf32>, vector<128x256xf32> -> vector<128x256xf32>
    %c0_72 = arith.constant 0 : index
    %c0_73 = arith.constant 0 : index
    %70 = vector.load %arg15[%c0_72, %c0_73] : memref<128x256xf32, #tpu.memory_space<vmem>>, vector<128x256xf32>
    %cst_74 = arith.constant dense<0.000000e+00> : vector<128x256xf32>
    %71 = tpu.matmul %18, %70, %cst_74 {dimension_numbers = #tpu.dot_dimension_numbers<[1], [0], [0], [1], [0, 0, 1, 1], [], []>} : vector<128x128xf32>, vector<128x256xf32>, vector<128x256xf32> -> vector<128x256xf32>
    %72 = arith.mulf %69, %71 : vector<128x256xf32>
    %c0_75 = arith.constant 0 : index
    %c0_76 = arith.constant 0 : index
    %73 = vector.load %arg28[%c0_75, %c0_76] : memref<256x16xf32, #tpu.memory_space<vmem>>, vector<256x16xf32>
    %cst_77 = arith.constant dense<0.000000e+00> : vector<128x16xf32>
    %74 = tpu.matmul %72, %73, %cst_77 {dimension_numbers = #tpu.dot_dimension_numbers<[1], [0], [0], [1], [0, 0, 1, 1], [], []>} : vector<128x256xf32>, vector<256x16xf32>, vector<128x16xf32> -> vector<128x16xf32>
    %c0_78 = arith.constant 0 : index
    %c0_79 = arith.constant 0 : index
    %75 = vector.load %arg16[%c0_78, %c0_79] : memref<128x256xf32, #tpu.memory_space<vmem>>, vector<128x256xf32>
    %cst_80 = arith.constant dense<0.000000e+00> : vector<128x256xf32>
    %76 = tpu.matmul %18, %75, %cst_80 {dimension_numbers = #tpu.dot_dimension_numbers<[1], [0], [0], [1], [0, 0, 1, 1], [], []>} : vector<128x128xf32>, vector<128x256xf32>, vector<128x256xf32> -> vector<128x256xf32>
    %c0_81 = arith.constant 0 : index
    %c0_82 = arith.constant 0 : index
    %77 = vector.load %arg15[%c0_81, %c0_82] : memref<128x256xf32, #tpu.memory_space<vmem>>, vector<128x256xf32>
    %cst_83 = arith.constant dense<0.000000e+00> : vector<128x256xf32>
    %78 = tpu.matmul %18, %77, %cst_83 {dimension_numbers = #tpu.dot_dimension_numbers<[1], [0], [0], [1], [0, 0, 1, 1], [], []>} : vector<128x128xf32>, vector<128x256xf32>, vector<128x256xf32> -> vector<128x256xf32>
    %79 = arith.mulf %76, %78 : vector<128x256xf32>
    %c0_84 = arith.constant 0 : index
    %c0_85 = arith.constant 0 : index
    %80 = vector.load %arg29[%c0_84, %c0_85] : memref<256x16xf32, #tpu.memory_space<vmem>>, vector<256x16xf32>
    %cst_86 = arith.constant dense<0.000000e+00> : vector<128x16xf32>
    %81 = tpu.matmul %79, %80, %cst_86 {dimension_numbers = #tpu.dot_dimension_numbers<[1], [0], [0], [1], [0, 0, 1, 1], [], []>} : vector<128x256xf32>, vector<256x16xf32>, vector<128x16xf32> -> vector<128x16xf32>
    %82 = arith.mulf %74, %81 : vector<128x16xf32>
    %c0_87 = arith.constant 0 : index
    %c0_88 = arith.constant 0 : index
    %83 = vector.load %arg17[%c0_87, %c0_88] : memref<128x64xf32, #tpu.memory_space<vmem>>, vector<128x64xf32>
    %cst_89 = arith.constant dense<0.000000e+00> : vector<128x64xf32>
    %84 = tpu.matmul %18, %83, %cst_89 {dimension_numbers = #tpu.dot_dimension_numbers<[1], [0], [0], [1], [0, 0, 1, 1], [], []>} : vector<128x128xf32>, vector<128x64xf32>, vector<128x64xf32> -> vector<128x64xf32>
    %c0_90 = arith.constant 0 : index
    %c0_91 = arith.constant 0 : index
    %85 = vector.load %arg18[%c0_90, %c0_91] : memref<128x64xf32, #tpu.memory_space<vmem>>, vector<128x64xf32>
    %cst_92 = arith.constant dense<0.000000e+00> : vector<128x64xf32>
    %86 = tpu.matmul %18, %85, %cst_92 {dimension_numbers = #tpu.dot_dimension_numbers<[1], [0], [0], [1], [0, 0, 1, 1], [], []>} : vector<128x128xf32>, vector<128x64xf32>, vector<128x64xf32> -> vector<128x64xf32>
    %87 = arith.mulf %84, %86 : vector<128x64xf32>
    %c0_93 = arith.constant 0 : index
    %c0_94 = arith.constant 0 : index
    %88 = vector.load %arg30[%c0_93, %c0_94] : memref<64x16xf32, #tpu.memory_space<vmem>>, vector<64x16xf32>
    %cst_95 = arith.constant dense<0.000000e+00> : vector<128x16xf32>
    %89 = tpu.matmul %87, %88, %cst_95 {dimension_numbers = #tpu.dot_dimension_numbers<[1], [0], [0], [1], [0, 0, 1, 1], [], []>} : vector<128x64xf32>, vector<64x16xf32>, vector<128x16xf32> -> vector<128x16xf32>
    %90 = arith.mulf %82, %89 : vector<128x16xf32>
    %c0_96 = arith.constant 0 : index
    %c0_97 = arith.constant 0 : index
    %91 = vector.load %arg16[%c0_96, %c0_97] : memref<128x256xf32, #tpu.memory_space<vmem>>, vector<128x256xf32>
    %cst_98 = arith.constant dense<0.000000e+00> : vector<128x256xf32>
    %92 = tpu.matmul %18, %91, %cst_98 {dimension_numbers = #tpu.dot_dimension_numbers<[1], [0], [0], [1], [0, 0, 1, 1], [], []>} : vector<128x128xf32>, vector<128x256xf32>, vector<128x256xf32> -> vector<128x256xf32>
    %c0_99 = arith.constant 0 : index
    %c0_100 = arith.constant 0 : index
    %93 = vector.load %arg19[%c0_99, %c0_100] : memref<128x256xf32, #tpu.memory_space<vmem>>, vector<128x256xf32>
    %cst_101 = arith.constant dense<0.000000e+00> : vector<128x256xf32>
    %94 = tpu.matmul %18, %93, %cst_101 {dimension_numbers = #tpu.dot_dimension_numbers<[1], [0], [0], [1], [0, 0, 1, 1], [], []>} : vector<128x128xf32>, vector<128x256xf32>, vector<128x256xf32> -> vector<128x256xf32>
    %95 = arith.mulf %92, %94 : vector<128x256xf32>
    %c0_102 = arith.constant 0 : index
    %c0_103 = arith.constant 0 : index
    %96 = vector.load %arg31[%c0_102, %c0_103] : memref<256x16xf32, #tpu.memory_space<vmem>>, vector<256x16xf32>
    %cst_104 = arith.constant dense<0.000000e+00> : vector<128x16xf32>
    %97 = tpu.matmul %95, %96, %cst_104 {dimension_numbers = #tpu.dot_dimension_numbers<[1], [0], [0], [1], [0, 0, 1, 1], [], []>} : vector<128x256xf32>, vector<256x16xf32>, vector<128x16xf32> -> vector<128x16xf32>
    %98 = arith.mulf %90, %97 : vector<128x16xf32>
    %c0_105 = arith.constant 0 : index
    %c0_106 = arith.constant 0 : index
    %99 = vector.load %arg17[%c0_105, %c0_106] : memref<128x64xf32, #tpu.memory_space<vmem>>, vector<128x64xf32>
    %cst_107 = arith.constant dense<0.000000e+00> : vector<128x64xf32>
    %100 = tpu.matmul %18, %99, %cst_107 {dimension_numbers = #tpu.dot_dimension_numbers<[1], [0], [0], [1], [0, 0, 1, 1], [], []>} : vector<128x128xf32>, vector<128x64xf32>, vector<128x64xf32> -> vector<128x64xf32>
    %c0_108 = arith.constant 0 : index
    %c0_109 = arith.constant 0 : index
    %101 = vector.load %arg20[%c0_108, %c0_109] : memref<128x64xf32, #tpu.memory_space<vmem>>, vector<128x64xf32>
    %cst_110 = arith.constant dense<0.000000e+00> : vector<128x64xf32>
    %102 = tpu.matmul %18, %101, %cst_110 {dimension_numbers = #tpu.dot_dimension_numbers<[1], [0], [0], [1], [0, 0, 1, 1], [], []>} : vector<128x128xf32>, vector<128x64xf32>, vector<128x64xf32> -> vector<128x64xf32>
    %103 = arith.mulf %100, %102 : vector<128x64xf32>
    %c0_111 = arith.constant 0 : index
    %c0_112 = arith.constant 0 : index
    %104 = vector.load %arg32[%c0_111, %c0_112] : memref<64x16xf32, #tpu.memory_space<vmem>>, vector<64x16xf32>
    %cst_113 = arith.constant dense<0.000000e+00> : vector<128x16xf32>
    %105 = tpu.matmul %103, %104, %cst_113 {dimension_numbers = #tpu.dot_dimension_numbers<[1], [0], [0], [1], [0, 0, 1, 1], [], []>} : vector<128x64xf32>, vector<64x16xf32>, vector<128x16xf32> -> vector<128x16xf32>
    %106 = arith.mulf %98, %105 : vector<128x16xf32>
    %c0_114 = arith.constant 0 : index
    %c0_115 = arith.constant 0 : index
    %107 = vector.load %arg17[%c0_114, %c0_115] : memref<128x64xf32, #tpu.memory_space<vmem>>, vector<128x64xf32>
    %cst_116 = arith.constant dense<0.000000e+00> : vector<128x64xf32>
    %108 = tpu.matmul %18, %107, %cst_116 {dimension_numbers = #tpu.dot_dimension_numbers<[1], [0], [0], [1], [0, 0, 1, 1], [], []>} : vector<128x128xf32>, vector<128x64xf32>, vector<128x64xf32> -> vector<128x64xf32>
    %c0_117 = arith.constant 0 : index
    %c0_118 = arith.constant 0 : index
    %109 = vector.load %arg21[%c0_117, %c0_118] : memref<128x64xf32, #tpu.memory_space<vmem>>, vector<128x64xf32>
    %cst_119 = arith.constant dense<0.000000e+00> : vector<128x64xf32>
    %110 = tpu.matmul %18, %109, %cst_119 {dimension_numbers = #tpu.dot_dimension_numbers<[1], [0], [0], [1], [0, 0, 1, 1], [], []>} : vector<128x128xf32>, vector<128x64xf32>, vector<128x64xf32> -> vector<128x64xf32>
    %111 = arith.mulf %108, %110 : vector<128x64xf32>
    %c0_120 = arith.constant 0 : index
    %c0_121 = arith.constant 0 : index
    %112 = vector.load %arg33[%c0_120, %c0_121] : memref<64x16xf32, #tpu.memory_space<vmem>>, vector<64x16xf32>
    %cst_122 = arith.constant dense<0.000000e+00> : vector<128x16xf32>
    %113 = tpu.matmul %111, %112, %cst_122 {dimension_numbers = #tpu.dot_dimension_numbers<[1], [0], [0], [1], [0, 0, 1, 1], [], []>} : vector<128x64xf32>, vector<64x16xf32>, vector<128x16xf32> -> vector<128x16xf32>
    %114 = arith.mulf %106, %113 : vector<128x16xf32>
    %c0_123 = arith.constant 0 : index
    %c0_124 = arith.constant 0 : index
    %115 = vector.load %arg35[%c0_123, %c0_124] : memref<16x48xf32, #tpu.memory_space<vmem>>, vector<16x48xf32>
    %cst_125 = arith.constant dense<0.000000e+00> : vector<128x48xf32>
    %116 = tpu.matmul %114, %115, %cst_125 {dimension_numbers = #tpu.dot_dimension_numbers<[1], [0], [0], [1], [0, 0, 1, 1], [], []>} : vector<128x16xf32>, vector<16x48xf32>, vector<128x48xf32> -> vector<128x48xf32>
    %117 = arith.addf %67, %116 : vector<128x48xf32>
    %c0_126 = arith.constant 0 : index
    %c0_127 = arith.constant 0 : index
    %118 = vector.load %arg36[%c0_126, %c0_127] : memref<1x48xf32, #tpu.memory_space<vmem>>, vector<1x48xf32>
    %119 = vector.broadcast %118 : vector<1x48xf32> to vector<128x48xf32>
    %120 = arith.addf %117, %119 : vector<128x48xf32>
    %cst_128 = arith.constant 0.000000e+00 : f32
    %121 = vector.broadcast %cst_128 : f32 to vector<128x48xf32>
    %122 = arith.maximumf %120, %121 : vector<128x48xf32>
    %c0_129 = arith.constant 0 : index
    %c0_130 = arith.constant 0 : index
    %123 = vector.load %arg37[%c0_129, %c0_130] : memref<48x16xf32, #tpu.memory_space<vmem>>, vector<48x16xf32>
    %cst_131 = arith.constant dense<0.000000e+00> : vector<128x16xf32>
    %124 = tpu.matmul %122, %123, %cst_131 {dimension_numbers = #tpu.dot_dimension_numbers<[1], [0], [0], [1], [0, 0, 1, 1], [], []>} : vector<128x48xf32>, vector<48x16xf32>, vector<128x16xf32> -> vector<128x16xf32>
    %c0_132 = arith.constant 0 : index
    %c0_133 = arith.constant 0 : index
    %125 = vector.load %arg38[%c0_132, %c0_133] : memref<1x16xf32, #tpu.memory_space<vmem>>, vector<1x16xf32>
    %126 = vector.broadcast %125 : vector<1x16xf32> to vector<128x16xf32>
    %127 = arith.addf %124, %126 : vector<128x16xf32>
    %c0_134 = arith.constant 0 : index
    %c0_135 = arith.constant 0 : index
    %128 = vector.load %arg39[%c0_134, %c0_135] : memref<128x16xf32, #tpu.memory_space<vmem>>, vector<128x16xf32>
    tpu.vector_store %arg39[%c0_134, %c0_135], %127 {strides = array<i32>} : memref<128x16xf32, #tpu.memory_space<vmem>>, vector<128x16xf32>,
    return
  }
  func.func @transform_0(%arg0: i32) -> (i32, i32) {
    %c0_i32 = arith.constant 0 : i32
    %c0_i32_0 = arith.constant 0 : i32
    return %arg0, %c0_i32 : i32, i32
  }
  func.func @transform_1(%arg0: i32) -> (i32, i32) {
    %c0_i32 = arith.constant 0 : i32
    %c0_i32_0 = arith.constant 0 : i32
    %c0_i32_1 = arith.constant 0 : i32
    return %c0_i32, %c0_i32_0 : i32, i32
  }
  func.func @transform_2(%arg0: i32) -> (i32, i32) {
    %c0_i32 = arith.constant 0 : i32
    %c0_i32_0 = arith.constant 0 : i32
    %c0_i32_1 = arith.constant 0 : i32
    return %c0_i32, %c0_i32_0 : i32, i32
  }
  func.func @transform_3(%arg0: i32) -> (i32, i32) {
    %c0_i32 = arith.constant 0 : i32
    %c0_i32_0 = arith.constant 0 : i32
    %c0_i32_1 = arith.constant 0 : i32
    return %c0_i32, %c0_i32_0 : i32, i32
  }
  func.func @transform_4(%arg0: i32) -> (i32, i32) {
    %c0_i32 = arith.constant 0 : i32
    %c0_i32_0 = arith.constant 0 : i32
    %c0_i32_1 = arith.constant 0 : i32
    return %c0_i32, %c0_i32_0 : i32, i32
  }
  func.func @transform_5(%arg0: i32) -> (i32, i32) {
    %c0_i32 = arith.constant 0 : i32
    %c0_i32_0 = arith.constant 0 : i32
    %c0_i32_1 = arith.constant 0 : i32
    return %c0_i32, %c0_i32_0 : i32, i32
  }
  func.func @transform_6(%arg0: i32) -> (i32, i32) {
    %c0_i32 = arith.constant 0 : i32
    %c0_i32_0 = arith.constant 0 : i32
    %c0_i32_1 = arith.constant 0 : i32
    return %c0_i32, %c0_i32_0 : i32, i32
  }
  func.func @transform_7(%arg0: i32) -> (i32, i32) {
    %c0_i32 = arith.constant 0 : i32
    %c0_i32_0 = arith.constant 0 : i32
    %c0_i32_1 = arith.constant 0 : i32
    return %c0_i32, %c0_i32_0 : i32, i32
  }
  func.func @transform_8(%arg0: i32) -> (i32, i32) {
    %c0_i32 = arith.constant 0 : i32
    %c0_i32_0 = arith.constant 0 : i32
    %c0_i32_1 = arith.constant 0 : i32
    return %c0_i32, %c0_i32_0 : i32, i32
  }
  func.func @transform_9(%arg0: i32) -> (i32, i32) {
    %c0_i32 = arith.constant 0 : i32
    %c0_i32_0 = arith.constant 0 : i32
    %c0_i32_1 = arith.constant 0 : i32
    return %c0_i32, %c0_i32_0 : i32, i32
  }
  func.func @transform_10(%arg0: i32) -> (i32, i32) {
    %c0_i32 = arith.constant 0 : i32
    %c0_i32_0 = arith.constant 0 : i32
    %c0_i32_1 = arith.constant 0 : i32
    return %c0_i32, %c0_i32_0 : i32, i32
  }
  func.func @transform_11(%arg0: i32) -> (i32, i32) {
    %c0_i32 = arith.constant 0 : i32
    %c0_i32_0 = arith.constant 0 : i32
    %c0_i32_1 = arith.constant 0 : i32
    return %c0_i32, %c0_i32_0 : i32, i32
  }
  func.func @transform_12(%arg0: i32) -> (i32, i32) {
    %c0_i32 = arith.constant 0 : i32
    %c0_i32_0 = arith.constant 0 : i32
    %c0_i32_1 = arith.constant 0 : i32
    return %c0_i32, %c0_i32_0 : i32, i32
  }
  func.func @transform_13(%arg0: i32) -> (i32, i32) {
    %c0_i32 = arith.constant 0 : i32
    %c0_i32_0 = arith.constant 0 : i32
    %c0_i32_1 = arith.constant 0 : i32
    return %c0_i32, %c0_i32_0 : i32, i32
  }
  func.func @transform_14(%arg0: i32) -> (i32, i32) {
    %c0_i32 = arith.constant 0 : i32
    %c0_i32_0 = arith.constant 0 : i32
    %c0_i32_1 = arith.constant 0 : i32
    return %c0_i32, %c0_i32_0 : i32, i32
  }
  func.func @transform_15(%arg0: i32) -> (i32, i32) {
    %c0_i32 = arith.constant 0 : i32
    %c0_i32_0 = arith.constant 0 : i32
    %c0_i32_1 = arith.constant 0 : i32
    return %c0_i32, %c0_i32_0 : i32, i32
  }
  func.func @transform_16(%arg0: i32) -> (i32, i32) {
    %c0_i32 = arith.constant 0 : i32
    %c0_i32_0 = arith.constant 0 : i32
    %c0_i32_1 = arith.constant 0 : i32
    return %c0_i32, %c0_i32_0 : i32, i32
  }
  func.func @transform_17(%arg0: i32) -> (i32, i32) {
    %c0_i32 = arith.constant 0 : i32
    %c0_i32_0 = arith.constant 0 : i32
    %c0_i32_1 = arith.constant 0 : i32
    return %c0_i32, %c0_i32_0 : i32, i32
  }
  func.func @transform_18(%arg0: i32) -> (i32, i32) {
    %c0_i32 = arith.constant 0 : i32
    %c0_i32_0 = arith.constant 0 : i32
    %c0_i32_1 = arith.constant 0 : i32
    return %c0_i32, %c0_i32_0 : i32, i32
  }
  func.func @transform_19(%arg0: i32) -> (i32, i32) {
    %c0_i32 = arith.constant 0 : i32
    %c0_i32_0 = arith.constant 0 : i32
    %c0_i32_1 = arith.constant 0 : i32
    return %c0_i32, %c0_i32_0 : i32, i32
  }
  func.func @transform_20(%arg0: i32) -> (i32, i32) {
    %c0_i32 = arith.constant 0 : i32
    %c0_i32_0 = arith.constant 0 : i32
    %c0_i32_1 = arith.constant 0 : i32
    return %c0_i32, %c0_i32_0 : i32, i32
  }
  func.func @transform_21(%arg0: i32) -> (i32, i32) {
    %c0_i32 = arith.constant 0 : i32
    %c0_i32_0 = arith.constant 0 : i32
    %c0_i32_1 = arith.constant 0 : i32
    return %c0_i32, %c0_i32_0 : i32, i32
  }
  func.func @transform_22(%arg0: i32) -> (i32, i32) {
    %c0_i32 = arith.constant 0 : i32
    %c0_i32_0 = arith.constant 0 : i32
    %c0_i32_1 = arith.constant 0 : i32
    return %c0_i32, %c0_i32_0 : i32, i32
  }
  func.func @transform_23(%arg0: i32) -> (i32, i32) {
    %c0_i32 = arith.constant 0 : i32
    %c0_i32_0 = arith.constant 0 : i32
    %c0_i32_1 = arith.constant 0 : i32
    return %c0_i32, %c0_i32_0 : i32, i32
  }
  func.func @transform_24(%arg0: i32) -> (i32, i32) {
    %c0_i32 = arith.constant 0 : i32
    %c0_i32_0 = arith.constant 0 : i32
    %c0_i32_1 = arith.constant 0 : i32
    return %c0_i32, %c0_i32_0 : i32, i32
  }
  func.func @transform_25(%arg0: i32) -> (i32, i32) {
    %c0_i32 = arith.constant 0 : i32
    %c0_i32_0 = arith.constant 0 : i32
    %c0_i32_1 = arith.constant 0 : i32
    return %c0_i32, %c0_i32_0 : i32, i32
  }
  func.func @transform_26(%arg0: i32) -> (i32, i32) {
    %c0_i32 = arith.constant 0 : i32
    %c0_i32_0 = arith.constant 0 : i32
    %c0_i32_1 = arith.constant 0 : i32
    return %c0_i32, %c0_i32_0 : i32, i32
  }
  func.func @transform_27(%arg0: i32) -> (i32, i32) {
    %c0_i32 = arith.constant 0 : i32
    %c0_i32_0 = arith.constant 0 : i32
    %c0_i32_1 = arith.constant 0 : i32
    return %c0_i32, %c0_i32_0 : i32, i32
  }
  func.func @transform_28(%arg0: i32) -> (i32, i32) {
    %c0_i32 = arith.constant 0 : i32
    %c0_i32_0 = arith.constant 0 : i32
    %c0_i32_1 = arith.constant 0 : i32
    return %c0_i32, %c0_i32_0 : i32, i32
  }
  func.func @transform_29(%arg0: i32) -> (i32, i32) {
    %c0_i32 = arith.constant 0 : i32
    %c0_i32_0 = arith.constant 0 : i32
    %c0_i32_1 = arith.constant 0 : i32
    return %c0_i32, %c0_i32_0 : i32, i32
  }
  func.func @transform_30(%arg0: i32) -> (i32, i32) {
    %c0_i32 = arith.constant 0 : i32
    %c0_i32_0 = arith.constant 0 : i32
    %c0_i32_1 = arith.constant 0 : i32
    return %c0_i32, %c0_i32_0 : i32, i32
  }
  func.func @transform_31(%arg0: i32) -> (i32, i32) {
    %c0_i32 = arith.constant 0 : i32
    %c0_i32_0 = arith.constant 0 : i32
    %c0_i32_1 = arith.constant 0 : i32
    return %c0_i32, %c0_i32_0 : i32, i32
  }
  func.func @transform_32(%arg0: i32) -> (i32, i32) {
    %c0_i32 = arith.constant 0 : i32
    %c0_i32_0 = arith.constant 0 : i32
    %c0_i32_1 = arith.constant 0 : i32
    return %c0_i32, %c0_i32_0 : i32, i32
  }
  func.func @transform_33(%arg0: i32) -> (i32, i32) {
    %c0_i32 = arith.constant 0 : i32
    %c0_i32_0 = arith.constant 0 : i32
    %c0_i32_1 = arith.constant 0 : i32
    return %c0_i32, %c0_i32_0 : i32, i32
  }
  func.func @transform_34(%arg0: i32) -> (i32, i32) {
    %c0_i32 = arith.constant 0 : i32
    %c0_i32_0 = arith.constant 0 : i32
    %c0_i32_1 = arith.constant 0 : i32
    return %c0_i32, %c0_i32_0 : i32, i32
  }
  func.func @transform_35(%arg0: i32) -> (i32, i32) {
    %c0_i32 = arith.constant 0 : i32
    %c0_i32_0 = arith.constant 0 : i32
    %c0_i32_1 = arith.constant 0 : i32
    return %c0_i32, %c0_i32_0 : i32, i32
  }
  func.func @transform_36(%arg0: i32) -> (i32, i32) {
    %c0_i32 = arith.constant 0 : i32
    %c0_i32_0 = arith.constant 0 : i32
    %c0_i32_1 = arith.constant 0 : i32
    return %c0_i32, %c0_i32_0 : i32, i32
  }
  func.func @transform_37(%arg0: i32) -> (i32, i32) {
    %c0_i32 = arith.constant 0 : i32
    %c0_i32_0 = arith.constant 0 : i32
    %c0_i32_1 = arith.constant 0 : i32
    return %c0_i32, %c0_i32_0 : i32, i32
  }
  func.func @transform_38(%arg0: i32) -> (i32, i32) {
    %c0_i32 = arith.constant 0 : i32
    %c0_i32_0 = arith.constant 0 : i32
    return %arg0, %c0_i32 : i32, i32
  }
}

</mosaic_0001>

<bundles_post_ra>
// kernel: tpu_custom_call.1
= control target key start
LH: loop header
LB: loop body
LE: loop exit
PB: predicated region body
PF: predicated region fallthrough
CT: control target
= control target key end

     0   :  { %s9975_s6 = smov 1   ;;  %s9976_s10 = smov 2   ;;  %s12460_s0 = inlined_call_operand.smem [shape: u32[39], index: -1, kind: input, shape index: {}] }
   0x1   :  { %s10022_s5 = sld [smem:[%s12460_s0]]   ;;  %s9977_s14 = smov 3  }
   0x2   :  { %s10027_s9 = sld [smem:[%s12460_s0 + %s9975_s6]]   ;;  %s9978_s18 = smov 4  }
   0x3   :  { %s10032_s13 = sld [smem:[%s12460_s0 + %s9976_s10]]   ;;  %s9979_s22 = smov 5  }
   0x4   :  { %s10037_s17 = sld [smem:[%s12460_s0 + %s9977_s14]]   ;;  %s9980_s26 = smov 6  }
   0x5   :  { %s10042_s21 = sld [smem:[%s12460_s0 + %s9978_s18]]   ;;  %s9981_s30 = smov 7  }
   0x6   :  { %s10047_s25 = sld [smem:[%s12460_s0 + %s9979_s22]]   ;;  %s9982_s4 = smov 8  }
   0x7   :  { %s10052_s29 = sld [smem:[%s12460_s0 + %s9980_s26]]   ;;  %s9983_s10 = smov 9  }
   0x8   :  { %s10057_s3 = sld [smem:[%s12460_s0 + %s9981_s30]]   ;;  %s9984_s15 = smov 10  }
   0x9   :  { %s10062_s8 = sld [smem:[%s12460_s0 + %s9982_s4]]   ;;  %s9985_s20 = smov 11  }
   0xa   :  { %s10067_s14 = sld [smem:[%s12460_s0 + %s9983_s10]]   ;;  %s9986_s26 = smov 12  }
   0xb   :  { %s10072_s19 = sld [smem:[%s12460_s0 + %s9984_s15]]   ;;  %s9987_s1 = smov 13  }
   0xc   :  { %s10077_s24 = sld [smem:[%s12460_s0 + %s9985_s20]]   ;;  %s9988_s7 = smov 14  }
   0xd   :  { %s10082_s30 = sld [smem:[%s12460_s0 + %s9986_s26]]   ;;  %s9989_s15 = smov 15  }
   0xe   :  { %12497 = sst [smem:[#allocation2_spill]] %s10057_s3  ;;  %s9990_s22 = smov 16  }
   0xf   :  { %s10087_s6 = sld [smem:[%s12460_s0 + %s9987_s1]]   ;;  %s9991_s28 = smov 17  }
  0x10   :  { %s10092_s12 = sld [smem:[%s12460_s0 + %s9988_s7]]   ;;  %s9992_s7 = smov 18  }
  0x11   :  { %s10097_s20 = sld [smem:[%s12460_s0 + %s9989_s15]]   ;;  %s9993_s15 = smov 19  }
  0x12   :  { %s10102_s27 = sld [smem:[%s12460_s0 + %s9990_s22]]   ;;  %s9994_s22 = smov 20  }
  0x13   :  { %12498 = sst [smem:[#allocation3_spill]] %s10082_s30 }
  0x14   :  { %s10107_s4 = sld [smem:[%s12460_s0 + %s9991_s28]]   ;;  %s9995_s28 = smov 21  }
  0x15   :  { %12499 = sst [smem:[#allocation4_spill]] %s10087_s6 }
  0x16   :  { %12500 = sst [smem:[#allocation5_spill]] %s10092_s12 }
  0x17   :  { %12501 = sst [smem:[#allocation6_spill]] %s10097_s20 }
  0x18   :  { %12502 = sst [smem:[#allocation7_spill]] %s10102_s27 }
  0x19   :  { %s10112_s12 = sld [smem:[%s12460_s0 + %s9992_s7]]   ;;  %s9996_s7 = smov 22  }
  0x1a   :  { %12503 = sst [smem:[#allocation8_spill]] %s10107_s4 }
  0x1b   :  { %s10117_s20 = sld [smem:[%s12460_s0 + %s9993_s15]]   ;;  %s9997_s15 = smov 23  }
  0x1c   :  { %s10122_s27 = sld [smem:[%s12460_s0 + %s9994_s22]]   ;;  %s9998_s22 = smov 24  }
  0x1d   :  { %s10127_s4 = sld [smem:[%s12460_s0 + %s9995_s28]]   ;;  %s9999_s28 = smov 25  }
  0x1e   :  { %s10147_s6 = sld [smem:[%s12460_s0 + %s9999_s28]]   ;;  %s10003_s28 = smov 29  }
  0x1f   :  { %12504 = sst [smem:[#allocation9_spill]] %s10112_s12 }
  0x20   :  { %s10132_s12 = sld [smem:[%s12460_s0 + %s9996_s7]]   ;;  %s10000_s7 = smov 26  }
  0x21   :  { %12505 = sst [smem:[#allocation10_spill]] %s10117_s20 }
  0x22   :  { %12506 = sst [smem:[#allocation11_spill]] %s10122_s27 }
  0x23   :  { %s10137_s20 = sld [smem:[%s12460_s0 + %s9997_s15]]   ;;  %s10001_s15 = smov 27  }
  0x24   :  { %s10142_s27 = sld [smem:[%s12460_s0 + %s9998_s22]]   ;;  %s10002_s22 = smov 28  }
  0x25   :  { %12509 = sst [smem:[#allocation14_spill]] %s10147_s6 }
  0x26   :  { %s10152_s30 = sld [smem:[%s12460_s0 + %s10000_s7]]   ;;  %s10004_s7 = smov 30  }
  0x27   :  { %s10167_s6 = sld [smem:[%s12460_s0 + %s10003_s28]]   ;;  %s10007_s28 = smov 33  }
  0x29   :  { %12507 = sst [smem:[#allocation12_spill]] %s10137_s20 }
  0x2a   :  { %12508 = sst [smem:[#allocation13_spill]] %s10142_s27 }
  0x2b   :  { %s10157_s20 = sld [smem:[%s12460_s0 + %s10001_s15]]   ;;  %s10005_s15 = smov 31  }
  0x2c   :  { %12510 = sst [smem:[#allocation15_spill]] %s10152_s30 }
  0x2d   :  { %s10162_s27 = sld [smem:[%s12460_s0 + %s10002_s22]]   ;;  %s10006_s22 = smov 32  }
  0x2e   :  { %12513 = sst [smem:[#allocation18_spill]] %s10167_s6 }
  0x2f   :  { %s10172_s30 = sld [smem:[%s12460_s0 + %s10004_s7]]   ;;  %s10008_s7 = smov 34  }
  0x30   :  { %s10187_s6 = sld [smem:[%s12460_s0 + %s10007_s28]]   ;;  %s10011_s28 = smov 37  }
  0x31   :  { %12511 = sst [smem:[#allocation16_spill]] %s10157_s20 }
  0x32   :  { %s10177_s20 = sld [smem:[%s12460_s0 + %s10005_s15]]   ;;  %s10009_s15 = smov 35  }
  0x33   :  { %12512 = sst [smem:[#allocation17_spill]] %s10162_s27 }
  0x34   :  { %s10182_s27 = sld [smem:[%s12460_s0 + %s10006_s22]]   ;;  %s10010_s22 = smov 36  }
  0x35   :  { %12514 = sst [smem:[#allocation19_spill]] %s10172_s30 }
  0x36   :  { %12517 = sst [smem:[#allocation22_spill]] %s10187_s6 }
  0x37   :  { %s10192_s30 = sld [smem:[%s12460_s0 + %s10008_s7]]   ;;  %s10012_s7 = smov 38  }
  0x38   :  { %12515 = sst [smem:[#allocation20_spill]] %s10177_s20 }
  0x39   :  { %s10197_s20 = sld [smem:[%s12460_s0 + %s10009_s15]]   ;;  %s10214_s15 = smov 0  }
  0x3a   :  { %12516 = sst [smem:[#allocation21_spill]] %s10182_s27 }
  0x3b   :  { %s10202_s27 = sld [smem:[%s12460_s0 + %s10010_s22]]  }
  0x3c   :  { %s10207_s6 = sld [smem:[%s12460_s0 + %s10011_s28]]  }
  0x3d   :  { %12518 = sst [smem:[#allocation23_spill]] %s10192_s30 }
  0x3e   :  { %s10212_s30 = sld [smem:[%s12460_s0 + %s10012_s7]]  }
  0x3f LB: > { %s12519_s3 = sld [smem:[#allocation2_spill]]  ;;  %s7667_s16 = sadd.s32 4294967295, %s9973_s15   ;;  %s9973_s15 = sphi %s10214_s15, %s87_s15  }
  0x40   : > { %p7671_p0 = scmp.ge.s32.totalorder %s9973_s15, 1  ;;  %p1052_p1 = scmp.lt.s32.totalorder %s9973_s15, 9 }
  0x42   : > { %p1053_p2 = pnand %p7671_p0, %p1052_p1 }
  0x44   : > { %1056 = sbr.rel (%p1053_p2) target bundleno = 1996 (0x7cc), region = 172 }
  0x49   : > { %v1174_v0 = vld [vmem:[%s10027_s9] sm:$0xff]  ;;  %s7672_s0 = sshll.u32 %s7667_s16, 4  ;;  %v1662_v1 = vld [vmem:[%s10052_s29 + $0x78] sm:$0xff]  ;;  %v1500_v3 = vld [vmem:[%s10047_s25 + $0x70] sm:$0xff]  ;;  %vm1182_vm0 = vcmask 64512   ;;  %vm1832_vm1 = vcmask 523264  }
  0x4a   : > { %v1501_v2 = vld [vmem:[%s10047_s25 + $0x78] sm:$0xff]  ;;  %8794 = vmatprep.subr.mxu0 %v1174_v0  ;;  %p1147_p3 = scmp.lt.s32.totalorder %s7672_s0, 127  ;;  %v1499_v4 = vld [vmem:[%s10047_s25 + $0x68] sm:$0xff]  ;;  %v1498_v5 = vld [vmem:[%s10047_s25 + $0x60] sm:$0xff]  ;;  %s12520_s23 = sld [smem:[#allocation12_spill]]  ;;  %vm2762_vm2 = vcmask 261120  }
  0x4b   : > { %8820 = vmatprep.subr.mxu1 %v1501_v2  ;;  %8795 = vmatpush3.msra.mxu0 %v1174_v0  ;;  %v1497_v6 = vld [vmem:[%s10047_s25 + $0x58] sm:$0xff]  ;;  %v1661_v10 = vld [vmem:[%s10052_s29 + $0x70] sm:$0xff]  ;;  %v1660_v13 = vld [vmem:[%s10052_s29 + $0x68] sm:$0xff]  ;;  %s12521_s26 = sld [smem:[#allocation3_spill]]  ;;  %vm6924_vm3 = vcmask 130048   ;;  %vm7363_vm4 = vcmask 392192  }
  0x4c   : > { %8821 = vmatpush3.msra.mxu1 %v1501_v2  ;;  %s12612_s0 = smov (!%p1147_p3, %s7672_s0), 127  ;;  %8876 = vmatprep.subr.mxu0 %v1662_v1  ;;  %v1496_v11 = vld [vmem:[%s10047_s25 + $0x50] sm:$0xff]  ;;  %v1659_v15 = vld [vmem:[%s10052_s29 + $0x60] sm:$0xff]  ;;  %v1495_v16 = vld [vmem:[%s10047_s25 + $0x48] sm:$0xff]  ;;  %s12522_s28 = sld [smem:[#allocation13_spill]] }
  0x4d   : > { %8822 = vmatprep.subr.mxu1 %v1500_v3  ;;  %s12484_s18 = sshll.u32 %s12612_s0, 3  ;;  %v1658_v18 = vld [vmem:[%s10052_s29 + $0x58] sm:$0xff]  ;;  %v1657_v20 = vld [vmem:[%s10052_s29 + $0x50] sm:$0xff]  ;;  %v1656_v22 = vld [vmem:[%s10052_s29 + $0x48] sm:$0xff]  ;;  %s12523_s1 = sld [smem:[#allocation4_spill]] }
  0x4e   : > { %8823 = vmatpush3.msra.mxu1 %v1500_v3  ;;  %s10234_s22 = scalar_lea.vmem %s10022_s5, %s12484_s18  ;;  %v1655_v24 = vld [vmem:[%s10052_s29 + $0x40] sm:$0xff]  ;;  %v1654_v33 = vld [vmem:[%s10052_s29 + $0x38] sm:$0xff]  ;;  %v1653_v35 = vld [vmem:[%s10052_s29 + $0x30] sm:$0xff]  ;;  %s12544_s2 = sld [smem:[#allocation14_spill]] }
  0x4f   : > { %8824 = vmatprep.subr.mxu1 %v1499_v4  ;;  %v1158_v7 = vld [vmem:[%s10234_s22] sm:$0xff]  ;;  %v1159_v8 = vld [vmem:[%s10234_s22 + $0x8] sm:$0xff]  ;;  %v1160_v9 = vld [vmem:[%s10234_s22 + $0x10] sm:$0xff]  ;;  %s12545_s7 = sld [smem:[#allocation15_spill]] }
  0x50   : > { %8825 = vmatpush3.msra.mxu1 %v1499_v4  ;;  %8796 = vmatprep.mubr.msk.f32.mxu0 %vm1182_vm0, %v1158_v7  ;;  %v1161_v12 = vld [vmem:[%s10234_s22 + $0x18] sm:$0xff]  ;;  %v1162_v14 = vld [vmem:[%s10234_s22 + $0x20] sm:$0xff]  ;;  %v1163_v17 = vld [vmem:[%s10234_s22 + $0x28] sm:$0xff]  ;;  %s12546_s10 = sld [smem:[#allocation5_spill]] }
  0x51   : > { %8826 = vmatprep.subr.mxu1 %v1498_v5  ;;  %8797 = vmatmul.mubr.msk.f32.vlgmr.msra.gmra.mxu0 %vm1182_vm0, %v1159_v8  ;;  %v1164_v19 = vld [vmem:[%s10234_s22 + $0x30] sm:$0xff]  ;;  %v1165_v21 = vld [vmem:[%s10234_s22 + $0x38] sm:$0xff]  ;;  %v1166_v23 = vld [vmem:[%s10234_s22 + $0x40] sm:$0xff]  ;;  %s12547_s11 = sld [smem:[#allocation6_spill]] }
  0x52   : > { %8827 = vmatpush3.msra.mxu1 %v1498_v5  ;;  %8799 = vmatprep.mubr.msk.f32.mxu0 %vm1182_vm0, %v1160_v9  ;;  %v1167_v25 = vld [vmem:[%s10234_s22 + $0x48] sm:$0xff]  ;;  %v1168_v26 = vld [vmem:[%s10234_s22 + $0x50] sm:$0xff]  ;;  %v1169_v27 = vld [vmem:[%s10234_s22 + $0x58] sm:$0xff]  ;;  %s12549_s16 = sld [smem:[#allocation7_spill]] }
  0x53   : > { %8828 = vmatprep.subr.mxu1 %v1497_v6  ;;  %8877 = vmatpush3.msra.mxu0 %v1662_v1  ;;  %v1170_v28 = vld [vmem:[%s10234_s22 + $0x60] sm:$0xff]  ;;  %v1171_v29 = vld [vmem:[%s10234_s22 + $0x68] sm:$0xff]  ;;  %v1172_v30 = vld [vmem:[%s10234_s22 + $0x70] sm:$0xff]  ;;  %s12568_s18 = sld [smem:[#allocation8_spill]] }
  0x54   : > { %8878 = vmatprep.subr.mxu0 %v1661_v10  ;;  %8829 = vmatpush3.msra.mxu1 %v1497_v6  ;;  %v1173_v31 = vld [vmem:[%s10234_s22 + $0x78] sm:$0xff]  ;;  %v1494_v32 = vld [vmem:[%s10047_s25 + $0x40] sm:$0xff]  ;;  %v1492_v36 = vld [vmem:[%s10047_s25 + $0x30] sm:$0xff]  ;;  %s12550_s22 = sld [smem:[#allocation16_spill]] }
  0x55   : > { %8879 = vmatpush3.msra.mxu0 %v1661_v10  ;;  %8830 = vmatprep.subr.mxu1 %v1496_v11  ;;  %v1493_v34 = vld [vmem:[%s10047_s25 + $0x38] sm:$0xff]  ;;  %v1652_v37 = vld [vmem:[%s10052_s29 + $0x28] sm:$0xff]  ;;  %v1651_v39 = vld [vmem:[%s10052_s29 + $0x20] sm:$0xff] }
  0x56   : > { %8800 = vmatmul.mubr.msk.f32.gmra.mxu0 %vm1182_vm0, %v1161_v12  ;;  %8880 = vmatprep.subr.mxu0 %v1660_v13  ;;  %v1491_v38 = vld [vmem:[%s10047_s25 + $0x28] sm:$0xff]  ;;  %v1490_v40 = vld [vmem:[%s10047_s25 + $0x20] sm:$0xff]  ;;  %v1650_v41 = vld [vmem:[%s10052_s29 + $0x18] sm:$0xff] }
  0x57   : > { %8802 = vmatprep.mubr.msk.f32.mxu0 %vm1182_vm0, %v1162_v14  ;;  %8881 = vmatpush3.msra.mxu0 %v1660_v13  ;;  %v1489_v42 = vld [vmem:[%s10047_s25 + $0x18] sm:$0xff]  ;;  %v1649_v43 = vld [vmem:[%s10052_s29 + $0x10] sm:$0xff]  ;;  %v1648_v45 = vld [vmem:[%s10052_s29 + $0x8] sm:$0xff] }
  0x58   : > { %8882 = vmatprep.subr.mxu0 %v1659_v15  ;;  %8831 = vmatpush3.msra.mxu1 %v1496_v11  ;;  %v1488_v44 = vld [vmem:[%s10047_s25 + $0x10] sm:$0xff]  ;;  %v1487_v46 = vld [vmem:[%s10047_s25 + $0x8] sm:$0xff]  ;;  %v1647_v47 = vld [vmem:[%s10052_s29] sm:$0xff] }
  0x59   : > { %8883 = vmatpush3.msra.mxu0 %v1659_v15  ;;  %8832 = vmatprep.subr.mxu1 %v1495_v16  ;;  %v1486_v48 = vld [vmem:[%s10047_s25] sm:$0xff]  ;;  %v10296_v49 = vld [vmem:[%s12519_s3 + $0x78] sm:$0xff] }
  0x5a   : > { %8803 = vmatmul.mubr.msk.f32.gmra.mxu0 %vm1182_vm0, %v1163_v17  ;;  %8884 = vmatprep.subr.mxu0 %v1658_v18  ;;  %v10300_v50 = vld [vmem:[%s10127_s4 + $0x38] sm:$0xff]  ;;  %v10304_v51 = vld [vmem:[%s10032_s13] ss:$0 sm:$0xff] }
  0x5b   : > { %8805 = vmatprep.mubr.msk.f32.mxu0 %vm1182_vm0, %v1164_v19  ;;  %8885 = vmatpush3.msra.mxu0 %v1658_v18  ;;  %v10308_v54 = vld [vmem:[%s10037_s17] ss:$0 sm:$0xff] }
  0x5c   : > { %8886 = vmatprep.subr.mxu0 %v1657_v20  ;;  %8833 = vmatpush3.msra.mxu1 %v1495_v16  ;;  %v10312_v58 = vld [vmem:[%s10042_s21] ss:$0 sm:$0xff] }
  0x5d   : > { %8887 = vmatpush3.msra.mxu0 %v1657_v20  ;;  %8834 = vmatprep.subr.mxu1 %v1494_v32 }
  0x5e   : > { %8806 = vmatmul.mubr.msk.f32.gmra.mxu0 %vm1182_vm0, %v1165_v21  ;;  %8888 = vmatprep.subr.mxu0 %v1656_v22 }
  0x5f   : > { %8808 = vmatprep.mubr.msk.f32.mxu0 %vm1182_vm0, %v1166_v23  ;;  %8889 = vmatpush3.msra.mxu0 %v1656_v22 }
  0x60   : > { %8890 = vmatprep.subr.mxu0 %v1655_v24  ;;  %8835 = vmatpush3.msra.mxu1 %v1494_v32 }
  0x61   : > { %8891 = vmatpush3.msra.mxu0 %v1655_v24  ;;  %8836 = vmatprep.subr.mxu1 %v1493_v34 }
  0x62   : > { %8809 = vmatmul.mubr.msk.f32.gmra.mxu0 %vm1182_vm0, %v1167_v25  ;;  %8892 = vmatprep.subr.mxu0 %v1654_v33 }
  0x63   : > { %8811 = vmatprep.mubr.msk.f32.mxu0 %vm1182_vm0, %v1168_v26  ;;  %8893 = vmatpush3.msra.mxu0 %v1654_v33 }
  0x64   : > { %8837 = vmatpush3.msra.mxu1 %v1493_v34  ;;  %8894 = vmatprep.subr.mxu0 %v1653_v35 }
  0x65   : > { %8838 = vmatprep.subr.mxu1 %v1492_v36  ;;  %8895 = vmatpush3.msra.mxu0 %v1653_v35 }
  0x66   : > { %8812 = vmatmul.mubr.msk.f32.gmra.mxu0 %vm1182_vm0, %v1169_v27  ;;  %8839 = vmatpush3.msra.mxu1 %v1492_v36 }
  0x67   : > { %8814 = vmatprep.mubr.msk.f32.mxu0 %vm1182_vm0, %v1170_v28  ;;  %8896 = vmatprep.subr.mxu0 %v1652_v37 }
  0x68   : > { %8840 = vmatprep.subr.mxu1 %v1491_v38  ;;  %8897 = vmatpush3.msra.mxu0 %v1652_v37  ;;  %v2040_v37 = vld [vmem:[%s12519_s3 + $0x70] sm:$0xff] }
  0x69   : > { %8841 = vmatpush3.msra.mxu1 %v1491_v38  ;;  %8898 = vmatprep.subr.mxu0 %v1651_v39  ;;  %v1830_v38 = vld [vmem:[%s10127_s4 + $0x30] sm:$0xff] }
  0x6a   : > { %8815 = vmatmul.mubr.msk.f32.gmra.mxu0 %vm1182_vm0, %v1171_v29  ;;  %8842 = vmatprep.subr.mxu1 %v1490_v40 }
  0x6b   : > { %8817 = vmatprep.mubr.msk.f32.mxu0 %vm1182_vm0, %v1172_v30  ;;  %8899 = vmatpush3.msra.mxu0 %v1651_v39 }
  0x6c   : > { %8843 = vmatpush3.msra.mxu1 %v1490_v40  ;;  %8900 = vmatprep.subr.mxu0 %v1650_v41 }
  0x6d   : > { %8844 = vmatprep.subr.mxu1 %v1489_v42  ;;  %8901 = vmatpush3.msra.mxu0 %v1650_v41 }
  0x6e   : > { %8818 = vmatmul.mubr.msk.f32.gmra.mxu0 %vm1182_vm0, %v1173_v31  ;;  %8845 = vmatpush3.msra.mxu1 %v1489_v42 }
  0x6f   : > { %8902 = vmatprep.subr.mxu0 %v1649_v43  ;;  %8846 = vmatprep.subr.mxu1 %v1488_v44 }
  0x70   : > { %8903 = vmatpush3.msra.mxu0 %v1649_v43  ;;  %8847 = vmatpush3.msra.mxu1 %v1488_v44 }
  0x71   : > { %8904 = vmatprep.subr.mxu0 %v1648_v45  ;;  %8848 = vmatprep.subr.mxu1 %v1487_v46 }
  0x72   : > { %8905 = vmatpush3.msra.mxu0 %v1648_v45  ;;  %8849 = vmatpush3.msra.mxu1 %v1487_v46 }
  0x73   : > { %8906 = vmatprep.subr.mxu0 %v1647_v47  ;;  %8850 = vmatprep.subr.mxu1 %v1486_v48 }
  0x74   : > { %8907 = vmatpush3.msra.mxu0 %v1647_v47  ;;  %8851 = vmatpush3.msra.mxu1 %v1486_v48  ;;  %v2039_v47 = vld [vmem:[%s12519_s3 + $0x68] sm:$0xff] }
  0x75   : > { %8972 = vmatprep.subr.mxu0 %v10296_v49  ;;  %8932 = vmatprep.subr.mxu1 %v10300_v50 }
 0x111   : > { %v8798_v52 = vpop.f32.mrf.mxu0 }
 0x112   : > { %v1303_v53 = vadd.f32 %v8798_v52, %v10304_v51 }
 0x113   : > { %v1297_v55 = vpop.f32.mrf.mxu0 }
 0x114   : > { %v1378_v56 = vmax.f32 %v1303_v53, 0.0  ;;  %v1298_v57 = vadd.f32 %v10304_v51, %v1297_v55 }
 0x116   : > { %v8801_v59 = vpop.f32.mrf.mxu0  ;;  %v1400_v60 = vmin.f32 %v10308_v54, %v1378_v56  ;;  %v1377_v61 = vmax.f32 %v1298_v57, 0.0 }
 0x117   : > { %v1313_v62 = vadd.f32 %v8801_v59, %v10304_v51 }
 0x118   : > { %v1307_v63 = vpop.f32.mrf.mxu0  ;;  %v1423_v0 = vsub.f32 %v1400_v60, %v10312_v58  ;;  %v1399_v1 = vmin.f32 %v10308_v54, %v1377_v61 }
 0x119   : > { %v1380_v2 = vmax.f32 %v1313_v62, 0.0  ;;  %v1308_v3 = vadd.f32 %v10304_v51, %v1307_v63  ;;  %v2038_v63 = vld [vmem:[%s12519_s3 + $0x60] sm:$0xff] }
 0x11a   : > { %v8804_v4 = vpop.f32.mrf.mxu0  ;;  %v1439_v5 = vand.u32 2147483647, %v1423_v0  ;;  %v1422_v6 = vsub.f32 %v1399_v1, %v10312_v58  ;;  %v1829_v0 = vld [vmem:[%s10127_s4 + $0x28] sm:$0xff] }
 0x11b   : > { %v1402_v7 = vmin.f32 %v10308_v54, %v1380_v2  ;;  %v1379_v8 = vmax.f32 %v1308_v3, 0.0  ;;  %v1323_v9 = vadd.f32 %v8804_v4, %v10304_v51 }
 0x11c   : > { %v1317_v10 = vpop.f32.mrf.mxu0  ;;  %v1455_v11 = vsub.f32 1.0, %v1439_v5  ;;  %v1438_v12 = vand.u32 2147483647, %v1422_v6 }
 0x11d   : > { %v1425_v13 = vsub.f32 %v1402_v7, %v10312_v58  ;;  %v1401_v14 = vmin.f32 %v10308_v54, %v1379_v8  ;;  %v1382_v15 = vmax.f32 %v1323_v9, 0.0  ;;  %v1318_v16 = vadd.f32 %v10304_v51, %v1317_v10  ;;  %v2037_v9 = vld [vmem:[%s12519_s3 + $0x58] sm:$0xff] }
 0x11e   : > { %v8807_v17 = vpop.f32.mrf.mxu0  ;;  %v1454_v18 = vsub.f32 1.0, %v1438_v12  ;;  %v10328_v25 = vmax.f32 %v1455_v11, 0.0 }
 0x11f   : > { %v1441_v19 = vand.u32 2147483647, %v1425_v13  ;;  %v1424_v20 = vsub.f32 %v1401_v14, %v10312_v58  ;;  %v1404_v21 = vmin.f32 %v10308_v54, %v1382_v15  ;;  %v1381_v22 = vmax.f32 %v1318_v16, 0.0 }
 0x120   : > { %v1333_v23 = vadd.f32 %v8807_v17, %v10304_v51  ;;  %v1327_v24 = vpop.f32.mrf.mxu0  ;;  %v10330_v26 = vmax.f32 %v1454_v18, 0.0 }
 0x121   : > { %v1440_v27 = vand.u32 2147483647, %v1424_v20  ;;  %v1328_v28 = vadd.f32 %v10304_v51, %v1327_v24  ;;  %v1457_v29 = vsub.f32 1.0, %v1441_v19  ;;  %v1427_v30 = vsub.f32 %v1404_v21, %v10312_v58  ;;  %v2036_v21 = vld [vmem:[%s12519_s3 + $0x50] sm:$0xff] }
 0x122   : > { %v1403_v31 = vmin.f32 %v10308_v54, %v1381_v22  ;;  %v1384_v32 = vmax.f32 %v1333_v23, 0.0  ;;  %v8810_v33 = vpop.f32.mrf.mxu0  ;;  %8852 = vmatprep.mubr.f32.mxu1 %v10330_v26  ;;  %8908 = vmatprep.mubr.f32.mxu0 %v10330_v26 }
 0x123   : > { %v1456_v34 = vsub.f32 1.0, %v1440_v27  ;;  %v1383_v35 = vmax.f32 %v1328_v28, 0.0  ;;  %v1343_v36 = vadd.f32 %v8810_v33, %v10304_v51  ;;  %v1443_v39 = vand.u32 2147483647, %v1427_v30  ;;  %8853 = vmatmul.mubr.f32.vlgmr.msra.gmra.mxu1 %v10328_v25  ;;  %8909 = vmatmul.mubr.f32.vlgmr.msra.gmra.mxu0 %v10328_v25 }
 0x124   : > { %v1426_v40 = vsub.f32 %v1403_v31, %v10312_v58  ;;  %v1406_v41 = vmin.f32 %v10308_v54, %v1384_v32  ;;  %v1337_v42 = vpop.f32.mrf.mxu0  ;;  %8973 = vmatpush3.msra.mxu0 %v10296_v49  ;;  %8933 = vmatpush3.msra.mxu1 %v10300_v50  ;;  %v10351_v48 = vmax.f32 %v1457_v29, 0.0  ;;  %v2035_v32 = vld [vmem:[%s12519_s3 + $0x48] sm:$0xff] }
 0x125   : > { %v10344_v43 = vmax.f32 %v1456_v34, 0.0  ;;  %v1405_v44 = vmin.f32 %v10308_v54, %v1383_v35  ;;  %v1386_v45 = vmax.f32 %v1343_v36, 0.0  ;;  %v1338_v46 = vadd.f32 %v10304_v51, %v1337_v42  ;;  %8974 = vmatprep.subr.mxu0 %v2040_v37  ;;  %8934 = vmatprep.subr.mxu1 %v1830_v38 }
 0x126   : > { %v1442_v52 = vand.u32 2147483647, %v1426_v40  ;;  %v1429_v53 = vsub.f32 %v1406_v41, %v10312_v58  ;;  %v8813_v55 = vpop.f32.mrf.mxu0  ;;  %8975 = vmatpush3.msra.mxu0 %v2040_v37  ;;  %v1459_v50 = vsub.f32 1.0, %v1443_v39  ;;  %8935 = vmatpush3.msra.mxu1 %v1830_v38 }
 0x127   : > { %v1428_v56 = vsub.f32 %v1405_v44, %v10312_v58  ;;  %v1408_v57 = vmin.f32 %v10308_v54, %v1386_v45  ;;  %v1385_v59 = vmax.f32 %v1338_v46, 0.0  ;;  %v1353_v49 = vadd.f32 %v8813_v55, %v10304_v51  ;;  %8855 = vmatprep.mubr.f32.mxu1 %v10344_v43  ;;  %8911 = vmatprep.mubr.f32.mxu0 %v10344_v43  ;;  %v2034_v45 = vld [vmem:[%s12519_s3 + $0x40] sm:$0xff] }
 0x128   : > { %v1458_v60 = vsub.f32 1.0, %v1442_v52  ;;  %v1445_v61 = vand.u32 2147483647, %v1429_v53  ;;  %8976 = vmatprep.subr.mxu0 %v2039_v47  ;;  %v1347_v62 = vpop.f32.mrf.mxu0  ;;  %8856 = vmatmul.mubr.f32.gmra.mxu1 %v10351_v48  ;;  %v10371_v14 = vmax.f32 %v1459_v50, 0.0  ;;  %v10400_v46 = vld [vmem:[%s10127_s4 + $0x20] sm:$0xff] }
 0x129   : > { %v1444_v1 = vand.u32 2147483647, %v1428_v56  ;;  %v1431_v2 = vsub.f32 %v1408_v57, %v10312_v58  ;;  %v1407_v3 = vmin.f32 %v10308_v54, %v1385_v59  ;;  %v1388_v4 = vmax.f32 %v1353_v49, 0.0  ;;  %8912 = vmatmul.mubr.f32.gmra.mxu0 %v10351_v48  ;;  %8936 = vmatprep.subr.mxu1 %v1829_v0  ;;  %v2033_v59 = vld [vmem:[%s12519_s3 + $0x38] sm:$0xff] }
 0x12a   : > { %v10365_v5 = vmax.f32 %v1458_v60, 0.0  ;;  %v1461_v6 = vsub.f32 1.0, %v1445_v61  ;;  %v1348_v7 = vadd.f32 %v10304_v51, %v1347_v62  ;;  %8977 = vmatpush3.msra.mxu0 %v2039_v47  ;;  %v8816_v8 = vpop.f32.mrf.mxu0  ;;  %8937 = vmatpush3.msra.mxu1 %v1829_v0  ;;  %v2032_v62 = vld [vmem:[%s12519_s3 + $0x30] sm:$0xff] }
 0x12b   : > { %v1460_v10 = vsub.f32 1.0, %v1444_v1  ;;  %v1447_v11 = vand.u32 2147483647, %v1431_v2  ;;  %v1430_v12 = vsub.f32 %v1407_v3, %v10312_v58  ;;  %v1410_v13 = vmin.f32 %v10308_v54, %v1388_v4  ;;  %8978 = vmatprep.subr.mxu0 %v2038_v63  ;;  %8938 = vmatprep.subr.mxu1 %v10400_v46  ;;  %v2031_v3 = vld [vmem:[%s12519_s3 + $0x28] sm:$0xff] }
 0x12c   : > { %v1387_v15 = vmax.f32 %v1348_v7, 0.0  ;;  %v1363_v16 = vadd.f32 %v8816_v8, %v10304_v51  ;;  %8979 = vmatpush3.msra.mxu0 %v2038_v63  ;;  %8858 = vmatprep.mubr.f32.mxu1 %v10365_v5  ;;  %v1357_v17 = vpop.f32.mrf.mxu0  ;;  %v10384_v28 = vmax.f32 %v1461_v6, 0.0 }
 0x12d   : > { %v10375_v18 = vmax.f32 %v1460_v10, 0.0  ;;  %v1446_v19 = vand.u32 2147483647, %v1430_v12  ;;  %v1433_v20 = vsub.f32 %v1410_v13, %v10312_v58  ;;  %8914 = vmatprep.mubr.f32.mxu0 %v10365_v5  ;;  %8980 = vmatprep.subr.mxu0 %v2037_v9  ;;  %v1358_v24 = vadd.f32 %v10304_v51, %v1357_v17  ;;  %v2029_v10 = vld [vmem:[%s12519_s3 + $0x18] sm:$0xff]  ;;  %v2028_v12 = vld [vmem:[%s12519_s3 + $0x10] sm:$0xff] }
 0x12e   : > { %v1409_v22 = vmin.f32 %v10308_v54, %v1387_v15  ;;  %v1390_v23 = vmax.f32 %v1363_v16, 0.0  ;;  %8859 = vmatmul.mubr.f32.gmra.mxu1 %v10371_v14  ;;  %8915 = vmatmul.mubr.f32.gmra.mxu0 %v10371_v14  ;;  %v8819_v27 = vpop.f32.mrf.mxu0  ;;  %v1463_v29 = vsub.f32 1.0, %v1447_v11  ;;  %v2027_v15 = vld [vmem:[%s12519_s3 + $0x8] sm:$0xff]  ;;  %v2026_v16 = vld [vmem:[%s12519_s3] sm:$0xff]  ;;  %v1827_v17 = vld [vmem:[%s10127_s4 + $0x18] sm:$0xff] }
 0x12f   : > { %v1462_v30 = vsub.f32 1.0, %v1446_v19  ;;  %8981 = vmatpush3.msra.mxu0 %v2037_v9  ;;  %v1373_v31 = vadd.f32 %v8819_v27, %v10304_v51  ;;  %8861 = vmatprep.mubr.f32.mxu1 %v10375_v18  ;;  %v1449_v33 = vand.u32 2147483647, %v1433_v20  ;;  %v1389_v36 = vmax.f32 %v1358_v24, 0.0  ;;  %v2435_v19 = vld [vmem:[%s10062_s8 + $0x78] sm:$0xff]  ;;  %v2434_v20 = vld [vmem:[%s10062_s8 + $0x70] sm:$0xff] }
 0x130   : > { %v1432_v34 = vsub.f32 %v1409_v22, %v10312_v58  ;;  %v1412_v35 = vmin.f32 %v10308_v54, %v1390_v23  ;;  %8982 = vmatprep.subr.mxu0 %v2036_v21  ;;  %8917 = vmatprep.mubr.f32.mxu0 %v10375_v18  ;;  %v1367_v37 = vpop.f32.mrf.mxu0  ;;  %v10402_v47 = vmax.f32 %v1463_v29, 0.0  ;;  %v2433_v22 = vld [vmem:[%s10062_s8 + $0x68] sm:$0xff]  ;;  %v2432_v23 = vld [vmem:[%s10062_s8 + $0x60] sm:$0xff]  ;;  %v2431_v27 = vld [vmem:[%s10062_s8 + $0x58] sm:$0xff] }
 0x131   : > { %v10392_v38 = vmax.f32 %v1462_v30, 0.0  ;;  %v1392_v39 = vmax.f32 %v1373_v31, 0.0  ;;  %8983 = vmatpush3.msra.mxu0 %v2036_v21  ;;  %v1368_v40 = vadd.f32 %v10304_v51, %v1367_v37  ;;  %v1411_v44 = vmin.f32 %v10308_v54, %v1389_v36  ;;  %8939 = vmatpush3.msra.mxu1 %v10400_v46  ;;  %v1826_v21 = vld [vmem:[%s10127_s4 + $0x10] sm:$0xff]  ;;  %v1825_v24 = vld [vmem:[%s10127_s4 + $0x8] sm:$0xff]  ;;  %v2428_v31 = vld [vmem:[%s10062_s8 + $0x40] sm:$0xff] }
 0x132   : > { %v1448_v41 = vand.u32 2147483647, %v1432_v34  ;;  %v1435_v42 = vsub.f32 %v1412_v35, %v10312_v58  ;;  %8984 = vmatprep.subr.mxu0 %v2035_v32  ;;  %8862 = vmatmul.mubr.f32.gmra.mxu1 %v10384_v28  ;;  %v1465_v51 = vsub.f32 1.0, %v1449_v33  ;;  %v2430_v29 = vld [vmem:[%s10062_s8 + $0x50] sm:$0xff]  ;;  %v2429_v30 = vld [vmem:[%s10062_s8 + $0x48] sm:$0xff]  ;;  %v2424_v35 = vld [vmem:[%s10062_s8 + $0x20] sm:$0xff] }
 0x133   : > { %v1414_v52 = vmin.f32 %v10308_v54, %v1392_v39  ;;  %v1391_v53 = vmax.f32 %v1368_v40, 0.0  ;;  %8918 = vmatmul.mubr.f32.gmra.mxu0 %v10384_v28  ;;  %8864 = vmatprep.mubr.f32.mxu1 %v10392_v38  ;;  %v1434_v57 = vsub.f32 %v1411_v44, %v10312_v58  ;;  %v2426_v33 = vld [vmem:[%s10062_s8 + $0x30] sm:$0xff]  ;;  %v2425_v34 = vld [vmem:[%s10062_s8 + $0x28] sm:$0xff]  ;;  %v2423_v36 = vld [vmem:[%s10062_s8 + $0x18] sm:$0xff] }
 0x134   : > { %v1464_v55 = vsub.f32 1.0, %v1448_v41  ;;  %v1451_v56 = vand.u32 2147483647, %v1435_v42  ;;  %8985 = vmatpush3.msra.mxu0 %v2035_v32  ;;  %8920 = vmatprep.mubr.f32.mxu0 %v10392_v38  ;;  %v10419_v0 = vmax.f32 %v1465_v51, 0.0  ;;  %v2427_v32 = vld [vmem:[%s10062_s8 + $0x38] sm:$0xff]  ;;  %v2422_v37 = vld [vmem:[%s10062_s8 + $0x10] sm:$0xff] }
 0x135   : > { %v1437_v49 = vsub.f32 %v1414_v52, %v10312_v58  ;;  %v1413_v50 = vmin.f32 %v10308_v54, %v1391_v53  ;;  %8986 = vmatprep.subr.mxu0 %v2034_v45  ;;  %v1450_v61 = vand.u32 2147483647, %v1434_v57  ;;  %8940 = vmatprep.subr.mxu1 %v1827_v17  ;;  %v2421_v39 = vld [vmem:[%s10062_s8 + $0x8] sm:$0xff]  ;;  %v2420_v40 = vld [vmem:[%s10062_s8] sm:$0xff]  ;;  %v2210_v42 = vld [vmem:[%s10132_s12 + $0x38] sm:$0xff] }
 0x136   : > { %v10413_v60 = vmax.f32 %v1464_v55, 0.0  ;;  %8987 = vmatpush3.msra.mxu0 %v2034_v45  ;;  %8865 = vmatmul.mubr.f32.gmra.mxu1 %v10402_v47  ;;  %v1467_v54 = vsub.f32 1.0, %v1451_v56  ;;  %v1824_v41 = vld [vmem:[%s10127_s4] sm:$0xff]  ;;  %v2209_v57 = vld [vmem:[%s10132_s12 + $0x30] sm:$0xff] }
 0x137   : > { %v1436_v63 = vsub.f32 %v1413_v50, %v10312_v58  ;;  %8988 = vmatprep.subr.mxu0 %v2033_v59  ;;  %8921 = vmatmul.mubr.f32.gmra.mxu0 %v10402_v47  ;;  %v1466_v1 = vsub.f32 1.0, %v1450_v61  ;;  %v1453_v2 = vand.u32 2147483647, %v1437_v49  ;;  %v2030_v58 = vld [vmem:[%s12519_s3 + $0x20] sm:$0xff]  ;;  %v2208_v50 = vld [vmem:[%s10132_s12 + $0x28] sm:$0xff]  ;;  %s12585_s3 = sld [smem:[#allocation10_spill]] }
 0x138   : > { %8989 = vmatpush3.msra.mxu0 %v2033_v59  ;;  %8867 = vmatprep.mubr.f32.mxu1 %v10413_v60  ;;  %v10429_v8 = vmax.f32 %v1467_v54, 0.0 }
 0x139   : > { %v1452_v4 = vand.u32 2147483647, %v1436_v63  ;;  %8990 = vmatprep.subr.mxu0 %v2032_v62  ;;  %8923 = vmatprep.mubr.f32.mxu0 %v10413_v60  ;;  %v10424_v6 = vmax.f32 %v1466_v1, 0.0  ;;  %v1469_v9 = vsub.f32 1.0, %v1453_v2  ;;  %v2207_v1 = vld [vmem:[%s10132_s12 + $0x20] sm:$0xff] }
 0x13a   : > { %8991 = vmatpush3.msra.mxu0 %v2032_v62  ;;  %8868 = vmatmul.mubr.f32.gmra.mxu1 %v10419_v0 }
 0x13b   : > { %v1468_v7 = vsub.f32 1.0, %v1452_v4  ;;  %8992 = vmatprep.subr.mxu0 %v2031_v3  ;;  %8924 = vmatmul.mubr.f32.gmra.mxu0 %v10419_v0  ;;  %v10439_v13 = vmax.f32 %v1469_v9, 0.0  ;;  %v2206_v4 = vld [vmem:[%s10132_s12 + $0x18] sm:$0xff] }
 0x13c   : > { %8993 = vmatpush3.msra.mxu0 %v2031_v3  ;;  %8870 = vmatprep.mubr.f32.mxu1 %v10424_v6 }
 0x13d   : > { %v10433_v11 = vmax.f32 %v1468_v7, 0.0  ;;  %8994 = vmatprep.subr.mxu0 %v2030_v58  ;;  %8926 = vmatprep.mubr.f32.mxu0 %v10424_v6 }
 0x13e   : > { %8995 = vmatpush3.msra.mxu0 %v2030_v58  ;;  %8871 = vmatmul.mubr.f32.gmra.mxu1 %v10429_v8 }
 0x13f   : > { %8996 = vmatprep.subr.mxu0 %v2029_v10  ;;  %8927 = vmatmul.mubr.f32.gmra.mxu0 %v10429_v8 }
 0x140   : > { %8997 = vmatpush3.msra.mxu0 %v2029_v10  ;;  %8873 = vmatprep.mubr.f32.mxu1 %v10433_v11 }
 0x141   : > { %8998 = vmatprep.subr.mxu0 %v2028_v12  ;;  %8929 = vmatprep.mubr.f32.mxu0 %v10433_v11 }
 0x142   : > { %8999 = vmatpush3.msra.mxu0 %v2028_v12  ;;  %8874 = vmatmul.mubr.f32.gmra.mxu1 %v10439_v13  ;;  %v2205_v12 = vld [vmem:[%s10132_s12 + $0x10] sm:$0xff] }
 0x143   : > { %9000 = vmatprep.subr.mxu0 %v2027_v15  ;;  %8930 = vmatmul.mubr.f32.gmra.mxu0 %v10439_v13 }
 0x144   : > { %9001 = vmatpush3.msra.mxu0 %v2027_v15  ;;  %9004 = vmatprep.mubr.f32.mxu0 %v10330_v26 }
 0x145   : > { %9002 = vmatprep.subr.mxu0 %v2026_v16  ;;  %8941 = vmatpush3.msra.mxu1 %v1827_v17  ;;  %v2204_v17 = vld [vmem:[%s10132_s12 + $0x8] sm:$0xff] }
 0x146   : > { %9003 = vmatpush3.msra.mxu0 %v2026_v16  ;;  %8942 = vmatprep.subr.mxu1 %v1826_v21 }
 0x147   : > { %9005 = vmatmul.mubr.f32.vlgmr.msra.gmra.mxu0 %v10328_v25  ;;  %9068 = vmatprep.subr.mxu0 %v2435_v19 }
 0x148   : > { %9007 = vmatprep.mubr.f32.mxu0 %v10344_v43  ;;  %9069 = vmatpush3.msra.mxu0 %v2435_v19 }
 0x149   : > { %9070 = vmatprep.subr.mxu0 %v2434_v20  ;;  %8943 = vmatpush3.msra.mxu1 %v1826_v21 }
 0x14a   : > { %9071 = vmatpush3.msra.mxu0 %v2434_v20  ;;  %8944 = vmatprep.subr.mxu1 %v1825_v24 }
 0x14b   : > { %9008 = vmatmul.mubr.f32.gmra.mxu0 %v10351_v48  ;;  %9072 = vmatprep.subr.mxu0 %v2433_v22 }
 0x14c   : > { %9010 = vmatprep.mubr.f32.mxu0 %v10365_v5  ;;  %9073 = vmatpush3.msra.mxu0 %v2433_v22 }
 0x14d   : > { %9074 = vmatprep.subr.mxu0 %v2432_v23  ;;  %8945 = vmatpush3.msra.mxu1 %v1825_v24  ;;  %v2203_v24 = vld [vmem:[%s10132_s12] sm:$0xff] }
 0x14e   : > { %9075 = vmatpush3.msra.mxu0 %v2432_v23  ;;  %8946 = vmatprep.subr.mxu1 %v1824_v41 }
 0x14f   : > { %9011 = vmatmul.mubr.f32.gmra.mxu0 %v10371_v14  ;;  %9076 = vmatprep.subr.mxu0 %v2431_v27 }
 0x150   : > { %9013 = vmatprep.mubr.f32.mxu0 %v10375_v18  ;;  %9077 = vmatpush3.msra.mxu0 %v2431_v27 }
 0x151   : > { %9078 = vmatprep.subr.mxu0 %v2430_v29  ;;  %8947 = vmatpush3.msra.mxu1 %v1824_v41 }
 0x152   : > { %9079 = vmatpush3.msra.mxu0 %v2430_v29  ;;  %9028 = vmatprep.subr.mxu1 %v2210_v42 }
 0x153   : > { %9014 = vmatmul.mubr.f32.gmra.mxu0 %v10384_v28  ;;  %9080 = vmatprep.subr.mxu0 %v2429_v30 }
 0x154   : > { %9016 = vmatprep.mubr.f32.mxu0 %v10392_v38  ;;  %9081 = vmatpush3.msra.mxu0 %v2429_v30 }
 0x155   : > { %9082 = vmatprep.subr.mxu0 %v2428_v31 }
 0x156   : > { %9083 = vmatpush3.msra.mxu0 %v2428_v31  ;;  %v2596_v31 = vld [vmem:[%s10067_s14 + $0x78] sm:$0xff] }
 0x157   : > { %9017 = vmatmul.mubr.f32.gmra.mxu0 %v10402_v47  ;;  %9084 = vmatprep.subr.mxu0 %v2427_v32 }
 0x158   : > { %9019 = vmatprep.mubr.f32.mxu0 %v10413_v60  ;;  %9085 = vmatpush3.msra.mxu0 %v2427_v32 }
 0x159   : > { %9086 = vmatprep.subr.mxu0 %v2426_v33 }
 0x15a   : > { %9087 = vmatpush3.msra.mxu0 %v2426_v33 }
 0x15b   : > { %9020 = vmatmul.mubr.f32.gmra.mxu0 %v10419_v0  ;;  %9088 = vmatprep.subr.mxu0 %v2425_v34 }
 0x15c   : > { %9022 = vmatprep.mubr.f32.mxu0 %v10424_v6  ;;  %9089 = vmatpush3.msra.mxu0 %v2425_v34 }
 0x15d   : > { %9090 = vmatprep.subr.mxu0 %v2424_v35 }
 0x15e   : > { %9091 = vmatpush3.msra.mxu0 %v2424_v35 }
 0x15f   : > { %9023 = vmatmul.mubr.f32.gmra.mxu0 %v10429_v8  ;;  %9092 = vmatprep.subr.mxu0 %v2423_v36 }
 0x160   : > { %9025 = vmatprep.mubr.f32.mxu0 %v10433_v11  ;;  %9093 = vmatpush3.msra.mxu0 %v2423_v36 }
 0x161   : > { %9094 = vmatprep.subr.mxu0 %v2422_v37 }
 0x162   : > { %9095 = vmatpush3.msra.mxu0 %v2422_v37 }
 0x163   : > { %9026 = vmatmul.mubr.f32.gmra.mxu0 %v10439_v13  ;;  %9096 = vmatprep.subr.mxu0 %v2421_v39 }
 0x164   : > { %9097 = vmatpush3.msra.mxu0 %v2421_v39  ;;  %9100 = vmatprep.mubr.f32.mxu0 %v10330_v26 }
 0x165   : > { %9098 = vmatprep.subr.mxu0 %v2420_v40 }
 0x166   : > { %9099 = vmatpush3.msra.mxu0 %v2420_v40 }
 0x167   : > { %9101 = vmatmul.mubr.f32.vlgmr.msra.gmra.mxu0 %v10328_v25 }
 0x168   : > { %9103 = vmatprep.mubr.f32.mxu0 %v10344_v43 }
 0x16b   : > { %9104 = vmatmul.mubr.f32.gmra.mxu0 %v10351_v48 }
 0x16c   : > { %9106 = vmatprep.mubr.f32.mxu0 %v10365_v5 }
 0x16f   : > { %9107 = vmatmul.mubr.f32.gmra.mxu0 %v10371_v14 }
 0x170   : > { %9109 = vmatprep.mubr.f32.mxu0 %v10375_v18 }
 0x173   : > { %9110 = vmatmul.mubr.f32.gmra.mxu0 %v10384_v28 }
 0x174   : > { %9112 = vmatprep.mubr.f32.mxu0 %v10392_v38 }
 0x177   : > { %9113 = vmatmul.mubr.f32.gmra.mxu0 %v10402_v47 }
 0x178   : > { %9115 = vmatprep.mubr.f32.mxu0 %v10413_v60 }
 0x17b   : > { %9116 = vmatmul.mubr.f32.gmra.mxu0 %v10419_v0 }
 0x17c   : > { %9118 = vmatprep.mubr.f32.mxu0 %v10424_v6 }
 0x17f   : > { %9119 = vmatmul.mubr.f32.gmra.mxu0 %v10429_v8 }
 0x180   : > { %9121 = vmatprep.mubr.f32.mxu0 %v10433_v11 }
 0x183   : > { %9122 = vmatmul.mubr.f32.gmra.mxu0 %v10439_v13 }
 0x1e3   : > { %v8854_v44 = vpop.f32.mrf.mxu1  ;;  %v10501_v45 = vpop.f32.mrf.mxu0 }
 0x1e4   : > { %v1809_v51 = vmul.f32 %v10501_v45, %v8854_v44 }
 0x1e5   : > { %v1568_v46 = vpop.f32.mrf.mxu1  ;;  %v10503_v52 = vpop.f32.mrf.mxu0 }
 0x1e6   : > { %v1808_v53 = vmul.f32 %v10503_v52, %v1568_v46 }
 0x1e8   : > { %v8857_v55 = vpop.f32.mrf.mxu1  ;;  %8948 = vmatprep.mubr.msk.f32.mxu1 %vm1832_vm1, %v1808_v53 }
 0x1e9   : > { %v10507_v56 = vpop.f32.mrf.mxu0  ;;  %8949 = vmatmul.mubr.msk.f32.vlgmr.msra.gmra.mxu1 %vm1832_vm1, %v1809_v51 }
 0x1ea   : > { %v1578_v59 = vpop.f32.mrf.mxu1  ;;  %9029 = vmatpush3.msra.mxu1 %v2210_v42  ;;  %v1811_v62 = vmul.f32 %v10507_v56, %v8857_v55 }
 0x1eb   : > { %v10512_v49 = vpop.f32.mrf.mxu0  ;;  %9030 = vmatprep.subr.mxu1 %v2209_v57 }
 0x1ec   : > { %v1810_v61 = vmul.f32 %v10512_v49, %v1578_v59  ;;  %9031 = vmatpush3.msra.mxu1 %v2209_v57 }
 0x1ed   : > { %9032 = vmatprep.subr.mxu1 %v2208_v50 }
 0x1ee   : > { %v8860_v63 = vpop.f32.mrf.mxu1  ;;  %v10517_v54 = vpop.f32.mrf.mxu0  ;;  %8951 = vmatprep.mubr.msk.f32.mxu1 %vm1832_vm1, %v1810_v61  ;;  %9033 = vmatpush3.msra.mxu1 %v2208_v50 }
 0x1ef   : > { %8952 = vmatmul.mubr.msk.f32.gmra.mxu1 %vm1832_vm1, %v1811_v62  ;;  %9034 = vmatprep.subr.mxu1 %v2207_v1  ;;  %v1813_v7 = vmul.f32 %v10517_v54, %v8860_v63 }
 0x1f0   : > { %v1588_v2 = vpop.f32.mrf.mxu1  ;;  %v10522_v3 = vpop.f32.mrf.mxu0  ;;  %9035 = vmatpush3.msra.mxu1 %v2207_v1 }
 0x1f1   : > { %v1812_v58 = vmul.f32 %v10522_v3, %v1588_v2  ;;  %9036 = vmatprep.subr.mxu1 %v2206_v4 }
 0x1f2   : > { %v8863_v9 = vpop.f32.mrf.mxu1  ;;  %9037 = vmatpush3.msra.mxu1 %v2206_v4  ;;  %v2595_v4 = vld [vmem:[%s10067_s14 + $0x70] sm:$0xff] }
 0x1f3   : > { %v10527_v10 = vpop.f32.mrf.mxu0  ;;  %8954 = vmatprep.mubr.msk.f32.mxu1 %vm1832_vm1, %v1812_v58  ;;  %9038 = vmatprep.subr.mxu1 %v2205_v12 }
 0x1f4   : > { %v1598_v15 = vpop.f32.mrf.mxu1  ;;  %8955 = vmatmul.mubr.msk.f32.gmra.mxu1 %vm1832_vm1, %v1813_v7  ;;  %v1815_v21 = vmul.f32 %v10527_v10, %v8863_v9  ;;  %v2594_v9 = vld [vmem:[%s10067_s14 + $0x68] sm:$0xff] }
 0x1f5   : > { %v10532_v16 = vpop.f32.mrf.mxu0  ;;  %9039 = vmatpush3.msra.mxu1 %v2205_v12  ;;  %v2593_v12 = vld [vmem:[%s10067_s14 + $0x60] sm:$0xff] }
 0x1f6   : > { %v1814_v19 = vmul.f32 %v10532_v16, %v1598_v15  ;;  %v8866_v20 = vpop.f32.mrf.mxu1  ;;  %9040 = vmatprep.subr.mxu1 %v2204_v17 }
 0x1f7   : > { %v10537_v22 = vpop.f32.mrf.mxu0  ;;  %9041 = vmatpush3.msra.mxu1 %v2204_v17  ;;  %v2592_v17 = vld [vmem:[%s10067_s14 + $0x58] sm:$0xff] }
 0x1f8   : > { %8957 = vmatprep.mubr.msk.f32.mxu1 %vm1832_vm1, %v1814_v19  ;;  %v1608_v23 = vpop.f32.mrf.mxu1  ;;  %v1817_v32 = vmul.f32 %v10537_v22, %v8866_v20  ;;  %9042 = vmatprep.subr.mxu1 %v2203_v24  ;;  %v2591_v20 = vld [vmem:[%s10067_s14 + $0x50] sm:$0xff] }
 0x1f9   : > { %v10541_v27 = vpop.f32.mrf.mxu0  ;;  %8958 = vmatmul.mubr.msk.f32.gmra.mxu1 %vm1832_vm1, %v1815_v21 }
 0x1fa   : > { %v1816_v29 = vmul.f32 %v10541_v27, %v1608_v23  ;;  %v8869_v30 = vpop.f32.mrf.mxu1  ;;  %9043 = vmatpush3.msra.mxu1 %v2203_v24  ;;  %v2590_v23 = vld [vmem:[%s10067_s14 + $0x48] sm:$0xff] }
 0x1fb   : > { %v10547_v33 = vpop.f32.mrf.mxu0  ;;  %9124 = vmatprep.subr.mxu1 %v2596_v31 }
 0x1fc   : > { %8960 = vmatprep.mubr.msk.f32.mxu1 %vm1832_vm1, %v1816_v29  ;;  %v1618_v34 = vpop.f32.mrf.mxu1  ;;  %v1819_v39 = vmul.f32 %v10547_v33, %v8869_v30  ;;  %v2589_v29 = vld [vmem:[%s10067_s14 + $0x40] sm:$0xff] }
 0x1fd   : > { %v10550_v35 = vpop.f32.mrf.mxu0  ;;  %8961 = vmatmul.mubr.msk.f32.gmra.mxu1 %vm1832_vm1, %v1817_v32 }
 0x1fe   : > { %v1818_v36 = vmul.f32 %v10550_v35, %v1618_v34  ;;  %v8872_v37 = vpop.f32.mrf.mxu1  ;;  %v2587_v34 = vld [vmem:[%s10067_s14 + $0x30] sm:$0xff] }
 0x1ff   : > { %v10555_v40 = vpop.f32.mrf.mxu0 }
 0x200   : > { %8963 = vmatprep.mubr.msk.f32.mxu1 %vm1832_vm1, %v1818_v36  ;;  %v1628_v41 = vpop.f32.mrf.mxu1  ;;  %v1821_v53 = vmul.f32 %v10555_v40, %v8872_v37  ;;  %v2586_v37 = vld [vmem:[%s10067_s14 + $0x28] sm:$0xff] }
 0x201   : > { %v10558_v42 = vpop.f32.mrf.mxu0  ;;  %8964 = vmatmul.mubr.msk.f32.gmra.mxu1 %vm1832_vm1, %v1819_v39 }
 0x202   : > { %v1820_v44 = vmul.f32 %v10558_v42, %v1628_v41  ;;  %v8875_v46 = vpop.f32.mrf.mxu1  ;;  %v2585_v41 = vld [vmem:[%s10067_s14 + $0x20] sm:$0xff] }
 0x203   : > { %v10563_v51 = vpop.f32.mrf.mxu0 }
 0x204   : > { %8966 = vmatprep.mubr.msk.f32.mxu1 %vm1832_vm1, %v1820_v44  ;;  %v1638_v55 = vpop.f32.mrf.mxu1  ;;  %v1823_v50 = vmul.f32 %v10563_v51, %v8875_v46  ;;  %v2584_v46 = vld [vmem:[%s10067_s14 + $0x18] sm:$0xff] }
 0x205   : > { %v10566_v57 = vpop.f32.mrf.mxu0  ;;  %8967 = vmatmul.mubr.msk.f32.gmra.mxu1 %vm1832_vm1, %v1821_v53 }
 0x206   : > { %v1822_v59 = vmul.f32 %v10566_v57, %v1638_v55  ;;  %v2583_v55 = vld [vmem:[%s10067_s14 + $0x10] sm:$0xff] }
 0x207   : > { %v10571_v61 = vpop.f32.mrf.mxu0 }
 0x208   : > { %8969 = vmatprep.mubr.msk.f32.mxu1 %vm1832_vm1, %v1822_v59  ;;  %v2188_v1 = vmul.f32 %v10571_v61, %v10501_v45 }
 0x209   : > { %8970 = vmatmul.mubr.msk.f32.gmra.mxu1 %vm1832_vm1, %v1823_v50  ;;  %v10575_v62 = vpop.f32.mrf.mxu0 }
 0x20a   : > { %v2187_v63 = vmul.f32 %v10575_v62, %v10503_v52 }
 0x20b   : > { %v10581_v2 = vpop.f32.mrf.mxu0 }
 0x20c   : > { %9044 = vmatprep.mubr.msk.f32.mxu1 %vm1832_vm1, %v2187_v63  ;;  %v2190_v52 = vmul.f32 %v10581_v2, %v10507_v56  ;;  %v2581_v63 = vld [vmem:[%s10067_s14] sm:$0xff] }
 0x20d   : > { %v10585_v58 = vpop.f32.mrf.mxu0  ;;  %9045 = vmatmul.mubr.msk.f32.vlgmr.msra.gmra.mxu1 %vm1832_vm1, %v2188_v1  ;;  %v2987_v1 = vld [vmem:[%s10072_s19 + $0x78] sm:$0xff] }
 0x20e   : > { %v2189_v7 = vmul.f32 %v10585_v58, %v10512_v49  ;;  %9125 = vmatpush3.msra.mxu1 %v2596_v31  ;;  %v2588_v31 = vld [vmem:[%s10067_s14 + $0x38] sm:$0xff] }
 0x20f   : > { %9126 = vmatprep.subr.mxu1 %v2595_v4  ;;  %v10593_v45 = vpop.f32.mrf.mxu0 }
 0x210   : > { %9127 = vmatpush3.msra.mxu1 %v2595_v4  ;;  %9047 = vmatprep.mubr.msk.f32.mxu1 %vm1832_vm1, %v2189_v7  ;;  %v2192_v56 = vmul.f32 %v10593_v45, %v10517_v54  ;;  %v2984_v4 = vld [vmem:[%s10072_s19 + $0x60] sm:$0xff]  ;;  %v2983_v7 = vld [vmem:[%s10072_s19 + $0x58] sm:$0xff] }
 0x211   : > { %9128 = vmatprep.subr.mxu1 %v2594_v9  ;;  %v10597_v15 = vpop.f32.mrf.mxu0  ;;  %9048 = vmatmul.mubr.msk.f32.gmra.mxu1 %vm1832_vm1, %v2190_v52  ;;  %v2981_v52 = vld [vmem:[%s10072_s19 + $0x48] sm:$0xff] }
 0x212   : > { %v2191_v49 = vmul.f32 %v10597_v15, %v10522_v3  ;;  %9129 = vmatpush3.msra.mxu1 %v2594_v9  ;;  %v2982_v9 = vld [vmem:[%s10072_s19 + $0x50] sm:$0xff] }
 0x213   : > { %9130 = vmatprep.subr.mxu1 %v2593_v12  ;;  %v10605_v19 = vpop.f32.mrf.mxu0 }
 0x214   : > { %9131 = vmatpush3.msra.mxu1 %v2593_v12  ;;  %9050 = vmatprep.mubr.msk.f32.mxu1 %vm1832_vm1, %v2191_v49  ;;  %v2194_v54 = vmul.f32 %v10605_v19, %v10527_v10  ;;  %v2980_v12 = vld [vmem:[%s10072_s19 + $0x40] sm:$0xff]  ;;  %v2979_v49 = vld [vmem:[%s10072_s19 + $0x38] sm:$0xff] }
 0x215   : > { %9132 = vmatprep.subr.mxu1 %v2592_v17  ;;  %v10609_v21 = vpop.f32.mrf.mxu0  ;;  %9051 = vmatmul.mubr.msk.f32.gmra.mxu1 %vm1832_vm1, %v2192_v56  ;;  %v2977_v56 = vld [vmem:[%s10072_s19 + $0x28] sm:$0xff] }
 0x216   : > { %v2193_v3 = vmul.f32 %v10609_v21, %v10532_v16  ;;  %9133 = vmatpush3.msra.mxu1 %v2592_v17  ;;  %v2978_v17 = vld [vmem:[%s10072_s19 + $0x30] sm:$0xff] }
 0x217   : > { %9134 = vmatprep.subr.mxu1 %v2591_v20  ;;  %v10617_v24 = vpop.f32.mrf.mxu0 }
 0x218   : > { %9135 = vmatpush3.msra.mxu1 %v2591_v20  ;;  %9053 = vmatprep.mubr.msk.f32.mxu1 %vm1832_vm1, %v2193_v3  ;;  %v2196_v10 = vmul.f32 %v10617_v24, %v10537_v22  ;;  %v2976_v20 = vld [vmem:[%s10072_s19 + $0x20] sm:$0xff]  ;;  %v2975_v3 = vld [vmem:[%s10072_s19 + $0x18] sm:$0xff] }
 0x219   : > { %9136 = vmatprep.subr.mxu1 %v2590_v23  ;;  %v10621_v30 = vpop.f32.mrf.mxu0  ;;  %9054 = vmatmul.mubr.msk.f32.gmra.mxu1 %vm1832_vm1, %v2194_v54  ;;  %v2973_v54 = vld [vmem:[%s10072_s19 + $0x8] sm:$0xff] }
 0x21a   : > { %v2195_v16 = vmul.f32 %v10621_v30, %v10541_v27  ;;  %9137 = vmatpush3.msra.mxu1 %v2590_v23  ;;  %v2974_v23 = vld [vmem:[%s10072_s19 + $0x10] sm:$0xff] }
 0x21b   : > { %9138 = vmatprep.subr.mxu1 %v2589_v29  ;;  %v10629_v32 = vpop.f32.mrf.mxu0 }
 0x21c   : > { %9139 = vmatpush3.msra.mxu1 %v2589_v29  ;;  %9056 = vmatprep.mubr.msk.f32.mxu1 %vm1832_vm1, %v2195_v16  ;;  %v2198_v22 = vmul.f32 %v10629_v32, %v10547_v33  ;;  %v2972_v29 = vld [vmem:[%s10072_s19] sm:$0xff]  ;;  %v3381_v16 = vld [vmem:[%s10077_s24 + $0x78] sm:$0xff] }
 0x21d   : > { %9140 = vmatprep.subr.mxu1 %v2588_v31  ;;  %v10633_v36 = vpop.f32.mrf.mxu0  ;;  %9057 = vmatmul.mubr.msk.f32.gmra.mxu1 %vm1832_vm1, %v2196_v10  ;;  %v3379_v10 = vld [vmem:[%s10077_s24 + $0x68] sm:$0xff] }
 0x21e   : > { %v2197_v27 = vmul.f32 %v10633_v36, %v10550_v35  ;;  %9141 = vmatpush3.msra.mxu1 %v2588_v31  ;;  %v3380_v31 = vld [vmem:[%s10077_s24 + $0x70] sm:$0xff] }
 0x21f   : > { %9142 = vmatprep.subr.mxu1 %v2587_v34  ;;  %v10641_v39 = vpop.f32.mrf.mxu0 }
 0x220   : > { %9143 = vmatpush3.msra.mxu1 %v2587_v34  ;;  %9059 = vmatprep.mubr.msk.f32.mxu1 %vm1832_vm1, %v2197_v27  ;;  %v2200_v33 = vmul.f32 %v10641_v39, %v10555_v40  ;;  %v2582_v40 = vld [vmem:[%s10067_s14 + $0x8] sm:$0xff]  ;;  %v3378_v34 = vld [vmem:[%s10077_s24 + $0x60] sm:$0xff]  ;;  %v3377_v27 = vld [vmem:[%s10077_s24 + $0x58] sm:$0xff] }
 0x221   : > { %9144 = vmatprep.subr.mxu1 %v2586_v37  ;;  %v10645_v44 = vpop.f32.mrf.mxu0  ;;  %9060 = vmatmul.mubr.msk.f32.gmra.mxu1 %vm1832_vm1, %v2198_v22  ;;  %v3376_v22 = vld [vmem:[%s10077_s24 + $0x50] sm:$0xff] }
 0x222   : > { %v2199_v35 = vmul.f32 %v10645_v44, %v10558_v42  ;;  %9145 = vmatpush3.msra.mxu1 %v2586_v37  ;;  %v2761_v37 = vld [vmem:[%s12520_s23 + $0x18] sm:$0xff] }
 0x223   : > { %9146 = vmatprep.subr.mxu1 %v2585_v41  ;;  %v10653_v53 = vpop.f32.mrf.mxu0  ;;  %9180 = vmatprep.subr.mxu0 %v2761_v37 }
 0x224   : > { %9147 = vmatpush3.msra.mxu1 %v2585_v41  ;;  %9062 = vmatprep.mubr.msk.f32.mxu1 %vm1832_vm1, %v2199_v35  ;;  %v2202_v50 = vmul.f32 %v10653_v53, %v10563_v51  ;;  %v2985_v51 = vld [vmem:[%s10072_s19 + $0x68] sm:$0xff]  ;;  %v3374_v35 = vld [vmem:[%s10077_s24 + $0x40] sm:$0xff] }
 0x225   : > { %9148 = vmatprep.subr.mxu1 %v2584_v46  ;;  %v10657_v59 = vpop.f32.mrf.mxu0  ;;  %9063 = vmatmul.mubr.msk.f32.gmra.mxu1 %vm1832_vm1, %v2200_v33  ;;  %v3375_v41 = vld [vmem:[%s10077_s24 + $0x48] sm:$0xff]  ;;  %v2760_v33 = vld [vmem:[%s12520_s23 + $0x10] sm:$0xff] }
 0x226   : > { %v2201_v42 = vmul.f32 %v10657_v59, %v10566_v57  ;;  %9149 = vmatpush3.msra.mxu1 %v2584_v46  ;;  %v2986_v57 = vld [vmem:[%s10072_s19 + $0x70] sm:$0xff]  ;;  %9181 = vmatpush3.msra.mxu0 %v2761_v37  ;;  %v3373_v46 = vld [vmem:[%s10077_s24 + $0x38] sm:$0xff] }
 0x227   : > { %9150 = vmatprep.subr.mxu1 %v2583_v55  ;;  %9182 = vmatprep.subr.mxu0 %v2760_v33  ;;  %v4179_v37 = vld [vmem:[%s12523_s1 + $0xf8] sm:$0xff] }
 0x228   : > { %9151 = vmatpush3.msra.mxu1 %v2583_v55  ;;  %9065 = vmatprep.mubr.msk.f32.mxu1 %vm1832_vm1, %v2201_v42  ;;  %v3372_v55 = vld [vmem:[%s10077_s24 + $0x30] sm:$0xff]  ;;  %v3371_v42 = vld [vmem:[%s10077_s24 + $0x28] sm:$0xff] }
 0x229   : > { %9152 = vmatprep.subr.mxu1 %v2582_v40  ;;  %9066 = vmatmul.mubr.msk.f32.gmra.mxu1 %vm1832_vm1, %v2202_v50  ;;  %v3369_v50 = vld [vmem:[%s10077_s24 + $0x18] sm:$0xff] }
 0x22a   : > { %9153 = vmatpush3.msra.mxu1 %v2582_v40  ;;  %9156 = vmatprep.mubr.f32.mxu1 %v10330_v26  ;;  %v3370_v40 = vld [vmem:[%s10077_s24 + $0x20] sm:$0xff] }
 0x22b   : > { %9154 = vmatprep.subr.mxu1 %v2581_v63  ;;  %9183 = vmatpush3.msra.mxu0 %v2760_v33  ;;  %v4174_v33 = vld [vmem:[%s12523_s1 + $0xd0] sm:$0xff] }
 0x22c   : > { %9155 = vmatpush3.msra.mxu1 %v2581_v63  ;;  %v2759_v63 = vld [vmem:[%s12520_s23 + $0x8] sm:$0xff] }
 0x22d   : > { %9212 = vmatprep.subr.mxu1 %v2987_v1  ;;  %9157 = vmatmul.mubr.f32.vlgmr.msra.gmra.mxu1 %v10328_v25 }
 0x22e   : > { %9213 = vmatpush3.msra.mxu1 %v2987_v1  ;;  %9159 = vmatprep.mubr.f32.mxu1 %v10344_v43  ;;  %v3368_v1 = vld [vmem:[%s10077_s24 + $0x10] sm:$0xff] }
 0x22f   : > { %9214 = vmatprep.subr.mxu1 %v2986_v57  ;;  %9184 = vmatprep.subr.mxu0 %v2759_v63 }
 0x230   : > { %9215 = vmatpush3.msra.mxu1 %v2986_v57  ;;  %9185 = vmatpush3.msra.mxu0 %v2759_v63  ;;  %v3367_v57 = vld [vmem:[%s10077_s24 + $0x8] sm:$0xff] }
 0x231   : > { %9216 = vmatprep.subr.mxu1 %v2985_v51  ;;  %9160 = vmatmul.mubr.f32.gmra.mxu1 %v10351_v48  ;;  %v4169_v63 = vld [vmem:[%s12523_s1 + $0xa8] sm:$0xff] }
 0x232   : > { %9217 = vmatpush3.msra.mxu1 %v2985_v51  ;;  %9162 = vmatprep.mubr.f32.mxu1 %v10365_v5  ;;  %v3366_v51 = vld [vmem:[%s10077_s24] sm:$0xff] }
 0x233   : > { %9218 = vmatprep.subr.mxu1 %v2984_v4 }
 0x234   : > { %9219 = vmatpush3.msra.mxu1 %v2984_v4  ;;  %v3771_v4 = vld [vmem:[%s12521_s26 + $0x78] sm:$0xff] }
 0x235   : > { %9220 = vmatprep.subr.mxu1 %v2983_v7  ;;  %9163 = vmatmul.mubr.f32.gmra.mxu1 %v10371_v14 }
 0x236   : > { %9221 = vmatpush3.msra.mxu1 %v2983_v7  ;;  %9165 = vmatprep.mubr.f32.mxu1 %v10375_v18  ;;  %v2758_v7 = vld [vmem:[%s12520_s23] sm:$0xff] }
 0x237   : > { %9222 = vmatprep.subr.mxu1 %v2982_v9  ;;  %9186 = vmatprep.subr.mxu0 %v2758_v7 }
 0x238   : > { %9223 = vmatpush3.msra.mxu1 %v2982_v9  ;;  %v3770_v9 = vld [vmem:[%s12521_s26 + $0x70] sm:$0xff]  ;;  %9187 = vmatpush3.msra.mxu0 %v2758_v7  ;;  %v4164_v7 = vld [vmem:[%s12523_s1 + $0x80] sm:$0xff] }
 0x239   : > { %9224 = vmatprep.subr.mxu1 %v2981_v52  ;;  %9166 = vmatmul.mubr.f32.gmra.mxu1 %v10384_v28 }
 0x23a   : > { %9225 = vmatpush3.msra.mxu1 %v2981_v52  ;;  %9168 = vmatprep.mubr.f32.mxu1 %v10392_v38  ;;  %v3769_v52 = vld [vmem:[%s12521_s26 + $0x68] sm:$0xff] }
 0x23b   : > { %9226 = vmatprep.subr.mxu1 %v2980_v12 }
 0x23c   : > { %9227 = vmatpush3.msra.mxu1 %v2980_v12  ;;  %v3768_v12 = vld [vmem:[%s12521_s26 + $0x60] sm:$0xff] }
 0x23d   : > { %9228 = vmatprep.subr.mxu1 %v2979_v49  ;;  %9169 = vmatmul.mubr.f32.gmra.mxu1 %v10402_v47 }
 0x23e   : > { %9229 = vmatpush3.msra.mxu1 %v2979_v49  ;;  %9171 = vmatprep.mubr.f32.mxu1 %v10413_v60  ;;  %v3767_v49 = vld [vmem:[%s12521_s26 + $0x58] sm:$0xff] }
 0x23f   : > { %9230 = vmatprep.subr.mxu1 %v2978_v17 }
 0x240   : > { %9231 = vmatpush3.msra.mxu1 %v2978_v17  ;;  %v10747_v17 = vld [vmem:[%s12522_s28 + $0x38] sm:$0xff] }
 0x241   : > { %9232 = vmatprep.subr.mxu1 %v2977_v56  ;;  %9172 = vmatmul.mubr.f32.gmra.mxu1 %v10419_v0 }
 0x242   : > { %9233 = vmatpush3.msra.mxu1 %v2977_v56  ;;  %9174 = vmatprep.mubr.f32.mxu1 %v10424_v6  ;;  %v3766_v56 = vld [vmem:[%s12521_s26 + $0x50] sm:$0xff] }
 0x243   : > { %9234 = vmatprep.subr.mxu1 %v2976_v20  ;;  %9268 = vmatprep.subr.mxu0 %v10747_v17 }
 0x244   : > { %9235 = vmatpush3.msra.mxu1 %v2976_v20  ;;  %v3765_v20 = vld [vmem:[%s12521_s26 + $0x48] sm:$0xff] }
 0x245   : > { %9236 = vmatprep.subr.mxu1 %v2975_v3  ;;  %9175 = vmatmul.mubr.f32.gmra.mxu1 %v10429_v8 }
 0x246   : > { %9237 = vmatpush3.msra.mxu1 %v2975_v3  ;;  %9177 = vmatprep.mubr.f32.mxu1 %v10433_v11  ;;  %v3764_v3 = vld [vmem:[%s12521_s26 + $0x40] sm:$0xff] }
 0x247   : > { %9238 = vmatprep.subr.mxu1 %v2974_v23 }
 0x248   : > { %9239 = vmatpush3.msra.mxu1 %v2974_v23  ;;  %v3763_v23 = vld [vmem:[%s12521_s26 + $0x38] sm:$0xff] }
 0x249   : > { %9240 = vmatprep.subr.mxu1 %v2973_v54  ;;  %9178 = vmatmul.mubr.f32.gmra.mxu1 %v10439_v13 }
 0x24a   : > { %9241 = vmatpush3.msra.mxu1 %v2973_v54  ;;  %9244 = vmatprep.mubr.f32.mxu1 %v10330_v26  ;;  %v3762_v54 = vld [vmem:[%s12521_s26 + $0x30] sm:$0xff] }
 0x24b   : > { %9242 = vmatprep.subr.mxu1 %v2972_v29 }
 0x24c   : > { %9243 = vmatpush3.msra.mxu1 %v2972_v29  ;;  %v3761_v29 = vld [vmem:[%s12521_s26 + $0x28] sm:$0xff] }
 0x24d   : > { %9308 = vmatprep.subr.mxu1 %v3381_v16  ;;  %9245 = vmatmul.mubr.f32.vlgmr.msra.gmra.mxu1 %v10328_v25 }
 0x24e   : > { %9309 = vmatpush3.msra.mxu1 %v3381_v16  ;;  %9247 = vmatprep.mubr.f32.mxu1 %v10344_v43  ;;  %v3760_v16 = vld [vmem:[%s12521_s26 + $0x20] sm:$0xff] }
 0x24f   : > { %9310 = vmatprep.subr.mxu1 %v3380_v31 }
 0x250   : > { %9311 = vmatpush3.msra.mxu1 %v3380_v31  ;;  %v3759_v31 = vld [vmem:[%s12521_s26 + $0x18] sm:$0xff] }
 0x251   : > { %9312 = vmatprep.subr.mxu1 %v3379_v10  ;;  %9248 = vmatmul.mubr.f32.gmra.mxu1 %v10351_v48 }
 0x252   : > { %9313 = vmatpush3.msra.mxu1 %v3379_v10  ;;  %9250 = vmatprep.mubr.f32.mxu1 %v10365_v5  ;;  %v3758_v10 = vld [vmem:[%s12521_s26 + $0x10] sm:$0xff] }
 0x253   : > { %9314 = vmatprep.subr.mxu1 %v3378_v34 }
 0x254   : > { %9315 = vmatpush3.msra.mxu1 %v3378_v34  ;;  %v3757_v34 = vld [vmem:[%s12521_s26 + $0x8] sm:$0xff] }
 0x255   : > { %9316 = vmatprep.subr.mxu1 %v3377_v27  ;;  %9251 = vmatmul.mubr.f32.gmra.mxu1 %v10371_v14 }
 0x256   : > { %9317 = vmatpush3.msra.mxu1 %v3377_v27  ;;  %9253 = vmatprep.mubr.f32.mxu1 %v10375_v18  ;;  %v3756_v27 = vld [vmem:[%s12521_s26] sm:$0xff] }
 0x257   : > { %9318 = vmatprep.subr.mxu1 %v3376_v22 }
 0x258   : > { %9319 = vmatpush3.msra.mxu1 %v3376_v22  ;;  %v4178_v22 = vld [vmem:[%s12523_s1 + $0xf0] sm:$0xff] }
 0x259   : > { %9320 = vmatprep.subr.mxu1 %v3375_v41  ;;  %9254 = vmatmul.mubr.f32.gmra.mxu1 %v10384_v28 }
 0x25a   : > { %9321 = vmatpush3.msra.mxu1 %v3375_v41  ;;  %9256 = vmatprep.mubr.f32.mxu1 %v10392_v38  ;;  %v4177_v41 = vld [vmem:[%s12523_s1 + $0xe8] sm:$0xff] }
 0x25b   : > { %9322 = vmatprep.subr.mxu1 %v3374_v35 }
 0x25c   : > { %9323 = vmatpush3.msra.mxu1 %v3374_v35  ;;  %v4176_v35 = vld [vmem:[%s12523_s1 + $0xe0] sm:$0xff] }
 0x25d   : > { %9324 = vmatprep.subr.mxu1 %v3373_v46  ;;  %9257 = vmatmul.mubr.f32.gmra.mxu1 %v10402_v47 }
 0x25e   : > { %9325 = vmatpush3.msra.mxu1 %v3373_v46  ;;  %9259 = vmatprep.mubr.f32.mxu1 %v10413_v60  ;;  %v4175_v46 = vld [vmem:[%s12523_s1 + $0xd8] sm:$0xff] }
 0x25f   : > { %9326 = vmatprep.subr.mxu1 %v3372_v55 }
 0x260   : > { %9327 = vmatpush3.msra.mxu1 %v3372_v55  ;;  %v4173_v55 = vld [vmem:[%s12523_s1 + $0xc8] sm:$0xff] }
 0x261   : > { %9328 = vmatprep.subr.mxu1 %v3371_v42  ;;  %9260 = vmatmul.mubr.f32.gmra.mxu1 %v10419_v0 }
 0x262   : > { %9329 = vmatpush3.msra.mxu1 %v3371_v42  ;;  %9262 = vmatprep.mubr.f32.mxu1 %v10424_v6  ;;  %v4172_v42 = vld [vmem:[%s12523_s1 + $0xc0] sm:$0xff] }
 0x263   : > { %9330 = vmatprep.subr.mxu1 %v3370_v40 }
 0x264   : > { %9331 = vmatpush3.msra.mxu1 %v3370_v40  ;;  %v4171_v40 = vld [vmem:[%s12523_s1 + $0xb8] sm:$0xff] }
 0x265   : > { %9332 = vmatprep.subr.mxu1 %v3369_v50  ;;  %9263 = vmatmul.mubr.f32.gmra.mxu1 %v10429_v8 }
 0x266   : > { %9333 = vmatpush3.msra.mxu1 %v3369_v50  ;;  %9265 = vmatprep.mubr.f32.mxu1 %v10433_v11  ;;  %v4170_v50 = vld [vmem:[%s12523_s1 + $0xb0] sm:$0xff] }
 0x267   : > { %9334 = vmatprep.subr.mxu1 %v3368_v1 }
 0x268   : > { %9335 = vmatpush3.msra.mxu1 %v3368_v1  ;;  %v4168_v1 = vld [vmem:[%s12523_s1 + $0xa0] sm:$0xff] }
 0x269   : > { %9336 = vmatprep.subr.mxu1 %v3367_v57  ;;  %9266 = vmatmul.mubr.f32.gmra.mxu1 %v10439_v13 }
 0x26a   : > { %9337 = vmatpush3.msra.mxu1 %v3367_v57  ;;  %9340 = vmatprep.mubr.f32.mxu1 %v10330_v26  ;;  %v4167_v57 = vld [vmem:[%s12523_s1 + $0x98] sm:$0xff] }
 0x26b   : > { %9338 = vmatprep.subr.mxu1 %v3366_v51 }
 0x26c   : > { %9339 = vmatpush3.msra.mxu1 %v3366_v51  ;;  %v4166_v51 = vld [vmem:[%s12523_s1 + $0x90] sm:$0xff] }
 0x26d   : > { %9396 = vmatprep.subr.mxu1 %v3771_v4  ;;  %9341 = vmatmul.mubr.f32.vlgmr.msra.gmra.mxu1 %v10328_v25 }
 0x26e   : > { %9397 = vmatpush3.msra.mxu1 %v3771_v4  ;;  %9343 = vmatprep.mubr.f32.mxu1 %v10344_v43  ;;  %v4165_v4 = vld [vmem:[%s12523_s1 + $0x88] sm:$0xff] }
 0x26f   : > { %9398 = vmatprep.subr.mxu1 %v3770_v9 }
 0x270   : > { %9399 = vmatpush3.msra.mxu1 %v3770_v9  ;;  %v4163_v9 = vld [vmem:[%s12523_s1 + $0x78] sm:$0xff] }
 0x271   : > { %9400 = vmatprep.subr.mxu1 %v3769_v52  ;;  %9344 = vmatmul.mubr.f32.gmra.mxu1 %v10351_v48 }
 0x272   : > { %9401 = vmatpush3.msra.mxu1 %v3769_v52  ;;  %9346 = vmatprep.mubr.f32.mxu1 %v10365_v5  ;;  %v4162_v52 = vld [vmem:[%s12523_s1 + $0x70] sm:$0xff] }
 0x273   : > { %9402 = vmatprep.subr.mxu1 %v3768_v12 }
 0x274   : > { %9403 = vmatpush3.msra.mxu1 %v3768_v12  ;;  %v4161_v12 = vld [vmem:[%s12523_s1 + $0x68] sm:$0xff] }
 0x275   : > { %9404 = vmatprep.subr.mxu1 %v3767_v49  ;;  %9347 = vmatmul.mubr.f32.gmra.mxu1 %v10371_v14 }
 0x276   : > { %9405 = vmatpush3.msra.mxu1 %v3767_v49  ;;  %9349 = vmatprep.mubr.f32.mxu1 %v10375_v18  ;;  %v4160_v49 = vld [vmem:[%s12523_s1 + $0x60] sm:$0xff] }
 0x277   : > { %9406 = vmatprep.subr.mxu1 %v3766_v56 }
 0x278   : > { %9407 = vmatpush3.msra.mxu1 %v3766_v56  ;;  %v4159_v56 = vld [vmem:[%s12523_s1 + $0x58] sm:$0xff] }
 0x279   : > { %9408 = vmatprep.subr.mxu1 %v3765_v20  ;;  %9350 = vmatmul.mubr.f32.gmra.mxu1 %v10384_v28 }
 0x27a   : > { %9409 = vmatpush3.msra.mxu1 %v3765_v20  ;;  %9352 = vmatprep.mubr.f32.mxu1 %v10392_v38  ;;  %v4158_v20 = vld [vmem:[%s12523_s1 + $0x50] sm:$0xff] }
 0x27b   : > { %9410 = vmatprep.subr.mxu1 %v3764_v3 }
 0x27c   : > { %9411 = vmatpush3.msra.mxu1 %v3764_v3  ;;  %v4157_v3 = vld [vmem:[%s12523_s1 + $0x48] sm:$0xff] }
 0x27d   : > { %9412 = vmatprep.subr.mxu1 %v3763_v23  ;;  %9353 = vmatmul.mubr.f32.gmra.mxu1 %v10402_v47 }
 0x27e   : > { %9413 = vmatpush3.msra.mxu1 %v3763_v23  ;;  %9355 = vmatprep.mubr.f32.mxu1 %v10413_v60  ;;  %v4156_v23 = vld [vmem:[%s12523_s1 + $0x40] sm:$0xff] }
 0x27f   : > { %9414 = vmatprep.subr.mxu1 %v3762_v54 }
 0x280   : > { %9415 = vmatpush3.msra.mxu1 %v3762_v54  ;;  %v4155_v54 = vld [vmem:[%s12523_s1 + $0x38] sm:$0xff] }
 0x281   : > { %9416 = vmatprep.subr.mxu1 %v3761_v29  ;;  %9356 = vmatmul.mubr.f32.gmra.mxu1 %v10419_v0 }
 0x282   : > { %9417 = vmatpush3.msra.mxu1 %v3761_v29  ;;  %9358 = vmatprep.mubr.f32.mxu1 %v10424_v6  ;;  %v4154_v29 = vld [vmem:[%s12523_s1 + $0x30] sm:$0xff] }
 0x283   : > { %9418 = vmatprep.subr.mxu1 %v3760_v16 }
 0x284   : > { %9419 = vmatpush3.msra.mxu1 %v3760_v16  ;;  %v4153_v16 = vld [vmem:[%s12523_s1 + $0x28] sm:$0xff] }
 0x285   : > { %9420 = vmatprep.subr.mxu1 %v3759_v31  ;;  %9359 = vmatmul.mubr.f32.gmra.mxu1 %v10429_v8 }
 0x286   : > { %9421 = vmatpush3.msra.mxu1 %v3759_v31  ;;  %9361 = vmatprep.mubr.f32.mxu1 %v10433_v11  ;;  %v4152_v31 = vld [vmem:[%s12523_s1 + $0x20] sm:$0xff] }
 0x287   : > { %9422 = vmatprep.subr.mxu1 %v3758_v10 }
 0x288   : > { %9423 = vmatpush3.msra.mxu1 %v3758_v10  ;;  %v4151_v10 = vld [vmem:[%s12523_s1 + $0x18] sm:$0xff] }
 0x289   : > { %9424 = vmatprep.subr.mxu1 %v3757_v34  ;;  %9362 = vmatmul.mubr.f32.gmra.mxu1 %v10439_v13 }
 0x28a   : > { %9425 = vmatpush3.msra.mxu1 %v3757_v34  ;;  %9428 = vmatprep.mubr.f32.mxu1 %v10330_v26  ;;  %v4150_v34 = vld [vmem:[%s12523_s1 + $0x10] sm:$0xff] }
 0x28b   : > { %9426 = vmatprep.subr.mxu1 %v3756_v27 }
 0x28c   : > { %9427 = vmatpush3.msra.mxu1 %v3756_v27  ;;  %v4149_v27 = vld [vmem:[%s12523_s1 + $0x8] sm:$0xff] }
 0x28d   : > { %9429 = vmatmul.mubr.f32.vlgmr.msra.gmra.mxu1 %v10328_v25  ;;  %4180 = vmatprep.subr.mxu1 %v4179_v37  ;;  %v4148_v37 = vld [vmem:[%s12523_s1] sm:$0xff]  ;;  %s12572_s1 = sld [smem:[#allocation17_spill]] }
 0x28e   : > { %9431 = vmatprep.mubr.f32.mxu1 %v10344_v43  ;;  %4181 = vmatpush1.msra.mxu1 %v4178_v22  ;;  %v12482_v22 = vmov 0.0  }
 0x28f   : > { %4182 = vmatprep.subr.mxu1 %v4177_v41 }
 0x290   : > { %4183 = vmatpush1.msra.mxu1 %v4176_v35 }
 0x291   : > { %9432 = vmatmul.mubr.f32.gmra.mxu1 %v10351_v48  ;;  %4184 = vmatprep.subr.mxu1 %v4175_v46 }
 0x292   : > { %9434 = vmatprep.mubr.f32.mxu1 %v10365_v5  ;;  %4185 = vmatpush1.msra.mxu1 %v4174_v33 }
 0x293   : > { %4186 = vmatprep.subr.mxu1 %v4173_v55 }
 0x294   : > { %4187 = vmatpush1.msra.mxu1 %v4172_v42 }
 0x295   : > { %9435 = vmatmul.mubr.f32.gmra.mxu1 %v10371_v14  ;;  %4188 = vmatprep.subr.mxu1 %v4171_v40 }
 0x296   : > { %9437 = vmatprep.mubr.f32.mxu1 %v10375_v18  ;;  %4189 = vmatpush1.msra.mxu1 %v4170_v50 }
 0x297   : > { %4190 = vmatprep.subr.mxu1 %v4169_v63 }
 0x298   : > { %4191 = vmatpush1.msra.mxu1 %v4168_v1 }
 0x299   : > { %9438 = vmatmul.mubr.f32.gmra.mxu1 %v10384_v28  ;;  %4192 = vmatprep.subr.mxu1 %v4167_v57 }
 0x29a   : > { %9440 = vmatprep.mubr.f32.mxu1 %v10392_v38  ;;  %4193 = vmatpush1.msra.mxu1 %v4166_v51 }
 0x29b   : > { %4194 = vmatprep.subr.mxu1 %v4165_v4 }
 0x29c   : > { %4195 = vmatpush1.msra.mxu1 %v4164_v7 }
 0x29d   : > { %9441 = vmatmul.mubr.f32.gmra.mxu1 %v10402_v47  ;;  %4196 = vmatprep.subr.mxu1 %v4163_v9 }
 0x29e   : > { %9443 = vmatprep.mubr.f32.mxu1 %v10413_v60  ;;  %4197 = vmatpush1.msra.mxu1 %v4162_v52 }
 0x29f   : > { %4198 = vmatprep.subr.mxu1 %v4161_v12 }
 0x2a0   : > { %4199 = vmatpush1.msra.mxu1 %v4160_v49 }
 0x2a1   : > { %9444 = vmatmul.mubr.f32.gmra.mxu1 %v10419_v0  ;;  %4200 = vmatprep.subr.mxu1 %v4159_v56  ;;  %v10857_v56 = vpop.f32.mrf.mxu0 }
 0x2a2   : > { %9446 = vmatprep.mubr.f32.mxu1 %v10424_v6  ;;  %4201 = vmatpush1.msra.mxu1 %v4158_v20 }
 0x2a3   : > { %4202 = vmatprep.subr.mxu1 %v4157_v3 }
 0x2a4   : > { %4203 = vmatpush1.msra.mxu1 %v4156_v23 }
 0x2a5   : > { %9447 = vmatmul.mubr.f32.gmra.mxu1 %v10429_v8  ;;  %4204 = vmatprep.subr.mxu1 %v4155_v54  ;;  %v10865_v54 = vpop.f32.mrf.mxu0 }
 0x2a6   : > { %9449 = vmatprep.mubr.f32.mxu1 %v10433_v11  ;;  %4205 = vmatpush1.msra.mxu1 %v4154_v29 }
 0x2a7   : > { %4206 = vmatprep.subr.mxu1 %v4153_v16 }
 0x2a8   : > { %4207 = vmatpush1.msra.mxu1 %v4152_v31 }
 0x2a9   : > { %9450 = vmatmul.mubr.f32.gmra.mxu1 %v10439_v13  ;;  %4208 = vmatprep.subr.mxu1 %v4151_v10  ;;  %v8950_v41 = vpop.f32.mrf.mxu1  ;;  %v10873_v10 = vpop.f32.mrf.mxu0 }
 0x2aa   : > { %4209 = vmatpush1.msra.mxu1 %v4150_v34  ;;  %4244 = vmatprep.mubr.f32.mxu1 %v12482_v22 }
 0x2ab   : > { %4210 = vmatprep.subr.mxu1 %v4149_v27  ;;  %v10821_v35 = vpop.f32.mrf.mxu1 }
 0x2ac   : > { %4211 = vmatpush1.msra.mxu1 %v4148_v37 }
 0x2ad   : > { %4245 = vmatmul.mubr.f32.vlgmr.msra.gmra.mxu1 %v10330_v26 }
 0x2ae   : > { %4250 = vmatprep.mubr.f32.mxu1 %v12482_v22 }
 0x2af   : > { %v8953_v46 = vpop.f32.mrf.mxu1 }
 0x2b1   : > { %4251 = vmatmul.mubr.f32.gmra.mxu1 %v10328_v25  ;;  %v10826_v33 = vpop.f32.mrf.mxu1 }
 0x2b2   : > { %4256 = vmatprep.mubr.f32.mxu1 %v12482_v22 }
 0x2b4   : > { %v8956_v55 = vpop.f32.mrf.mxu1 }
 0x2b5   : > { %4257 = vmatmul.mubr.f32.gmra.mxu1 %v10344_v43 }
 0x2b6   : > { %v10830_v42 = vpop.f32.mrf.mxu1  ;;  %4262 = vmatprep.mubr.f32.mxu1 %v12482_v22 }
 0x2b7   : > { %12524 = vst [vmem:[#allocation24_spill] sm:$0xff] %v10830_v42 }
 0x2b9   : > { %v8959_v40 = vpop.f32.mrf.mxu1  ;;  %4263 = vmatmul.mubr.f32.gmra.mxu1 %v10351_v48 }
 0x2ba   : > { %4268 = vmatprep.mubr.f32.mxu1 %v12482_v22 }
 0x2bb   : > { %v10835_v50 = vpop.f32.mrf.mxu1 }
 0x2bc   : > { %12525 = vst [vmem:[#allocation25_spill] sm:$0xff] %v10835_v50 }
 0x2bd   : > { %v8962_v63 = vpop.f32.mrf.mxu1  ;;  %4269 = vmatmul.mubr.f32.gmra.mxu1 %v10365_v5 }
 0x2be   : > { %4274 = vmatprep.mubr.f32.mxu1 %v12482_v22 }
 0x2bf   : > { %v10839_v1 = vpop.f32.mrf.mxu1 }
 0x2c0   : > { %12526 = vst [vmem:[#allocation26_spill] sm:$0xff] %v10839_v1  ;;  %v3154_v1 = vld [vmem:[%s12522_s28 + $0x28] sm:$0xff] }
 0x2c1   : > { %v8965_v57 = vpop.f32.mrf.mxu1  ;;  %4275 = vmatmul.mubr.f32.gmra.mxu1 %v10371_v14 }
 0x2c2   : > { %4280 = vmatprep.mubr.f32.mxu1 %v12482_v22 }
 0x2c3   : > { %v10843_v51 = vpop.f32.mrf.mxu1 }
 0x2c4   : > { %12527 = vst [vmem:[#allocation27_spill] sm:$0xff] %v10843_v51 }
 0x2c5   : > { %v8968_v4 = vpop.f32.mrf.mxu1  ;;  %4281 = vmatmul.mubr.f32.gmra.mxu1 %v10375_v18 }
 0x2c6   : > { %4286 = vmatprep.mubr.f32.mxu1 %v12482_v22 }
 0x2c7   : > { %v10847_v7 = vpop.f32.mrf.mxu1 }
 0x2c8   : > { %12528 = vst [vmem:[#allocation28_spill] sm:$0xff] %v10847_v7 }
 0x2c9   : > { %v8971_v9 = vpop.f32.mrf.mxu1  ;;  %4287 = vmatmul.mubr.f32.gmra.mxu1 %v10384_v28 }
 0x2ca   : > { %4292 = vmatprep.mubr.f32.mxu1 %v12482_v22 }
 0x2cb   : > { %v10851_v52 = vpop.f32.mrf.mxu1 }
 0x2cc   : > { %12529 = vst [vmem:[#allocation29_spill] sm:$0xff] %v10851_v52 }
 0x2cd   : > { %v9046_v12 = vpop.f32.mrf.mxu1  ;;  %4293 = vmatmul.mubr.f32.gmra.mxu1 %v10392_v38 }
 0x2ce   : > { %v10854_v49 = vmul.f32 %v9046_v12, %v8950_v41  ;;  %4298 = vmatprep.mubr.f32.mxu1 %v12482_v22  ;;  %v10881_v41 = vpop.f32.mrf.mxu0 }
 0x2cf   : > { %v10859_v20 = vpop.f32.mrf.mxu1 }
 0x2d1   : > { %v9049_v3 = vpop.f32.mrf.mxu1  ;;  %4299 = vmatmul.mubr.f32.gmra.mxu1 %v10402_v47 }
 0x2d2   : > { %v10862_v23 = vmul.f32 %v9049_v3, %v8953_v46  ;;  %4304 = vmatprep.mubr.f32.mxu1 %v12482_v22  ;;  %v10889_v3 = vpop.f32.mrf.mxu0 }
 0x2d3   : > { %v10867_v29 = vpop.f32.mrf.mxu1 }
 0x2d4   : > { %12530 = vst [vmem:[#allocation30_spill] sm:$0xff] %v10862_v23  ;;  %12531 = vst [vmem:[#allocation31_spill] sm:$0xff] %v10867_v29 }
 0x2d5   : > { %v9052_v16 = vpop.f32.mrf.mxu1  ;;  %4305 = vmatmul.mubr.f32.gmra.mxu1 %v10413_v60 }
 0x2d6   : > { %v10870_v31 = vmul.f32 %v9052_v16, %v8956_v55  ;;  %4310 = vmatprep.mubr.f32.mxu1 %v12482_v22 }
 0x2d7   : > { %v10875_v34 = vpop.f32.mrf.mxu1 }
 0x2d8   : > { %12532 = vst [vmem:[#allocation32_spill] sm:$0xff] %v10870_v31  ;;  %12533 = vst [vmem:[#allocation33_spill] sm:$0xff] %v10875_v34 }
 0x2d9   : > { %v9055_v27 = vpop.f32.mrf.mxu1  ;;  %4311 = vmatmul.mubr.f32.gmra.mxu1 %v10419_v0 }
 0x2da   : > { %v10878_v37 = vmul.f32 %v9055_v27, %v8959_v40  ;;  %4316 = vmatprep.mubr.f32.mxu1 %v12482_v22  ;;  %v10897_v27 = vpop.f32.mrf.mxu0 }
 0x2db   : > { %v10883_v46 = vpop.f32.mrf.mxu1 }
 0x2dc   : > { %12534 = vst [vmem:[#allocation34_spill] sm:$0xff] %v10878_v37  ;;  %12535 = vst [vmem:[#allocation35_spill] sm:$0xff] %v10883_v46 }
 0x2dd   : > { %v9058_v12 = vpop.f32.mrf.mxu1  ;;  %4317 = vmatmul.mubr.f32.gmra.mxu1 %v10424_v6 }
 0x2de   : > { %v10886_v55 = vmul.f32 %v9058_v12, %v8962_v63  ;;  %4322 = vmatprep.mubr.f32.mxu1 %v12482_v22  ;;  %v10905_v12 = vpop.f32.mrf.mxu0 }
 0x2df   : > { %v10891_v16 = vpop.f32.mrf.mxu1 }
 0x2e0   : > { %12536 = vst [vmem:[#allocation36_spill] sm:$0xff] %v10886_v55  ;;  %12537 = vst [vmem:[#allocation37_spill] sm:$0xff] %v10891_v16 }
 0x2e1   : > { %v9061_v52 = vpop.f32.mrf.mxu1  ;;  %4323 = vmatmul.mubr.f32.gmra.mxu1 %v10429_v8 }
 0x2e2   : > { %v10894_v40 = vmul.f32 %v9061_v52, %v8965_v57  ;;  %4328 = vmatprep.mubr.f32.mxu1 %v12482_v22 }
 0x2e3   : > { %v10899_v7 = vpop.f32.mrf.mxu1 }
 0x2e4   : > { %12538 = vst [vmem:[#allocation38_spill] sm:$0xff] %v10894_v40  ;;  %12539 = vst [vmem:[#allocation39_spill] sm:$0xff] %v10899_v7  ;;  %v10912_v40 = vpop.f32.mrf.mxu0 }
 0x2e5   : > { %v9064_v51 = vpop.f32.mrf.mxu1  ;;  %4329 = vmatmul.mubr.f32.gmra.mxu1 %v10433_v11 }
 0x2e6   : > { %v10902_v63 = vmul.f32 %v9064_v51, %v8968_v4  ;;  %4334 = vmatprep.mubr.f32.mxu1 %v12482_v22  ;;  %v10916_v51 = vpop.f32.mrf.mxu0 }
 0x2e7   : > { %v10907_v55 = vpop.f32.mrf.mxu1 }
 0x2e8   : > { %12540 = vst [vmem:[#allocation40_spill] sm:$0xff] %v10902_v63  ;;  %12541 = vst [vmem:[#allocation41_spill] sm:$0xff] %v10907_v55 }
 0x2e9   : > { %v9067_v57 = vpop.f32.mrf.mxu1  ;;  %4335 = vmatmul.mubr.f32.gmra.mxu1 %v10439_v13 }
 0x2ea   : > { %v10910_v52 = vmul.f32 %v9067_v57, %v8971_v9  ;;  %v3155_v9 = vld [vmem:[%s12522_s28 + $0x30] sm:$0xff]  ;;  %v10922_v57 = vpop.f32.mrf.mxu0 }
 0x2eb   : > { %v10914_v7 = vpop.f32.mrf.mxu1 }
 0x2ec   : > { %12542 = vst [vmem:[#allocation42_spill] sm:$0xff] %v10910_v52  ;;  %12543 = vst [vmem:[#allocation43_spill] sm:$0xff] %v10914_v7 }
 0x2ed   : > { %v9158_v16 = vpop.f32.mrf.mxu1 }
 0x2ee   : > { %v2743_v63 = vmul.f32 %v9158_v16, %v10857_v56  ;;  %v10931_v16 = vpop.f32.mrf.mxu0 }
 0x2ef   : > { %v2663_v4 = vpop.f32.mrf.mxu1 }
 0x2f0   : > { %v2742_v22 = vmul.f32 %v2663_v4, %v10865_v54 }
 0x2f1   : > { %v9161_v55 = vpop.f32.mrf.mxu1 }
 0x2f2   : > { %9188 = vmatprep.mubr.msk.f32.mxu0 %vm2762_vm2, %v2742_v22  ;;  %v2745_v4 = vmul.f32 %v9161_v55, %v10873_v10  ;;  %v3153_v22 = vld [vmem:[%s12522_s28 + $0x20] sm:$0xff] }
 0x2f3   : > { %v2673_v52 = vpop.f32.mrf.mxu1  ;;  %9189 = vmatmul.mubr.msk.f32.vlgmr.msra.gmra.mxu0 %vm2762_vm2, %v2743_v63 }
 0x2f4   : > { %v2744_v7 = vmul.f32 %v2673_v52, %v10881_v41  ;;  %9269 = vmatpush3.msra.mxu0 %v10747_v17  ;;  %v3152_v17 = vld [vmem:[%s12522_s28 + $0x18] sm:$0xff] }
 0x2f5   : > { %v9164_v37 = vpop.f32.mrf.mxu1  ;;  %9270 = vmatprep.subr.mxu0 %v3155_v9 }
 0x2f6   : > { %9191 = vmatprep.mubr.msk.f32.mxu0 %vm2762_vm2, %v2744_v7  ;;  %9271 = vmatpush3.msra.mxu0 %v3155_v9  ;;  %v2747_v55 = vmul.f32 %v9164_v37, %v10889_v3  ;;  %v3151_v7 = vld [vmem:[%s12522_s28 + $0x10] sm:$0xff]  ;;  %v10939_v9 = vpop.f32.mrf.mxu0 }
 0x2f7   : > { %v2683_v46 = vpop.f32.mrf.mxu1  ;;  %9192 = vmatmul.mubr.msk.f32.gmra.mxu0 %vm2762_vm2, %v2745_v4  ;;  %9272 = vmatprep.subr.mxu0 %v3154_v1 }
 0x2f8   : > { %v2746_v63 = vmul.f32 %v2683_v46, %v10897_v27  ;;  %9273 = vmatpush3.msra.mxu0 %v3154_v1  ;;  %v3150_v1 = vld [vmem:[%s12522_s28 + $0x8] sm:$0xff] }
 0x2f9   : > { %v9167_v52 = vpop.f32.mrf.mxu1  ;;  %9274 = vmatprep.subr.mxu0 %v3153_v22 }
 0x2fa   : > { %9194 = vmatprep.mubr.msk.f32.mxu0 %vm2762_vm2, %v2746_v63  ;;  %9275 = vmatpush3.msra.mxu0 %v3153_v22  ;;  %v2749_v37 = vmul.f32 %v9167_v52, %v10905_v12  ;;  %v3149_v22 = vld [vmem:[%s12522_s28] sm:$0xff]  ;;  %v10947_v63 = vpop.f32.mrf.mxu0 }
 0x2fb   : > { %v2693_v50 = vpop.f32.mrf.mxu1  ;;  %9195 = vmatmul.mubr.msk.f32.gmra.mxu0 %vm2762_vm2, %v2747_v55  ;;  %9276 = vmatprep.subr.mxu0 %v3152_v17 }
 0x2fc   : > { %v2748_v46 = vmul.f32 %v2693_v50, %v10912_v40  ;;  %9277 = vmatpush3.msra.mxu0 %v3152_v17  ;;  %v3546_v50 = vld [vmem:[%s12544_s2 + $0x18] sm:$0xff]  ;;  %v10954_v52 = vpop.f32.mrf.mxu0 }
 0x2fd   : > { %v9170_v4 = vpop.f32.mrf.mxu1  ;;  %9278 = vmatprep.subr.mxu0 %v3151_v7 }
 0x2fe   : > { %9197 = vmatprep.mubr.msk.f32.mxu0 %vm2762_vm2, %v2748_v46  ;;  %9279 = vmatpush3.msra.mxu0 %v3151_v7  ;;  %v2751_v17 = vmul.f32 %v9170_v4, %v10916_v51 }
 0x2ff   : > { %v2703_v31 = vpop.f32.mrf.mxu1  ;;  %9198 = vmatmul.mubr.msk.f32.gmra.mxu0 %vm2762_vm2, %v2749_v37  ;;  %9280 = vmatprep.subr.mxu0 %v3150_v1 }
 0x300   : > { %v2750_v55 = vmul.f32 %v2703_v31, %v10922_v57  ;;  %9281 = vmatpush3.msra.mxu0 %v3150_v1  ;;  %v10960_v1 = vpop.f32.mrf.mxu0 }
 0x301   : > { %v9173_v34 = vpop.f32.mrf.mxu1  ;;  %9282 = vmatprep.subr.mxu0 %v3149_v22 }
 0x302   : > { %9200 = vmatprep.mubr.msk.f32.mxu0 %vm2762_vm2, %v2750_v55  ;;  %9283 = vmatpush3.msra.mxu0 %v3149_v22  ;;  %v2753_v37 = vmul.f32 %v9173_v34, %v10931_v16 }
 0x303   : > { %v2713_v7 = vpop.f32.mrf.mxu1  ;;  %9201 = vmatmul.mubr.msk.f32.gmra.mxu0 %vm2762_vm2, %v2751_v17  ;;  %9364 = vmatprep.subr.mxu0 %v3546_v50  ;;  %v10966_v17 = vpop.f32.mrf.mxu0 }
 0x304   : > { %v2752_v46 = vmul.f32 %v2713_v7, %v10939_v9 }
 0x305   : > { %v9176_v31 = vpop.f32.mrf.mxu1 }
 0x306   : > { %9203 = vmatprep.mubr.msk.f32.mxu0 %vm2762_vm2, %v2752_v46  ;;  %v2755_v55 = vmul.f32 %v9176_v31, %v10947_v63 }
 0x307   : > { %v2723_v4 = vpop.f32.mrf.mxu1  ;;  %9204 = vmatmul.mubr.msk.f32.gmra.mxu0 %vm2762_vm2, %v2753_v37 }
 0x308   : > { %v2754_v22 = vmul.f32 %v2723_v4, %v10954_v52 }
 0x309   : > { %v9179_v42 = vpop.f32.mrf.mxu1 }
 0x30a   : > { %9206 = vmatprep.mubr.msk.f32.mxu0 %vm2762_vm2, %v2754_v22  ;;  %v2757_v46 = vmul.f32 %v9179_v42, %v10960_v1 }
 0x30b   : > { %v2733_v7 = vpop.f32.mrf.mxu1  ;;  %9207 = vmatmul.mubr.msk.f32.gmra.mxu0 %vm2762_vm2, %v2755_v55  ;;  %v3545_v55 = vld [vmem:[%s12544_s2 + $0x10] sm:$0xff] }
 0x30c   : > { %v2756_v34 = vmul.f32 %v2733_v7, %v10966_v17  ;;  %v3544_v7 = vld [vmem:[%s12544_s2 + $0x8] sm:$0xff] }
 0x30d   : > { %v9246_v23 = vpop.f32.mrf.mxu1 }
 0x30e   : > { %9209 = vmatprep.mubr.msk.f32.mxu0 %vm2762_vm2, %v2756_v34  ;;  %v3134_v4 = vmul.f32 %v9246_v23, %v10571_v61  ;;  %v3543_v61 = vld [vmem:[%s12544_s2] sm:$0xff]  ;;  %s12573_s2 = sld [smem:[#allocation9_spill]] }
 0x30f   : > { %9210 = vmatmul.mubr.msk.f32.gmra.mxu0 %vm2762_vm2, %v2757_v46  ;;  %v3054_v37 = vpop.f32.mrf.mxu1 }
 0x310   : > { %v3133_v31 = vmul.f32 %v3054_v37, %v10575_v62  ;;  %v3936_v37 = vld [vmem:[%s12545_s7 + $0x18] sm:$0xff] }
 0x311   : > { %v9249_v22 = vpop.f32.mrf.mxu1 }
 0x312   : > { %9284 = vmatprep.mubr.msk.f32.mxu0 %vm1832_vm1, %v3133_v31  ;;  %v3136_v34 = vmul.f32 %v9249_v22, %v10581_v2 }
 0x313   : > { %v3064_v29 = vpop.f32.mrf.mxu1  ;;  %9285 = vmatmul.mubr.msk.f32.vlgmr.msra.gmra.mxu0 %vm1832_vm1, %v3134_v4 }
 0x314   : > { %v3135_v42 = vmul.f32 %v3064_v29, %v10585_v58  ;;  %9365 = vmatpush3.msra.mxu0 %v3546_v50 }
 0x315   : > { %v9252_v46 = vpop.f32.mrf.mxu1  ;;  %9366 = vmatprep.subr.mxu0 %v3545_v55 }
 0x316   : > { %9287 = vmatprep.mubr.msk.f32.mxu0 %vm1832_vm1, %v3135_v42  ;;  %9367 = vmatpush3.msra.mxu0 %v3545_v55  ;;  %v3138_v58 = vmul.f32 %v9252_v46, %v10593_v45 }
 0x317   : > { %v3074_v62 = vpop.f32.mrf.mxu1  ;;  %9288 = vmatmul.mubr.msk.f32.gmra.mxu0 %vm1832_vm1, %v3136_v34  ;;  %9368 = vmatprep.subr.mxu0 %v3544_v7 }
 0x318   : > { %v3137_v23 = vmul.f32 %v3074_v62, %v10597_v15  ;;  %9369 = vmatpush3.msra.mxu0 %v3544_v7 }
 0x319   : > { %v9255_v29 = vpop.f32.mrf.mxu1  ;;  %9370 = vmatprep.subr.mxu0 %v3543_v61 }
 0x31a   : > { %9290 = vmatprep.mubr.msk.f32.mxu0 %vm1832_vm1, %v3137_v23  ;;  %9371 = vmatpush3.msra.mxu0 %v3543_v61  ;;  %v3140_v31 = vmul.f32 %v9255_v29, %v10605_v19  ;;  %v3935_v29 = vld [vmem:[%s12545_s7 + $0x10] sm:$0xff] }
 0x31b   : > { %v3084_v2 = vpop.f32.mrf.mxu1  ;;  %9291 = vmatmul.mubr.msk.f32.gmra.mxu0 %vm1832_vm1, %v3138_v58  ;;  %9452 = vmatprep.subr.mxu0 %v3936_v37 }
 0x31c   : > { %v3139_v50 = vmul.f32 %v3084_v2, %v10609_v21 }
 0x31d   : > { %v9258_v4 = vpop.f32.mrf.mxu1 }
 0x31e   : > { %9293 = vmatprep.mubr.msk.f32.mxu0 %vm1832_vm1, %v3139_v50  ;;  %v3142_v22 = vmul.f32 %v9258_v4, %v10617_v24  ;;  %v3933_v4 = vld [vmem:[%s12545_s7] sm:$0xff] }
 0x31f   : > { %v3094_v15 = vpop.f32.mrf.mxu1  ;;  %9294 = vmatmul.mubr.msk.f32.gmra.mxu0 %vm1832_vm1, %v3140_v31 }
 0x320   : > { %v3141_v45 = vmul.f32 %v3094_v15, %v10621_v30 }
 0x321   : > { %v9261_v55 = vpop.f32.mrf.mxu1 }
 0x322   : > { %9296 = vmatprep.mubr.msk.f32.mxu0 %vm1832_vm1, %v3141_v45  ;;  %v3144_v19 = vmul.f32 %v9261_v55, %v10629_v32 }
 0x323   : > { %v3104_v42 = vpop.f32.mrf.mxu1  ;;  %9297 = vmatmul.mubr.msk.f32.gmra.mxu0 %vm1832_vm1, %v3142_v22  ;;  %v4372_v22 = vld [vmem:[%s12546_s10 + $0xf8] sm:$0xff] }
 0x324   : > { %v3143_v21 = vmul.f32 %v3104_v42, %v10633_v36 }
 0x325   : > { %v9264_v7 = vpop.f32.mrf.mxu1 }
 0x326   : > { %9299 = vmatprep.mubr.msk.f32.mxu0 %vm1832_vm1, %v3143_v21  ;;  %v3146_v24 = vmul.f32 %v9264_v7, %v10641_v39 }
 0x327   : > { %v3114_v34 = vpop.f32.mrf.mxu1  ;;  %9300 = vmatmul.mubr.msk.f32.gmra.mxu0 %vm1832_vm1, %v3144_v19 }
 0x328   : > { %v3145_v30 = vmul.f32 %v3114_v34, %v10645_v44 }
 0x329   : > { %v9267_v46 = vpop.f32.mrf.mxu1 }
 0x32a   : > { %9302 = vmatprep.mubr.msk.f32.mxu0 %vm1832_vm1, %v3145_v30  ;;  %v3148_v36 = vmul.f32 %v9267_v46, %v10653_v53 }
 0x32b   : > { %v3124_v61 = vpop.f32.mrf.mxu1  ;;  %9303 = vmatmul.mubr.msk.f32.gmra.mxu0 %vm1832_vm1, %v3146_v24 }
 0x32c   : > { %v3147_v32 = vmul.f32 %v3124_v61, %v10657_v59  ;;  %v3934_v59 = vld [vmem:[%s12545_s7 + $0x8] sm:$0xff] }
 0x32d   : > { %v9342_v62 = vpop.f32.mrf.mxu1 }
 0x32e   : > { %9305 = vmatprep.mubr.msk.f32.mxu0 %vm1832_vm1, %v3147_v32  ;;  %v3528_v23 = vmul.f32 %v9342_v62, %v10857_v56 }
 0x32f   : > { %9306 = vmatmul.mubr.msk.f32.gmra.mxu0 %vm1832_vm1, %v3148_v36  ;;  %v3448_v44 = vpop.f32.mrf.mxu1 }
 0x330   : > { %v3527_v39 = vmul.f32 %v3448_v44, %v10865_v54 }
 0x331   : > { %v9345_v58 = vpop.f32.mrf.mxu1 }
 0x332   : > { %9372 = vmatprep.mubr.msk.f32.mxu0 %vm2762_vm2, %v3527_v39  ;;  %v3530_v50 = vmul.f32 %v9345_v58, %v10873_v10 }
 0x333   : > { %v3458_v2 = vpop.f32.mrf.mxu1  ;;  %9373 = vmatmul.mubr.msk.f32.vlgmr.msra.gmra.mxu0 %vm2762_vm2, %v3528_v23 }
 0x334   : > { %v3529_v53 = vmul.f32 %v3458_v2, %v10881_v41  ;;  %9453 = vmatpush3.msra.mxu0 %v3936_v37 }
 0x335   : > { %v9348_v31 = vpop.f32.mrf.mxu1  ;;  %9454 = vmatprep.subr.mxu0 %v3935_v29 }
 0x336   : > { %9375 = vmatprep.mubr.msk.f32.mxu0 %vm2762_vm2, %v3529_v53  ;;  %9455 = vmatpush3.msra.mxu0 %v3935_v29  ;;  %v3532_v55 = vmul.f32 %v9348_v31, %v10889_v3 }
 0x337   : > { %v3468_v15 = vpop.f32.mrf.mxu1  ;;  %9376 = vmatmul.mubr.msk.f32.gmra.mxu0 %vm2762_vm2, %v3530_v50  ;;  %9456 = vmatprep.subr.mxu0 %v3934_v59 }
 0x338   : > { %v3531_v45 = vmul.f32 %v3468_v15, %v10897_v27  ;;  %9457 = vmatpush3.msra.mxu0 %v3934_v59 }
 0x339   : > { %v9351_v37 = vpop.f32.mrf.mxu1  ;;  %9458 = vmatprep.subr.mxu0 %v3933_v4 }
 0x33a   : > { %9378 = vmatprep.mubr.msk.f32.mxu0 %vm2762_vm2, %v3531_v45  ;;  %9459 = vmatpush3.msra.mxu0 %v3933_v4  ;;  %v3534_v19 = vmul.f32 %v9351_v37, %v10905_v12  ;;  %v4371_v45 = vld [vmem:[%s12546_s10 + $0xf0] sm:$0xff]  ;;  %v4369_v37 = vld [vmem:[%s12546_s10 + $0xe0] sm:$0xff] }
 0x33b   : > { %v3478_v42 = vpop.f32.mrf.mxu1  ;;  %9379 = vmatmul.mubr.msk.f32.gmra.mxu0 %vm2762_vm2, %v3532_v55  ;;  %4373 = vmatprep.subr.mxu0 %v4372_v22  ;;  %v4370_v22 = vld [vmem:[%s12546_s10 + $0xe8] sm:$0xff] }
 0x33c   : > { %v3533_v21 = vmul.f32 %v3478_v42, %v10912_v40 }
 0x33d   : > { %v9354_v7 = vpop.f32.mrf.mxu1 }
 0x33e   : > { %9381 = vmatprep.mubr.msk.f32.mxu0 %vm2762_vm2, %v3533_v21  ;;  %v3536_v24 = vmul.f32 %v9354_v7, %v10916_v51  ;;  %v4368_v21 = vld [vmem:[%s12546_s10 + $0xd8] sm:$0xff]  ;;  %v4366_v7 = vld [vmem:[%s12546_s10 + $0xc8] sm:$0xff] }
 0x33f   : > { %v3488_v34 = vpop.f32.mrf.mxu1  ;;  %9382 = vmatmul.mubr.msk.f32.gmra.mxu0 %vm2762_vm2, %v3534_v19  ;;  %v4367_v19 = vld [vmem:[%s12546_s10 + $0xd0] sm:$0xff] }
 0x340   : > { %v3535_v30 = vmul.f32 %v3488_v34, %v10922_v57 }
 0x341   : > { %v9357_v46 = vpop.f32.mrf.mxu1 }
 0x342   : > { %9384 = vmatprep.mubr.msk.f32.mxu0 %vm2762_vm2, %v3535_v30  ;;  %v3538_v36 = vmul.f32 %v9357_v46, %v10931_v16 }
 0x343   : > { %v3498_v61 = vpop.f32.mrf.mxu1  ;;  %9385 = vmatmul.mubr.msk.f32.gmra.mxu0 %vm2762_vm2, %v3536_v24 }
 0x344   : > { %v3537_v32 = vmul.f32 %v3498_v61, %v10939_v9  ;;  %v4363_v61 = vld [vmem:[%s12546_s10 + $0xb0] sm:$0xff] }
 0x345   : > { %v9360_v62 = vpop.f32.mrf.mxu1 }
 0x346   : > { %9387 = vmatprep.mubr.msk.f32.mxu0 %vm2762_vm2, %v3537_v32  ;;  %v3540_v23 = vmul.f32 %v9360_v62, %v10947_v63  ;;  %v4362_v32 = vld [vmem:[%s12546_s10 + $0xa8] sm:$0xff] }
 0x347   : > { %v3508_v44 = vpop.f32.mrf.mxu1  ;;  %9388 = vmatmul.mubr.msk.f32.gmra.mxu0 %vm2762_vm2, %v3538_v36 }
 0x348   : > { %v3539_v39 = vmul.f32 %v3508_v44, %v10954_v52 }
 0x349   : > { %v9363_v58 = vpop.f32.mrf.mxu1 }
 0x34a   : > { %9390 = vmatprep.mubr.msk.f32.mxu0 %vm2762_vm2, %v3539_v39  ;;  %v3542_v53 = vmul.f32 %v9363_v58, %v10960_v1  ;;  %v4358_v58 = vld [vmem:[%s12546_s10 + $0x88] sm:$0xff] }
 0x34b   : > { %v3518_v29 = vpop.f32.mrf.mxu1  ;;  %9391 = vmatmul.mubr.msk.f32.gmra.mxu0 %vm2762_vm2, %v3540_v23  ;;  %v4359_v23 = vld [vmem:[%s12546_s10 + $0x90] sm:$0xff] }
 0x34c   : > { %v3541_v2 = vmul.f32 %v3518_v29, %v10966_v17 }
 0x34d   : > { %v9430_v59 = vpop.f32.mrf.mxu1 }
 0x34e   : > { %9393 = vmatprep.mubr.msk.f32.mxu0 %vm2762_vm2, %v3541_v2  ;;  %v3918_v4 = vmul.f32 %v9430_v59, %v10857_v56 }
 0x34f   : > { %9394 = vmatmul.mubr.msk.f32.gmra.mxu0 %vm2762_vm2, %v3542_v53  ;;  %v3838_v50 = vpop.f32.mrf.mxu1 }
 0x350   : > { %v3917_v31 = vmul.f32 %v3838_v50, %v10865_v54  ;;  %v4355_v50 = vld [vmem:[%s12546_s10 + $0x70] sm:$0xff] }
 0x351   : > { %v9433_v15 = vpop.f32.mrf.mxu1 }
 0x352   : > { %9460 = vmatprep.mubr.msk.f32.mxu0 %vm2762_vm2, %v3917_v31  ;;  %v3920_v54 = vmul.f32 %v9433_v15, %v10873_v10  ;;  %v4364_v10 = vld [vmem:[%s12546_s10 + $0xb8] sm:$0xff]  ;;  %v4354_v31 = vld [vmem:[%s12546_s10 + $0x68] sm:$0xff] }
 0x353   : > { %v3848_v55 = vpop.f32.mrf.mxu1  ;;  %9461 = vmatmul.mubr.msk.f32.vlgmr.msra.gmra.mxu0 %vm2762_vm2, %v3918_v4 }
 0x354   : > { %v3919_v42 = vmul.f32 %v3848_v55, %v10881_v41  ;;  %4374 = vmatpush1.msra.mxu0 %v4371_v45  ;;  %v4365_v41 = vld [vmem:[%s12546_s10 + $0xc0] sm:$0xff]  ;;  %v4351_v55 = vld [vmem:[%s12546_s10 + $0x50] sm:$0xff] }
 0x355   : > { %4375 = vmatprep.subr.mxu0 %v4370_v22  ;;  %v9436_v56 = vpop.f32.mrf.mxu1 }
 0x356   : > { %4376 = vmatpush1.msra.mxu0 %v4369_v37  ;;  %9463 = vmatprep.mubr.msk.f32.mxu0 %vm2762_vm2, %v3919_v42  ;;  %v3922_v24 = vmul.f32 %v9436_v56, %v10889_v3  ;;  %v4360_v3 = vld [vmem:[%s12546_s10 + $0x98] sm:$0xff]  ;;  %v4350_v37 = vld [vmem:[%s12546_s10 + $0x48] sm:$0xff] }
 0x357   : > { %4377 = vmatprep.subr.mxu0 %v4368_v21  ;;  %v3858_v34 = vpop.f32.mrf.mxu1  ;;  %9464 = vmatmul.mubr.msk.f32.gmra.mxu0 %vm2762_vm2, %v3920_v54 }
 0x358   : > { %v3921_v30 = vmul.f32 %v3858_v34, %v10897_v27  ;;  %4378 = vmatpush1.msra.mxu0 %v4367_v19  ;;  %v4361_v27 = vld [vmem:[%s12546_s10 + $0xa0] sm:$0xff]  ;;  %v4347_v19 = vld [vmem:[%s12546_s10 + $0x30] sm:$0xff] }
 0x359   : > { %4379 = vmatprep.subr.mxu0 %v4366_v7  ;;  %v9439_v46 = vpop.f32.mrf.mxu1  ;;  %v4346_v7 = vld [vmem:[%s12546_s10 + $0x28] sm:$0xff] }
 0x35a   : > { %4380 = vmatpush1.msra.mxu0 %v4365_v41  ;;  %9466 = vmatprep.mubr.msk.f32.mxu0 %vm2762_vm2, %v3921_v30  ;;  %v3924_v44 = vmul.f32 %v9439_v46, %v10905_v12  ;;  %v4356_v12 = vld [vmem:[%s12546_s10 + $0x78] sm:$0xff]  ;;  %v4341_v46 = vld [vmem:[%s12546_s10] sm:$0xff] }
 0x35b   : > { %4381 = vmatprep.subr.mxu0 %v4364_v10  ;;  %v3868_v36 = vpop.f32.mrf.mxu1  ;;  %9467 = vmatmul.mubr.msk.f32.gmra.mxu0 %vm2762_vm2, %v3922_v24  ;;  %v4343_v10 = vld [vmem:[%s12546_s10 + $0x10] sm:$0xff]  ;;  %v4342_v24 = vld [vmem:[%s12546_s10 + $0x8] sm:$0xff] }
 0x35c   : > { %v3923_v62 = vmul.f32 %v3868_v36, %v10912_v40  ;;  %4382 = vmatpush1.msra.mxu0 %v4363_v61  ;;  %v4357_v40 = vld [vmem:[%s12546_s10 + $0x80] sm:$0xff]  ;;  %v4774_v61 = vld [vmem:[%s12547_s11 + $0xf8] sm:$0xff] }
 0x35d   : > { %4383 = vmatprep.subr.mxu0 %v4362_v32  ;;  %v9442_v39 = vpop.f32.mrf.mxu1  ;;  %v4772_v32 = vld [vmem:[%s12547_s11 + $0xe8] sm:$0xff]  ;;  %v4771_v36 = vld [vmem:[%s12547_s11 + $0xe0] sm:$0xff] }
 0x35e   : > { %4384 = vmatpush1.msra.mxu0 %v4361_v27  ;;  %9469 = vmatprep.mubr.msk.f32.mxu0 %vm2762_vm2, %v3923_v62  ;;  %v3926_v53 = vmul.f32 %v9442_v39, %v10916_v51  ;;  %v4352_v51 = vld [vmem:[%s12546_s10 + $0x58] sm:$0xff]  ;;  %v4769_v62 = vld [vmem:[%s12547_s11 + $0xd0] sm:$0xff] }
 0x35f   : > { %4385 = vmatprep.subr.mxu0 %v4360_v3  ;;  %v3878_v29 = vpop.f32.mrf.mxu1  ;;  %9470 = vmatmul.mubr.msk.f32.gmra.mxu0 %vm2762_vm2, %v3924_v44  ;;  %v4770_v27 = vld [vmem:[%s12547_s11 + $0xd8] sm:$0xff]  ;;  %v4768_v3 = vld [vmem:[%s12547_s11 + $0xc8] sm:$0xff]  ;;  %v4767_v44 = vld [vmem:[%s12547_s11 + $0xc0] sm:$0xff] }
 0x360   : > { %v3925_v2 = vmul.f32 %v3878_v29, %v10922_v57  ;;  %4386 = vmatpush1.msra.mxu0 %v4359_v23  ;;  %v4353_v57 = vld [vmem:[%s12546_s10 + $0x60] sm:$0xff]  ;;  %v4766_v39 = vld [vmem:[%s12547_s11 + $0xb8] sm:$0xff]  ;;  %v4765_v23 = vld [vmem:[%s12547_s11 + $0xb0] sm:$0xff] }
 0x361   : > { %4387 = vmatprep.subr.mxu0 %v4358_v58  ;;  %v9445_v59 = vpop.f32.mrf.mxu1  ;;  %v4764_v58 = vld [vmem:[%s12547_s11 + $0xa8] sm:$0xff]  ;;  %v4763_v29 = vld [vmem:[%s12547_s11 + $0xa0] sm:$0xff] }
 0x362   : > { %4388 = vmatpush1.msra.mxu0 %v4357_v40  ;;  %9472 = vmatprep.mubr.msk.f32.mxu0 %vm2762_vm2, %v3925_v2  ;;  %v3928_v45 = vmul.f32 %v9445_v59, %v10931_v16  ;;  %v4348_v16 = vld [vmem:[%s12546_s10 + $0x38] sm:$0xff]  ;;  %v4761_v2 = vld [vmem:[%s12547_s11 + $0x90] sm:$0xff] }
 0x363   : > { %4389 = vmatprep.subr.mxu0 %v4356_v12  ;;  %v3888_v4 = vpop.f32.mrf.mxu1  ;;  %9473 = vmatmul.mubr.msk.f32.gmra.mxu0 %vm2762_vm2, %v3926_v53  ;;  %v4762_v40 = vld [vmem:[%s12547_s11 + $0x98] sm:$0xff]  ;;  %v4760_v12 = vld [vmem:[%s12547_s11 + $0x88] sm:$0xff]  ;;  %v4759_v53 = vld [vmem:[%s12547_s11 + $0x80] sm:$0xff] }
 0x364   : > { %v3927_v15 = vmul.f32 %v3888_v4, %v10939_v9  ;;  %4390 = vmatpush1.msra.mxu0 %v4355_v50  ;;  %v4349_v9 = vld [vmem:[%s12546_s10 + $0x40] sm:$0xff]  ;;  %v4758_v59 = vld [vmem:[%s12547_s11 + $0x78] sm:$0xff]  ;;  %v4757_v50 = vld [vmem:[%s12547_s11 + $0x70] sm:$0xff] }
 0x365   : > { %4391 = vmatprep.subr.mxu0 %v4354_v31  ;;  %v9448_v22 = vpop.f32.mrf.mxu1  ;;  %v4756_v31 = vld [vmem:[%s12547_s11 + $0x68] sm:$0xff]  ;;  %v4755_v4 = vld [vmem:[%s12547_s11 + $0x60] sm:$0xff] }
 0x366   : > { %4392 = vmatpush1.msra.mxu0 %v4353_v57  ;;  %9475 = vmatprep.mubr.msk.f32.mxu0 %vm2762_vm2, %v3927_v15  ;;  %v3930_v54 = vmul.f32 %v9448_v22, %v10947_v63  ;;  %v4344_v63 = vld [vmem:[%s12546_s10 + $0x18] sm:$0xff]  ;;  %v4753_v15 = vld [vmem:[%s12547_s11 + $0x50] sm:$0xff] }
 0x367   : > { %4393 = vmatprep.subr.mxu0 %v4352_v51  ;;  %v3898_v42 = vpop.f32.mrf.mxu1  ;;  %9476 = vmatmul.mubr.msk.f32.gmra.mxu0 %vm2762_vm2, %v3928_v45  ;;  %v4754_v57 = vld [vmem:[%s12547_s11 + $0x58] sm:$0xff]  ;;  %v4752_v51 = vld [vmem:[%s12547_s11 + $0x48] sm:$0xff]  ;;  %v4751_v45 = vld [vmem:[%s12547_s11 + $0x40] sm:$0xff] }
 0x368   : > { %v3929_v21 = vmul.f32 %v3898_v42, %v10954_v52  ;;  %4394 = vmatpush1.msra.mxu0 %v4351_v55  ;;  %v4345_v52 = vld [vmem:[%s12546_s10 + $0x20] sm:$0xff]  ;;  %v4750_v22 = vld [vmem:[%s12547_s11 + $0x38] sm:$0xff]  ;;  %v4749_v55 = vld [vmem:[%s12547_s11 + $0x30] sm:$0xff] }
 0x369   : > { %4395 = vmatprep.subr.mxu0 %v4350_v37  ;;  %v9451_v56 = vpop.f32.mrf.mxu1  ;;  %v4748_v37 = vld [vmem:[%s12547_s11 + $0x28] sm:$0xff]  ;;  %v4747_v42 = vld [vmem:[%s12547_s11 + $0x20] sm:$0xff] }
 0x36a   : > { %4396 = vmatpush1.msra.mxu0 %v4349_v9  ;;  %9478 = vmatprep.mubr.msk.f32.mxu0 %vm2762_vm2, %v3929_v21  ;;  %v3932_v30 = vmul.f32 %v9451_v56, %v10960_v1  ;;  %v4773_v1 = vld [vmem:[%s12547_s11 + $0xf0] sm:$0xff]  ;;  %v4746_v9 = vld [vmem:[%s12547_s11 + $0x18] sm:$0xff] }
 0x36b   : > { %4397 = vmatprep.subr.mxu0 %v4348_v16  ;;  %v3908_v34 = vpop.f32.mrf.mxu1  ;;  %9479 = vmatmul.mubr.msk.f32.gmra.mxu0 %vm2762_vm2, %v3930_v54  ;;  %v4745_v21 = vld [vmem:[%s12547_s11 + $0x10] sm:$0xff]  ;;  %v4744_v16 = vld [vmem:[%s12547_s11 + $0x8] sm:$0xff]  ;;  %v4743_v54 = vld [vmem:[%s12547_s11] sm:$0xff] }
 0x36c   : > { %v3931_v41 = vmul.f32 %v3908_v34, %v10966_v17  ;;  %4398 = vmatpush1.msra.mxu0 %v4347_v19  ;;  %v12548_v17 = vmov 0.0   ;;  %v11158_v56 = vld [vmem:[%s12549_s16 + $0x78] sm:$0xff]  ;;  %v4596_v34 = vld [vmem:[%s12550_s22 + $0xf0] sm:$0xff] }
 0x36d   : > { %4399 = vmatprep.subr.mxu0 %v4346_v7  ;;  %v4597_v19 = vld [vmem:[%s12550_s22 + $0xf8] sm:$0xff] }
 0x36e   : > { %4400 = vmatpush1.msra.mxu0 %v4345_v52  ;;  %9481 = vmatprep.mubr.msk.f32.mxu0 %vm2762_vm2, %v3931_v41  ;;  %v4581_v7 = vld [vmem:[%s12550_s22 + $0x78] sm:$0xff]  ;;  %v4580_v52 = vld [vmem:[%s12550_s22 + $0x70] sm:$0xff]  ;;  %v4595_v41 = vld [vmem:[%s12550_s22 + $0xe8] sm:$0xff] }
 0x36f   : > { %4401 = vmatprep.subr.mxu0 %v4344_v63  ;;  %9482 = vmatmul.mubr.msk.f32.gmra.mxu0 %vm2762_vm2, %v3932_v30  ;;  %v4579_v63 = vld [vmem:[%s12550_s22 + $0x68] sm:$0xff]  ;;  %v4594_v30 = vld [vmem:[%s12550_s22 + $0xe0] sm:$0xff] }
 0x370   : > { %4402 = vmatpush1.msra.mxu0 %v4343_v10  ;;  %4437 = vmatprep.mubr.f32.mxu0 %v12548_v17  ;;  %v4578_v10 = vld [vmem:[%s12550_s22 + $0x60] sm:$0xff] }
 0x371   : > { %4403 = vmatprep.subr.mxu0 %v4342_v24  ;;  %8296 = vmatprep.subr.mxu1 %v4597_v19  ;;  %v4593_v24 = vld [vmem:[%s12550_s22 + $0xd8] sm:$0xff] }
 0x372   : > { %4404 = vmatpush1.msra.mxu0 %v4341_v46  ;;  %8297 = vmatpush3.msra.mxu1 %v4581_v7  ;;  %v4577_v46 = vld [vmem:[%s12550_s22 + $0x58] sm:$0xff]  ;;  %v5171_v7 = vld [vmem:[%s12549_s16 + $0x50] sm:$0xff] }
 0x373   : > { %4775 = vmatprep.subr.mxu0 %v4774_v61  ;;  %4438 = vmatmul.mubr.f32.vlgmr.msra.gmra.mxu0 %v10330_v26  ;;  %v4592_v61 = vld [vmem:[%s12550_s22 + $0xd0] sm:$0xff] }
 0x374   : > { %4776 = vmatpush1.msra.mxu0 %v4773_v1  ;;  %4443 = vmatprep.mubr.f32.mxu0 %v12548_v17  ;;  %v4576_v1 = vld [vmem:[%s12550_s22 + $0x50] sm:$0xff] }
 0x375   : > { %4777 = vmatprep.subr.mxu0 %v4772_v32  ;;  %8298 = vmatprep.subr.mxu1 %v4596_v34  ;;  %v4591_v32 = vld [vmem:[%s12550_s22 + $0xc8] sm:$0xff]  ;;  %v4566_v34 = vld [vmem:[%s12550_s22] sm:$0xff] }
 0x376   : > { %4778 = vmatpush1.msra.mxu0 %v4771_v36  ;;  %8299 = vmatpush3.msra.mxu1 %v4580_v52  ;;  %v4575_v36 = vld [vmem:[%s12550_s22 + $0x48] sm:$0xff] }
 0x377   : > { %4444 = vmatmul.mubr.f32.gmra.mxu0 %v10328_v25  ;;  %4779 = vmatprep.subr.mxu0 %v4770_v27  ;;  %v4590_v27 = vld [vmem:[%s12550_s22 + $0xc0] sm:$0xff] }
 0x378   : > { %4449 = vmatprep.mubr.f32.mxu0 %v12548_v17  ;;  %4780 = vmatpush1.msra.mxu0 %v4769_v62  ;;  %v4574_v62 = vld [vmem:[%s12550_s22 + $0x40] sm:$0xff] }
 0x379   : > { %4781 = vmatprep.subr.mxu0 %v4768_v3  ;;  %8300 = vmatprep.subr.mxu1 %v4595_v41  ;;  %v4589_v3 = vld [vmem:[%s12550_s22 + $0xb8] sm:$0xff]  ;;  %v12554_v41 = vld [vmem:[#allocation33_spill] sm:$0xff] }
 0x37a   : > { %4782 = vmatpush1.msra.mxu0 %v4767_v44  ;;  %8301 = vmatpush3.msra.mxu1 %v4579_v63  ;;  %v4573_v44 = vld [vmem:[%s12550_s22 + $0x38] sm:$0xff] }
 0x37b   : > { %4450 = vmatmul.mubr.f32.gmra.mxu0 %v10344_v43  ;;  %4783 = vmatprep.subr.mxu0 %v4766_v39  ;;  %v4588_v39 = vld [vmem:[%s12550_s22 + $0xb0] sm:$0xff] }
 0x37c   : > { %4455 = vmatprep.mubr.f32.mxu0 %v12548_v17  ;;  %4784 = vmatpush1.msra.mxu0 %v4765_v23  ;;  %v4572_v23 = vld [vmem:[%s12550_s22 + $0x30] sm:$0xff] }
 0x37d   : > { %4785 = vmatprep.subr.mxu0 %v4764_v58  ;;  %8302 = vmatprep.subr.mxu1 %v4594_v30  ;;  %v4587_v58 = vld [vmem:[%s12550_s22 + $0xa8] sm:$0xff]  ;;  %v12555_v30 = vld [vmem:[#allocation32_spill] sm:$0xff] }
 0x37e   : > { %4786 = vmatpush1.msra.mxu0 %v4763_v29  ;;  %8303 = vmatpush3.msra.mxu1 %v4578_v10  ;;  %v4571_v29 = vld [vmem:[%s12550_s22 + $0x28] sm:$0xff] }
 0x37f   : > { %4456 = vmatmul.mubr.f32.gmra.mxu0 %v10351_v48  ;;  %4787 = vmatprep.subr.mxu0 %v4762_v40  ;;  %v4586_v40 = vld [vmem:[%s12550_s22 + $0xa0] sm:$0xff] }
 0x380   : > { %4461 = vmatprep.mubr.f32.mxu0 %v12548_v17  ;;  %4788 = vmatpush1.msra.mxu0 %v4761_v2  ;;  %v4570_v2 = vld [vmem:[%s12550_s22 + $0x20] sm:$0xff] }
 0x381   : > { %4789 = vmatprep.subr.mxu0 %v4760_v12  ;;  %8304 = vmatprep.subr.mxu1 %v4593_v24  ;;  %v4585_v12 = vld [vmem:[%s12550_s22 + $0x98] sm:$0xff]  ;;  %v5170_v24 = vld [vmem:[%s12549_s16 + $0x48] sm:$0xff] }
 0x382   : > { %4790 = vmatpush1.msra.mxu0 %v4759_v53  ;;  %8305 = vmatpush3.msra.mxu1 %v4577_v46  ;;  %v4569_v53 = vld [vmem:[%s12550_s22 + $0x18] sm:$0xff] }
 0x383   : > { %4462 = vmatmul.mubr.f32.gmra.mxu0 %v10365_v5  ;;  %4791 = vmatprep.subr.mxu0 %v4758_v59  ;;  %v5175_v59 = vld [vmem:[%s12549_s16 + $0x70] sm:$0xff] }
 0x384   : > { %4467 = vmatprep.mubr.f32.mxu0 %v12548_v17  ;;  %4792 = vmatpush1.msra.mxu0 %v4757_v50  ;;  %v4584_v50 = vld [vmem:[%s12550_s22 + $0x90] sm:$0xff] }
 0x385   : > { %4793 = vmatprep.subr.mxu0 %v4756_v31  ;;  %8306 = vmatprep.subr.mxu1 %v4592_v61 }
 0x386   : > { %4794 = vmatpush1.msra.mxu0 %v4755_v4  ;;  %8307 = vmatpush3.msra.mxu1 %v4576_v1  ;;  %v4568_v4 = vld [vmem:[%s12550_s22 + $0x10] sm:$0xff]  ;;  %v5169_v1 = vld [vmem:[%s12549_s16 + $0x40] sm:$0xff] }
 0x387   : > { %4468 = vmatmul.mubr.f32.gmra.mxu0 %v10371_v14  ;;  %4795 = vmatprep.subr.mxu0 %v4754_v57  ;;  %v2404_v57 = vmul.f32 %v10859_v20, %v10821_v35  ;;  %v4567_v35 = vld [vmem:[%s12550_s22 + $0x8] sm:$0xff]  ;;  %v4582_v20 = vld [vmem:[%s12550_s22 + $0x80] sm:$0xff] }
 0x388   : > { %4473 = vmatprep.mubr.f32.mxu0 %v12548_v17  ;;  %4796 = vmatpush1.msra.mxu0 %v4753_v15 }
 0x389   : > { %4797 = vmatprep.subr.mxu0 %v4752_v51  ;;  %8308 = vmatprep.subr.mxu1 %v4591_v32  ;;  %v5174_v51 = vld [vmem:[%s12549_s16 + $0x68] sm:$0xff] }
 0x38a   : > { %4798 = vmatpush1.msra.mxu0 %v4751_v45  ;;  %8309 = vmatpush3.msra.mxu1 %v4575_v36  ;;  %v4583_v45 = vld [vmem:[%s12550_s22 + $0x88] sm:$0xff] }
 0x38b   : > { %4474 = vmatmul.mubr.f32.gmra.mxu0 %v10375_v18  ;;  %4799 = vmatprep.subr.mxu0 %v4750_v22  ;;  %v12556_v36 = vld [vmem:[#allocation25_spill] sm:$0xff] }
 0x38c   : > { %4479 = vmatprep.mubr.f32.mxu0 %v12548_v17  ;;  %4800 = vmatpush1.msra.mxu0 %v4749_v55 }
 0x38d   : > { %4801 = vmatprep.subr.mxu0 %v4748_v37  ;;  %8310 = vmatprep.subr.mxu1 %v4590_v27  ;;  %v5173_v37 = vld [vmem:[%s12549_s16 + $0x60] sm:$0xff]  ;;  %v12557_v27 = vld [vmem:[#allocation35_spill] sm:$0xff] }
 0x38e   : > { %4802 = vmatpush1.msra.mxu0 %v4747_v42  ;;  %8311 = vmatpush3.msra.mxu1 %v4574_v62  ;;  %v12551_v42 = vld [vmem:[#allocation31_spill] sm:$0xff]  ;;  %v2410_v62 = vmul.f32 %v12557_v27, %v12556_v36 }
 0x38f   : > { %4480 = vmatmul.mubr.f32.gmra.mxu0 %v10384_v28  ;;  %4803 = vmatprep.subr.mxu0 %v4746_v9  ;;  %v2406_v9 = vmul.f32 %v12551_v42, %v10826_v33  ;;  %v12553_v33 = vld [vmem:[#allocation24_spill] sm:$0xff]  ;;  %v5164_v42 = vld [vmem:[%s12549_s16 + $0x18] sm:$0xff] }
 0x390   : > { %4485 = vmatprep.mubr.f32.mxu0 %v12548_v17  ;;  %4804 = vmatpush1.msra.mxu0 %v4745_v21  ;;  %v12552_v21 = vld [vmem:[#allocation30_spill] sm:$0xff]  ;;  %v2408_v63 = vmul.f32 %v12554_v41, %v12553_v33  ;;  %v12567_v33 = vld [vmem:[#allocation40_spill] sm:$0xff]  ;;  %v12570_v36 = vld [vmem:[#allocation43_spill] sm:$0xff] }
 0x391   : > { %4805 = vmatprep.subr.mxu0 %v4744_v16  ;;  %8312 = vmatprep.subr.mxu1 %v4589_v3  ;;  %v12558_v3 = vld [vmem:[#allocation34_spill] sm:$0xff] }
 0x392   : > { %4806 = vmatpush1.msra.mxu0 %v4743_v54  ;;  %8313 = vmatpush3.msra.mxu1 %v4573_v44  ;;  %v5172_v54 = vld [vmem:[%s12549_s16 + $0x58] sm:$0xff] }
 0x393   : > { %4486 = vmatmul.mubr.f32.gmra.mxu0 %v10392_v38  ;;  %9484 = vmatprep.subr.mxu0 %v11158_v56 }
 0x394   : > { %4491 = vmatprep.mubr.f32.mxu0 %v12548_v17  ;;  %8314 = vmatprep.subr.mxu1 %v4588_v39  ;;  %v5168_v39 = vld [vmem:[%s12549_s16 + $0x38] sm:$0xff] }
 0x395   : > { %8315 = vmatpush3.msra.mxu1 %v4572_v23 }
 0x396   : > { %8316 = vmatprep.subr.mxu1 %v4587_v58 }
 0x397   : > { %4492 = vmatmul.mubr.f32.gmra.mxu0 %v10402_v47  ;;  %8317 = vmatpush3.msra.mxu1 %v4571_v29  ;;  %v5167_v29 = vld [vmem:[%s12549_s16 + $0x30] sm:$0xff] }
 0x398   : > { %4497 = vmatprep.mubr.f32.mxu0 %v12548_v17  ;;  %8318 = vmatprep.subr.mxu1 %v4586_v40 }
 0x399   : > { %8319 = vmatpush3.msra.mxu1 %v4570_v2  ;;  %v12559_v2 = vld [vmem:[#allocation26_spill] sm:$0xff] }
 0x39a   : > { %8320 = vmatprep.subr.mxu1 %v4585_v12  ;;  %v12560_v12 = vld [vmem:[#allocation37_spill] sm:$0xff] }
 0x39b   : > { %4498 = vmatmul.mubr.f32.gmra.mxu0 %v10413_v60  ;;  %8321 = vmatpush3.msra.mxu1 %v4569_v53  ;;  %v2412_v53 = vmul.f32 %v12560_v12, %v12559_v2 }
 0x39c   : > { %4503 = vmatprep.mubr.f32.mxu0 %v12548_v17  ;;  %8322 = vmatprep.subr.mxu1 %v4584_v50 }
 0x39d   : > { %8323 = vmatpush3.msra.mxu1 %v4568_v4 }
 0x39e   : > { %8324 = vmatprep.subr.mxu1 %v4583_v45 }
 0x39f   : > { %4504 = vmatmul.mubr.f32.gmra.mxu0 %v10419_v0  ;;  %8325 = vmatpush3.msra.mxu1 %v4567_v35 }
 0x3a0   : > { %4509 = vmatprep.mubr.f32.mxu0 %v12548_v17  ;;  %8326 = vmatprep.subr.mxu1 %v4582_v20 }
 0x3a1   : > { %8327 = vmatpush3.msra.mxu1 %v4566_v34  ;;  %v12566_v34 = vld [vmem:[#allocation41_spill] sm:$0xff] }
 0x3a3   : > { %4510 = vmatmul.mubr.f32.gmra.mxu0 %v10424_v6 }
 0x3a4   : > { %4515 = vmatprep.mubr.f32.mxu0 %v12548_v17 }
 0x3a7   : > { %4516 = vmatmul.mubr.f32.gmra.mxu0 %v10429_v8 }
 0x3a8   : > { %4521 = vmatprep.mubr.f32.mxu0 %v12548_v17 }
 0x3ab   : > { %4522 = vmatmul.mubr.f32.gmra.mxu0 %v10433_v11 }
 0x3ac   : > { %4527 = vmatprep.mubr.f32.mxu0 %v12548_v17 }
 0x3af   : > { %4528 = vmatmul.mubr.f32.gmra.mxu0 %v10439_v13 }
 0x3b0   : > { %4839 = vmatprep.mubr.f32.mxu0 %v12548_v17 }
 0x3b3   : > { %v9190_v31 = vpop.f32.mrf.mxu0  ;;  %4840 = vmatmul.mubr.f32.vlgmr.msra.gmra.mxu0 %v10330_v26 }
 0x3b4   : > { %v11210_v15 = vmul.f32 %v9190_v31, %v10854_v49  ;;  %9485 = vmatpush3.msra.mxu0 %v11158_v56  ;;  %4845 = vmatprep.mubr.f32.mxu0 %v12548_v17  ;;  %v5166_v31 = vld [vmem:[%s12549_s16 + $0x28] sm:$0xff] }
 0x3b5   : > { %v2877_v22 = vpop.f32.mrf.mxu0  ;;  %9486 = vmatprep.subr.mxu0 %v5175_v59 }
 0x3b6   : > { %v11216_v55 = vmul.f32 %v2877_v22, %v2404_v57  ;;  %9487 = vmatpush3.msra.mxu0 %v5175_v59  ;;  %v12561_v59 = vld [vmem:[#allocation36_spill] sm:$0xff]  ;;  %v12562_v22 = vld [vmem:[#allocation27_spill] sm:$0xff] }
 0x3b7   : > { %v9193_v49 = vpop.f32.mrf.mxu0  ;;  %4846 = vmatmul.mubr.f32.gmra.mxu0 %v10328_v25  ;;  %9488 = vmatprep.subr.mxu0 %v5174_v51 }
 0x3b8   : > { %v11225_v16 = vmul.f32 %v9193_v49, %v12552_v21  ;;  %4851 = vmatprep.mubr.f32.mxu0 %v12548_v17  ;;  %9489 = vmatpush3.msra.mxu0 %v5174_v51  ;;  %v5165_v51 = vld [vmem:[%s12549_s16 + $0x20] sm:$0xff]  ;;  %v12564_v49 = vld [vmem:[#allocation38_spill] sm:$0xff] }
 0x3b9   : > { %v2887_v56 = vpop.f32.mrf.mxu0  ;;  %9490 = vmatprep.subr.mxu0 %v5173_v37 }
 0x3ba   : > { %v11229_v19 = vmul.f32 %v2887_v56, %v2406_v9  ;;  %9491 = vmatpush3.msra.mxu0 %v5173_v37  ;;  %v12563_v37 = vld [vmem:[#allocation39_spill] sm:$0xff] }
 0x3bb   : > { %v9196_v52 = vpop.f32.mrf.mxu0  ;;  %4852 = vmatmul.mubr.f32.gmra.mxu0 %v10344_v43  ;;  %9492 = vmatprep.subr.mxu0 %v5172_v54  ;;  %v2414_v35 = vmul.f32 %v12563_v37, %v12562_v22 }
 0x3bc   : > { %v11237_v10 = vmul.f32 %v9196_v52, %v12555_v30  ;;  %4857 = vmatprep.mubr.f32.mxu0 %v12548_v17  ;;  %9493 = vmatpush3.msra.mxu0 %v5172_v54  ;;  %v5163_v54 = vld [vmem:[%s12549_s16 + $0x10] sm:$0xff] }
 0x3bd   : > { %v2897_v46 = vpop.f32.mrf.mxu0  ;;  %9494 = vmatprep.subr.mxu0 %v5171_v7 }
 0x3be   : > { %v11241_v61 = vmul.f32 %v2897_v46, %v2408_v63  ;;  %9495 = vmatpush3.msra.mxu0 %v5171_v7  ;;  %v12565_v7 = vld [vmem:[#allocation28_spill] sm:$0xff]  ;;  %v5162_v63 = vld [vmem:[%s12549_s16 + $0x8] sm:$0xff] }
 0x3bf   : > { %v9199_v32 = vpop.f32.mrf.mxu0  ;;  %4858 = vmatmul.mubr.f32.gmra.mxu0 %v10351_v48  ;;  %9496 = vmatprep.subr.mxu0 %v5170_v24  ;;  %v2416_v52 = vmul.f32 %v12566_v34, %v12565_v7  ;;  %v5161_v46 = vld [vmem:[%s12549_s16] sm:$0xff] }
 0x3c0   : > { %v11248_v44 = vmul.f32 %v9199_v32, %v12558_v3  ;;  %4863 = vmatprep.mubr.f32.mxu0 %v12548_v17  ;;  %9497 = vmatpush3.msra.mxu0 %v5170_v24  ;;  %v12569_v32 = vld [vmem:[#allocation29_spill] sm:$0xff] }
 0x3c1   : > { %v2907_v23 = vpop.f32.mrf.mxu0  ;;  %9498 = vmatprep.subr.mxu0 %v5169_v1  ;;  %v2418_v27 = vmul.f32 %v12570_v36, %v12569_v32  ;;  %v5334_v36 = vld [vmem:[%s12568_s18 + $0x60] sm:$0xff] }
 0x3c2   : > { %v11252_v58 = vmul.f32 %v2907_v23, %v2410_v62  ;;  %9499 = vmatpush3.msra.mxu0 %v5169_v1  ;;  %v12571_v62 = vld [vmem:[#allocation42_spill] sm:$0xff] }
 0x3c3   : > { %v9202_v40 = vpop.f32.mrf.mxu0  ;;  %4864 = vmatmul.mubr.f32.gmra.mxu0 %v10365_v5  ;;  %9500 = vmatprep.subr.mxu0 %v5168_v39 }
 0x3c4   : > { %v11259_v50 = vmul.f32 %v9202_v40, %v12561_v59  ;;  %4869 = vmatprep.mubr.f32.mxu0 %v12548_v17  ;;  %9501 = vmatpush3.msra.mxu0 %v5168_v39  ;;  %v5337_v39 = vld [vmem:[%s12568_s18 + $0x78] sm:$0xff] }
 0x3c5   : > { %v2917_v4 = vpop.f32.mrf.mxu0  ;;  %9502 = vmatprep.subr.mxu0 %v5167_v29 }
 0x3c6   : > { %v11263_v57 = vmul.f32 %v2917_v4, %v2412_v53  ;;  %9503 = vmatpush3.msra.mxu0 %v5167_v29  ;;  %v4999_v4 = vld [vmem:[%s12572_s1 + $0xf8] sm:$0xff] }
 0x3c7   : > { %v9205_v45 = vpop.f32.mrf.mxu0  ;;  %4870 = vmatmul.mubr.f32.gmra.mxu0 %v10371_v14  ;;  %9504 = vmatprep.subr.mxu0 %v5166_v31 }
 0x3c8   : > { %v11270_v20 = vmul.f32 %v9205_v45, %v12564_v49  ;;  %4875 = vmatprep.mubr.f32.mxu0 %v12548_v17  ;;  %9505 = vmatpush3.msra.mxu0 %v5166_v31 }
 0x3c9   : > { %v2927_v9 = vpop.f32.mrf.mxu0  ;;  %9506 = vmatprep.subr.mxu0 %v5165_v51  ;;  %8376 = vmatprep.subr.mxu1 %v4999_v4 }
 0x3ca   : > { %v11274_v21 = vmul.f32 %v2927_v9, %v2414_v35  ;;  %9507 = vmatpush3.msra.mxu0 %v5165_v51 }
 0x3cb   : > { %v9208_v56 = vpop.f32.mrf.mxu0  ;;  %4876 = vmatmul.mubr.f32.gmra.mxu0 %v10375_v18  ;;  %9508 = vmatprep.subr.mxu0 %v5164_v42 }
 0x3cc   : > { %v2969_v41 = vmul.f32 %v9208_v56, %v12567_v33  ;;  %4881 = vmatprep.mubr.f32.mxu0 %v12548_v17  ;;  %9509 = vmatpush3.msra.mxu0 %v5164_v42 }
 0x3cd   : > { %v2937_v30 = vpop.f32.mrf.mxu0  ;;  %9510 = vmatprep.subr.mxu0 %v5163_v54 }
 0x3ce   : > { %v2968_v24 = vmul.f32 %v2937_v30, %v2416_v52  ;;  %9511 = vmatpush3.msra.mxu0 %v5163_v54 }
 0x3cf   : > { %v9211_v1 = vpop.f32.mrf.mxu0  ;;  %4882 = vmatmul.mubr.f32.gmra.mxu0 %v10384_v28  ;;  %9512 = vmatprep.subr.mxu0 %v5162_v63 }
 0x3d0   : > { %v2971_v3 = vmul.f32 %v9211_v1, %v12571_v62  ;;  %4887 = vmatprep.mubr.f32.mxu0 %v12548_v17  ;;  %9513 = vmatpush3.msra.mxu0 %v5162_v63  ;;  %v5336_v63 = vld [vmem:[%s12568_s18 + $0x70] sm:$0xff] }
 0x3d1   : > { %v2947_v23 = vpop.f32.mrf.mxu0  ;;  %9514 = vmatprep.subr.mxu0 %v5161_v46 }
 0x3d2   : > { %v2970_v29 = vmul.f32 %v2947_v23, %v2418_v27  ;;  %9515 = vmatpush3.msra.mxu0 %v5161_v46  ;;  %v11349_v46 = vpop.f32.mrf.mxu1 }
 0x3d3   : > { %v9286_v40 = vpop.f32.mrf.mxu0  ;;  %4888 = vmatmul.mubr.f32.gmra.mxu0 %v10392_v38  ;;  %9540 = vmatprep.subr.mxu0 %v5337_v39 }
 0x3d4   : > { %v3351_v2 = vmul.f32 %v9286_v40, %v11210_v15  ;;  %4893 = vmatprep.mubr.f32.mxu0 %v12548_v17  ;;  %v5332_v40 = vld [vmem:[%s12568_s18 + $0x50] sm:$0xff] }
 0x3d5   : > { %v3271_v12 = vpop.f32.mrf.mxu0 }
 0x3d6   : > { %v3350_v53 = vmul.f32 %v3271_v12, %v11216_v55 }
 0x3d7   : > { %v9289_v59 = vpop.f32.mrf.mxu0  ;;  %4894 = vmatmul.mubr.f32.gmra.mxu0 %v10402_v47 }
 0x3d8   : > { %v3353_v31 = vmul.f32 %v9289_v59, %v11225_v16  ;;  %4899 = vmatprep.mubr.f32.mxu0 %v12548_v17 }
 0x3d9   : > { %v3281_v51 = vpop.f32.mrf.mxu0 }
 0x3da   : > { %v3352_v45 = vmul.f32 %v3281_v51, %v11229_v19  ;;  %v5330_v51 = vld [vmem:[%s12568_s18 + $0x40] sm:$0xff] }
 0x3db   : > { %v9292_v22 = vpop.f32.mrf.mxu0  ;;  %4900 = vmatmul.mubr.f32.gmra.mxu0 %v10413_v60 }
 0x3dc   : > { %v11301_v15 = vmul.f32 %v9292_v22, %v11237_v10  ;;  %4905 = vmatprep.mubr.f32.mxu0 %v12548_v17 }
 0x3dd   : > { %v3291_v55 = vpop.f32.mrf.mxu0 }
 0x3de   : > { %v11305_v37 = vmul.f32 %v3291_v55, %v11241_v61 }
 0x3df   : > { %v9295_v16 = vpop.f32.mrf.mxu0  ;;  %4906 = vmatmul.mubr.f32.gmra.mxu0 %v10419_v0 }
 0x3e0   : > { %v11309_v35 = vmul.f32 %v9295_v16, %v11248_v44  ;;  %4911 = vmatprep.mubr.f32.mxu0 %v12548_v17 }
 0x3e1   : > { %v3301_v19 = vpop.f32.mrf.mxu0 }
 0x3e2   : > { %v11313_v49 = vmul.f32 %v3301_v19, %v11252_v58  ;;  %v5328_v19 = vld [vmem:[%s12568_s18 + $0x30] sm:$0xff] }
 0x3e3   : > { %v9298_v10 = vpop.f32.mrf.mxu0  ;;  %4912 = vmatmul.mubr.f32.gmra.mxu0 %v10424_v6 }
 0x3e4   : > { %v11317_v42 = vmul.f32 %v9298_v10, %v11259_v50  ;;  %4917 = vmatprep.mubr.f32.mxu0 %v12548_v17 }
 0x3e5   : > { %v3311_v61 = vpop.f32.mrf.mxu0 }
 0x3e6   : > { %v11321_v9 = vmul.f32 %v3311_v61, %v11263_v57  ;;  %v5327_v61 = vld [vmem:[%s12568_s18 + $0x28] sm:$0xff] }
 0x3e7   : > { %v9301_v44 = vpop.f32.mrf.mxu0  ;;  %4918 = vmatmul.mubr.f32.gmra.mxu0 %v10429_v8 }
 0x3e8   : > { %v11325_v54 = vmul.f32 %v9301_v44, %v11270_v20  ;;  %4923 = vmatprep.mubr.f32.mxu0 %v12548_v17 }
 0x3e9   : > { %v3321_v58 = vpop.f32.mrf.mxu0 }
 0x3ea   : > { %v11329_v56 = vmul.f32 %v3321_v58, %v11274_v21 }
 0x3eb   : > { %v9304_v50 = vpop.f32.mrf.mxu0  ;;  %4924 = vmatmul.mubr.f32.gmra.mxu0 %v10433_v11 }
 0x3ec   : > { %v11332_v7 = vmul.f32 %v9304_v50, %v2969_v41  ;;  %4929 = vmatprep.mubr.f32.mxu0 %v12548_v17  ;;  %v5326_v50 = vld [vmem:[%s12568_s18 + $0x20] sm:$0xff] }
 0x3ed   : > { %v3331_v57 = vpop.f32.mrf.mxu0 }
 0x3ee   : > { %v11335_v34 = vmul.f32 %v3331_v57, %v2968_v24  ;;  %v5335_v24 = vld [vmem:[%s12568_s18 + $0x68] sm:$0xff] }
 0x3ef   : > { %v9307_v20 = vpop.f32.mrf.mxu0  ;;  %4930 = vmatmul.mubr.f32.gmra.mxu0 %v10439_v13 }
 0x3f0   : > { %v11338_v52 = vmul.f32 %v9307_v20, %v2971_v3  ;;  %9516 = vmatprep.mubr.f32.mxu0 %v10330_v26  ;;  %v5333_v3 = vld [vmem:[%s12568_s18 + $0x58] sm:$0xff] }
 0x3f1   : > { %v3341_v21 = vpop.f32.mrf.mxu0  ;;  %v5325_v20 = vld [vmem:[%s12568_s18 + $0x18] sm:$0xff] }
 0x3f2   : > { %v11341_v33 = vmul.f32 %v3341_v21, %v2970_v29 }
 0x3f3   : > { %v9374_v41 = vpop.f32.mrf.mxu0  ;;  %9517 = vmatmul.mubr.f32.vlgmr.msra.gmra.mxu0 %v10328_v25 }
 0x3f4   : > { %v11345_v30 = vmul.f32 %v9374_v41, %v3351_v2  ;;  %9541 = vmatpush3.msra.mxu0 %v5337_v39  ;;  %9519 = vmatprep.mubr.f32.mxu0 %v10344_v43  ;;  %v11359_v39 = vpop.f32.mrf.mxu1  ;;  %v5324_v41 = vld [vmem:[%s12568_s18 + $0x10] sm:$0xff] }
 0x3f5   : > { %9542 = vmatprep.subr.mxu0 %v5336_v63  ;;  %v3661_v1 = vpop.f32.mrf.mxu0 }
 0x3f6   : > { %v11351_v32 = vmul.f32 %v3661_v1, %v3350_v53  ;;  %9543 = vmatpush3.msra.mxu0 %v5336_v63  ;;  %v5331_v53 = vld [vmem:[%s12568_s18 + $0x48] sm:$0xff]  ;;  %v11370_v59 = vpop.f32.mrf.mxu1 }
 0x3f7   : > { %9544 = vmatprep.subr.mxu0 %v5335_v24  ;;  %v9377_v27 = vpop.f32.mrf.mxu0  ;;  %9520 = vmatmul.mubr.f32.gmra.mxu0 %v10351_v48  ;;  %v5323_v1 = vld [vmem:[%s12568_s18 + $0x8] sm:$0xff] }
 0x3f8   : > { %v11355_v62 = vmul.f32 %v9377_v27, %v3353_v31  ;;  %9545 = vmatpush3.msra.mxu0 %v5335_v24  ;;  %9522 = vmatprep.mubr.f32.mxu0 %v10365_v5  ;;  %v11382_v55 = vpop.f32.mrf.mxu1 }
 0x3f9   : > { %9546 = vmatprep.subr.mxu0 %v5334_v36  ;;  %v3671_v23 = vpop.f32.mrf.mxu0 }
 0x3fa   : > { %v11361_v29 = vmul.f32 %v3671_v23, %v3352_v45  ;;  %9547 = vmatpush3.msra.mxu0 %v5334_v36  ;;  %v11394_v44 = vpop.f32.mrf.mxu1 }
 0x3fb   : > { %9548 = vmatprep.subr.mxu0 %v5333_v3  ;;  %v9380_v2 = vpop.f32.mrf.mxu0  ;;  %9523 = vmatmul.mubr.f32.gmra.mxu0 %v10371_v14 }
 0x3fc   : > { %v11366_v12 = vmul.f32 %v9380_v2, %v11301_v15  ;;  %9549 = vmatpush3.msra.mxu0 %v5333_v3  ;;  %9525 = vmatprep.mubr.f32.mxu0 %v10375_v18  ;;  %v5329_v15 = vld [vmem:[%s12568_s18 + $0x38] sm:$0xff]  ;;  %v11406_v21 = vpop.f32.mrf.mxu1  ;;  %v5322_v3 = vld [vmem:[%s12568_s18] sm:$0xff] }
 0x3fd   : > { %9550 = vmatprep.subr.mxu0 %v5332_v40  ;;  %v3681_v31 = vpop.f32.mrf.mxu0 }
 0x3fe   : > { %v11373_v4 = vmul.f32 %v3681_v31, %v11305_v37  ;;  %9551 = vmatpush3.msra.mxu0 %v5332_v40  ;;  %v11418_v36 = vpop.f32.mrf.mxu1  ;;  %v5747_v40 = vld [vmem:[%s12573_s2 + $0xf8] sm:$0xff] }
 0x3ff   : > { %9552 = vmatprep.subr.mxu0 %v5331_v53  ;;  %v9383_v45 = vpop.f32.mrf.mxu0  ;;  %9526 = vmatmul.mubr.f32.gmra.mxu0 %v10384_v28 }
 0x400   : > { %v11378_v22 = vmul.f32 %v9383_v45, %v11309_v35  ;;  %9553 = vmatpush3.msra.mxu0 %v5331_v53  ;;  %9528 = vmatprep.mubr.f32.mxu0 %v10392_v38  ;;  %v11430_v2 = vpop.f32.mrf.mxu1  ;;  %v5746_v53 = vld [vmem:[%s12573_s2 + $0xf0] sm:$0xff]  ;;  %v5744_v45 = vld [vmem:[%s12573_s2 + $0xe0] sm:$0xff] }
 0x401   : > { %9554 = vmatprep.subr.mxu0 %v5330_v51  ;;  %v3691_v16 = vpop.f32.mrf.mxu0 }
 0x402   : > { %v11385_v37 = vmul.f32 %v3691_v16, %v11313_v49  ;;  %9555 = vmatpush3.msra.mxu0 %v5330_v51  ;;  %v5745_v51 = vld [vmem:[%s12573_s2 + $0xe8] sm:$0xff]  ;;  %v5743_v16 = vld [vmem:[%s12573_s2 + $0xd8] sm:$0xff] }
 0x403   : > { %9556 = vmatprep.subr.mxu0 %v5329_v15  ;;  %v9386_v10 = vpop.f32.mrf.mxu0  ;;  %9529 = vmatmul.mubr.f32.gmra.mxu0 %v10402_v47 }
 0x404   : > { %v11390_v35 = vmul.f32 %v9386_v10, %v11317_v42  ;;  %9557 = vmatpush3.msra.mxu0 %v5329_v15  ;;  %9531 = vmatprep.mubr.f32.mxu0 %v10413_v60  ;;  %v5742_v10 = vld [vmem:[%s12573_s2 + $0xd0] sm:$0xff] }
 0x405   : > { %9558 = vmatprep.subr.mxu0 %v5328_v19  ;;  %v3701_v58 = vpop.f32.mrf.mxu0 }
 0x406   : > { %v11397_v49 = vmul.f32 %v3701_v58, %v11321_v9  ;;  %9559 = vmatpush3.msra.mxu0 %v5328_v19  ;;  %v11444_v19 = vpop.f32.mrf.mxu1  ;;  %v5741_v58 = vld [vmem:[%s12573_s2 + $0xc8] sm:$0xff] }
 0x407   : > { %9560 = vmatprep.subr.mxu0 %v5327_v61  ;;  %v9389_v57 = vpop.f32.mrf.mxu0  ;;  %9532 = vmatmul.mubr.f32.gmra.mxu0 %v10419_v0 }
 0x408   : > { %v11402_v42 = vmul.f32 %v9389_v57, %v11325_v54  ;;  %9561 = vmatpush3.msra.mxu0 %v5327_v61  ;;  %9534 = vmatprep.mubr.f32.mxu0 %v10424_v6 }
 0x409   : > { %9562 = vmatprep.subr.mxu0 %v5326_v50  ;;  %v3711_v63 = vpop.f32.mrf.mxu0 }
 0x40a   : > { %v11409_v9 = vmul.f32 %v3711_v63, %v11329_v56  ;;  %9563 = vmatpush3.msra.mxu0 %v5326_v50  ;;  %v5740_v50 = vld [vmem:[%s12573_s2 + $0xc0] sm:$0xff]  ;;  %v11458_v63 = vpop.f32.mrf.mxu1 }
 0x40b   : > { %9564 = vmatprep.subr.mxu0 %v5325_v20  ;;  %v9392_v24 = vpop.f32.mrf.mxu0  ;;  %9535 = vmatmul.mubr.f32.gmra.mxu0 %v10429_v8 }
 0x40c   : > { %v11414_v54 = vmul.f32 %v9392_v24, %v11332_v7  ;;  %9565 = vmatpush3.msra.mxu0 %v5325_v20  ;;  %9537 = vmatprep.mubr.f32.mxu0 %v10433_v11  ;;  %v5739_v20 = vld [vmem:[%s12573_s2 + $0xb8] sm:$0xff] }
 0x40d   : > { %9566 = vmatprep.subr.mxu0 %v5324_v41  ;;  %v3721_v56 = vpop.f32.mrf.mxu0 }
 0x40e   : > { %v11421_v27 = vmul.f32 %v3721_v56, %v11335_v34  ;;  %9567 = vmatpush3.msra.mxu0 %v5324_v41  ;;  %v5738_v41 = vld [vmem:[%s12573_s2 + $0xb0] sm:$0xff]  ;;  %v5736_v56 = vld [vmem:[%s12573_s2 + $0xa0] sm:$0xff] }
 0x40f   : > { %9568 = vmatprep.subr.mxu0 %v5323_v1  ;;  %v9395_v23 = vpop.f32.mrf.mxu0  ;;  %9538 = vmatmul.mubr.f32.gmra.mxu0 %v10439_v13 }
 0x410   : > { %v11426_v7 = vmul.f32 %v9395_v23, %v11338_v52  ;;  %9569 = vmatpush3.msra.mxu0 %v5323_v1  ;;  %9572 = vmatprep.mubr.f32.mxu0 %v10330_v26  ;;  %v5737_v1 = vld [vmem:[%s12573_s2 + $0xa8] sm:$0xff]  ;;  %v5735_v23 = vld [vmem:[%s12573_s2 + $0x98] sm:$0xff] }
 0x411   : > { %9570 = vmatprep.subr.mxu0 %v5322_v3  ;;  %v3731_v34 = vpop.f32.mrf.mxu0 }
 0x412   : > { %v11434_v31 = vmul.f32 %v3731_v34, %v11341_v33  ;;  %9571 = vmatpush3.msra.mxu0 %v5322_v3  ;;  %v5734_v34 = vld [vmem:[%s12573_s2 + $0x90] sm:$0xff] }
 0x413   : > { %5748 = vmatprep.subr.mxu0 %v5747_v40  ;;  %v9462_v52 = vpop.f32.mrf.mxu0  ;;  %9573 = vmatmul.mubr.f32.vlgmr.msra.gmra.mxu0 %v10328_v25  ;;  %v11472_v40 = vpop.f32.mrf.mxu1 }
 0x414   : > { %v11440_v15 = vmul.f32 %v9462_v52, %v11345_v30  ;;  %5749 = vmatpush1.msra.mxu0 %v5746_v53  ;;  %9575 = vmatprep.mubr.f32.mxu0 %v10344_v43  ;;  %v5732_v52 = vld [vmem:[%s12573_s2 + $0x80] sm:$0xff] }
 0x415   : > { %5750 = vmatprep.subr.mxu0 %v5745_v51  ;;  %v4051_v33 = vpop.f32.mrf.mxu0  ;;  %v5733_v51 = vld [vmem:[%s12573_s2 + $0x88] sm:$0xff] }
 0x416   : > { %v11448_v61 = vmul.f32 %v4051_v33, %v11351_v32  ;;  %5751 = vmatpush1.msra.mxu0 %v5744_v45  ;;  %v11486_v33 = vpop.f32.mrf.mxu1 }
 0x417   : > { %5752 = vmatprep.subr.mxu0 %v5743_v16  ;;  %v9465_v30 = vpop.f32.mrf.mxu0  ;;  %9576 = vmatmul.mubr.f32.gmra.mxu0 %v10351_v48  ;;  %v5731_v16 = vld [vmem:[%s12573_s2 + $0x78] sm:$0xff] }
 0x418   : > { %v11454_v57 = vmul.f32 %v9465_v30, %v11355_v62  ;;  %5753 = vmatpush1.msra.mxu0 %v5742_v10  ;;  %9578 = vmatprep.mubr.f32.mxu0 %v10365_v5  ;;  %v5730_v10 = vld [vmem:[%s12573_s2 + $0x70] sm:$0xff]  ;;  %v5729_v30 = vld [vmem:[%s12573_s2 + $0x68] sm:$0xff] }
 0x419   : > { %5754 = vmatprep.subr.mxu0 %v5741_v58  ;;  %v4061_v32 = vpop.f32.mrf.mxu0 }
 0x41a   : > { %12574 = vst [vmem:[#allocation31_spill] sm:$0xff] %v11454_v57  ;;  %v11462_v24 = vmul.f32 %v4061_v32, %v11361_v29  ;;  %5755 = vmatpush1.msra.mxu0 %v5740_v50  ;;  %v5728_v50 = vld [vmem:[%s12573_s2 + $0x60] sm:$0xff]  ;;  %v5727_v32 = vld [vmem:[%s12573_s2 + $0x58] sm:$0xff] }
 0x41b   : > { %5756 = vmatprep.subr.mxu0 %v5739_v20  ;;  %v9468_v62 = vpop.f32.mrf.mxu0  ;;  %9579 = vmatmul.mubr.f32.gmra.mxu0 %v10371_v14 }
 0x41c   : > { %12575 = vst [vmem:[#allocation30_spill] sm:$0xff] %v11462_v24  ;;  %v11468_v3 = vmul.f32 %v9468_v62, %v11366_v12  ;;  %5757 = vmatpush1.msra.mxu0 %v5738_v41  ;;  %9581 = vmatprep.mubr.f32.mxu0 %v10375_v18  ;;  %v11500_v41 = vpop.f32.mrf.mxu1 }
 0x41d   : > { %5758 = vmatprep.subr.mxu0 %v5737_v1  ;;  %v4071_v29 = vpop.f32.mrf.mxu0  ;;  %v5726_v1 = vld [vmem:[%s12573_s2 + $0x50] sm:$0xff] }
 0x41e   : > { %12576 = vst [vmem:[#allocation24_spill] sm:$0xff] %v11468_v3  ;;  %v11476_v53 = vmul.f32 %v4071_v29, %v11373_v4  ;;  %5759 = vmatpush1.msra.mxu0 %v5736_v56  ;;  %v5725_v56 = vld [vmem:[%s12573_s2 + $0x48] sm:$0xff] }
 0x41f   : > { %5760 = vmatprep.subr.mxu0 %v5735_v23  ;;  %v9471_v12 = vpop.f32.mrf.mxu0  ;;  %9582 = vmatmul.mubr.f32.gmra.mxu0 %v10384_v28  ;;  %v5724_v23 = vld [vmem:[%s12573_s2 + $0x40] sm:$0xff] }
 0x420   : > { %12577 = vst [vmem:[#allocation33_spill] sm:$0xff] %v11476_v53  ;;  %v11482_v45 = vmul.f32 %v9471_v12, %v11378_v22  ;;  %5761 = vmatpush1.msra.mxu0 %v5734_v34  ;;  %9584 = vmatprep.mubr.f32.mxu0 %v10392_v38  ;;  %v5723_v34 = vld [vmem:[%s12573_s2 + $0x38] sm:$0xff]  ;;  %v5722_v12 = vld [vmem:[%s12573_s2 + $0x30] sm:$0xff] }
 0x421   : > { %5762 = vmatprep.subr.mxu0 %v5733_v51  ;;  %v4081_v4 = vpop.f32.mrf.mxu0  ;;  %v11514_v51 = vpop.f32.mrf.mxu1 }
 0x422   : > { %12578 = vst [vmem:[#allocation32_spill] sm:$0xff] %v11482_v45  ;;  %v11490_v58 = vmul.f32 %v4081_v4, %v11385_v37  ;;  %5763 = vmatpush1.msra.mxu0 %v5732_v52  ;;  %v5720_v4 = vld [vmem:[%s12573_s2 + $0x20] sm:$0xff] }
 0x423   : > { %5764 = vmatprep.subr.mxu0 %v5731_v16  ;;  %v9474_v22 = vpop.f32.mrf.mxu0  ;;  %9585 = vmatmul.mubr.f32.gmra.mxu0 %v10402_v47  ;;  %v5721_v16 = vld [vmem:[%s12573_s2 + $0x28] sm:$0xff]  ;;  %v4972_v45 = vld [vmem:[%s12572_s1 + $0x20] sm:$0xff] }
 0x424   : > { %12579 = vst [vmem:[#allocation25_spill] sm:$0xff] %v11490_v58  ;;  %v11496_v20 = vmul.f32 %v9474_v22, %v11390_v35  ;;  %5765 = vmatpush1.msra.mxu0 %v5730_v10  ;;  %9587 = vmatprep.mubr.f32.mxu0 %v10413_v60  ;;  %v11528_v22 = vpop.f32.mrf.mxu1  ;;  %v4971_v58 = vld [vmem:[%s12572_s1 + $0x18] sm:$0xff] }
 0x425   : > { %5766 = vmatprep.subr.mxu0 %v5729_v30  ;;  %v4091_v37 = vpop.f32.mrf.mxu0  ;;  %v5719_v30 = vld [vmem:[%s12573_s2 + $0x18] sm:$0xff] }
 0x426   : > { %12580 = vst [vmem:[#allocation35_spill] sm:$0xff] %v11496_v20  ;;  %v11504_v62 = vmul.f32 %v4091_v37, %v11397_v49  ;;  %5767 = vmatpush1.msra.mxu0 %v5728_v50  ;;  %v5718_v50 = vld [vmem:[%s12573_s2 + $0x10] sm:$0xff]  ;;  %v5717_v37 = vld [vmem:[%s12573_s2 + $0x8] sm:$0xff] }
 0x427   : > { %5768 = vmatprep.subr.mxu0 %v5727_v32  ;;  %v9477_v35 = vpop.f32.mrf.mxu0  ;;  %9588 = vmatmul.mubr.f32.gmra.mxu0 %v10419_v0  ;;  %v4974_v20 = vld [vmem:[%s12572_s1 + $0x30] sm:$0xff] }
 0x428   : > { %12581 = vst [vmem:[#allocation34_spill] sm:$0xff] %v11504_v62  ;;  %v11510_v29 = vmul.f32 %v9477_v35, %v11402_v42  ;;  %5769 = vmatpush1.msra.mxu0 %v5726_v1  ;;  %9590 = vmatprep.mubr.f32.mxu0 %v10424_v6  ;;  %v6149_v35 = vld [vmem:[%s12585_s3 + $0x78] sm:$0xff]  ;;  %v4973_v62 = vld [vmem:[%s12572_s1 + $0x28] sm:$0xff] }
 0x429   : > { %5770 = vmatprep.subr.mxu0 %v5725_v56  ;;  %v4101_v49 = vpop.f32.mrf.mxu0 }
 0x42a   : > { %12582 = vst [vmem:[#allocation26_spill] sm:$0xff] %v11510_v29  ;;  %v11518_v52 = vmul.f32 %v4101_v49, %v11409_v9  ;;  %5771 = vmatpush1.msra.mxu0 %v5724_v23  ;;  %v11542_v23 = vpop.f32.mrf.mxu1  ;;  %v6148_v49 = vld [vmem:[%s12585_s3 + $0x70] sm:$0xff]  ;;  %v4976_v29 = vld [vmem:[%s12572_s1 + $0x40] sm:$0xff] }
 0x42b   : > { %5772 = vmatprep.subr.mxu0 %v5723_v34  ;;  %v9480_v42 = vpop.f32.mrf.mxu0  ;;  %9591 = vmatmul.mubr.f32.gmra.mxu0 %v10429_v8 }
 0x42c   : > { %12583 = vst [vmem:[#allocation37_spill] sm:$0xff] %v11518_v52  ;;  %v11524_v10 = vmul.f32 %v9480_v42, %v11414_v54  ;;  %5773 = vmatpush1.msra.mxu0 %v5722_v12  ;;  %9593 = vmatprep.mubr.f32.mxu0 %v10433_v11  ;;  %v5716_v54 = vld [vmem:[%s12573_s2] sm:$0xff]  ;;  %v4975_v52 = vld [vmem:[%s12572_s1 + $0x38] sm:$0xff]  ;;  %s12589_s2 = sld [smem:[#allocation11_spill]] }
 0x42d   : > { %5774 = vmatprep.subr.mxu0 %v5721_v16  ;;  %v4111_v9 = vpop.f32.mrf.mxu0  ;;  %v11553_v16 = vpop.f32.mrf.mxu1 }
 0x42e   : > { %12584 = vst [vmem:[#allocation36_spill] sm:$0xff] %v11524_v10  ;;  %v11532_v32 = vmul.f32 %v4111_v9, %v11421_v27  ;;  %5775 = vmatpush1.msra.mxu0 %v5720_v4  ;;  %v6146_v9 = vld [vmem:[%s12585_s3 + $0x60] sm:$0xff]  ;;  %v4978_v10 = vld [vmem:[%s12572_s1 + $0x50] sm:$0xff] }
 0x42f   : > { %5776 = vmatprep.subr.mxu0 %v5719_v30  ;;  %v9483_v1 = vpop.f32.mrf.mxu0  ;;  %9594 = vmatmul.mubr.f32.gmra.mxu0 %v10439_v13 }
 0x430   : > { %12586 = vst [vmem:[#allocation27_spill] sm:$0xff] %v11532_v32  ;;  %v11538_v56 = vmul.f32 %v9483_v1, %v11426_v7  ;;  %5777 = vmatpush1.msra.mxu0 %v5718_v50  ;;  %5812 = vmatprep.mubr.f32.mxu0 %v12548_v17  ;;  %v6147_v7 = vld [vmem:[%s12585_s3 + $0x68] sm:$0xff]  ;;  %v4983_v50 = vld [vmem:[%s12572_s1 + $0x78] sm:$0xff]  ;;  %v11568_v1 = vpop.f32.mrf.mxu1 }
 0x431   : > { %5778 = vmatprep.subr.mxu0 %v5717_v37  ;;  %v4121_v27 = vpop.f32.mrf.mxu0  ;;  %v4998_v37 = vld [vmem:[%s12572_s1 + $0xf0] sm:$0xff]  ;;  %v4977_v32 = vld [vmem:[%s12572_s1 + $0x48] sm:$0xff] }
 0x432   : > { %12587 = vst [vmem:[#allocation39_spill] sm:$0xff] %v11538_v56  ;;  %v11545_v34 = vmul.f32 %v4121_v27, %v11434_v31  ;;  %5779 = vmatpush1.msra.mxu0 %v5716_v54  ;;  %v6145_v27 = vld [vmem:[%s12585_s3 + $0x58] sm:$0xff]  ;;  %v4980_v56 = vld [vmem:[%s12572_s1 + $0x60] sm:$0xff] }
 0x433   : > { %9636 = vmatprep.subr.mxu0 %v6149_v35  ;;  %v11548_v12 = vpop.f32.mrf.mxu0  ;;  %5813 = vmatmul.mubr.f32.vlgmr.msra.gmra.mxu0 %v10330_v26 }
 0x434   : > { %12588 = vst [vmem:[#allocation38_spill] sm:$0xff] %v11545_v34  ;;  %9637 = vmatpush3.msra.mxu0 %v6149_v35  ;;  %5818 = vmatprep.mubr.f32.mxu0 %v12548_v17  ;;  %v4534_v4 = vmul.f32 %v11548_v12, %v11349_v46  ;;  %v4979_v34 = vld [vmem:[%s12572_s1 + $0x58] sm:$0xff] }
 0x435   : > { %v11555_v42 = vpop.f32.mrf.mxu0  ;;  %9638 = vmatprep.subr.mxu0 %v6148_v49 }
 0x436   : > { %v4535_v31 = vmul.f32 %v11555_v42, %v11359_v39  ;;  %9639 = vmatpush3.msra.mxu0 %v6148_v49  ;;  %v4982_v49 = vld [vmem:[%s12572_s1 + $0x70] sm:$0xff] }
 0x437   : > { %v11561_v30 = vpop.f32.mrf.mxu0  ;;  %5819 = vmatmul.mubr.f32.gmra.mxu0 %v10328_v25  ;;  %9640 = vmatprep.subr.mxu0 %v6147_v7 }
 0x438   : > { %4662 = vmatprep.mubr.f32.mxu1 %v4535_v31  ;;  %5824 = vmatprep.mubr.f32.mxu0 %v12548_v17  ;;  %v4536_v54 = vmul.f32 %v11561_v30, %v11370_v59 }
 0x439   : > { %v11570_v39 = vpop.f32.mrf.mxu0  ;;  %4663 = vmatmul.mubr.f32.vlgmr.msra.gmra.mxu1 %v4534_v4  ;;  %9641 = vmatpush3.msra.mxu0 %v6147_v7  ;;  %v4997_v7 = vld [vmem:[%s12572_s1 + $0xe8] sm:$0xff] }
 0x43a   : > { %v4537_v46 = vmul.f32 %v11570_v39, %v11382_v55  ;;  %9642 = vmatprep.subr.mxu0 %v6146_v9  ;;  %8377 = vmatpush3.msra.mxu1 %v4983_v50  ;;  %v11583_v55 = vpop.f32.mrf.mxu1 }
 0x43b   : > { %v11576_v35 = vpop.f32.mrf.mxu0  ;;  %5825 = vmatmul.mubr.f32.gmra.mxu0 %v10344_v43  ;;  %8378 = vmatprep.subr.mxu1 %v4998_v37  ;;  %v6144_v37 = vld [vmem:[%s12585_s3 + $0x50] sm:$0xff] }
 0x43c   : > { %4667 = vmatprep.mubr.f32.mxu1 %v4537_v46  ;;  %5830 = vmatprep.mubr.f32.mxu0 %v12548_v17  ;;  %v4538_v4 = vmul.f32 %v11576_v35, %v11394_v44  ;;  %v4981_v46 = vld [vmem:[%s12572_s1 + $0x68] sm:$0xff] }
 0x43d   : > { %v11585_v31 = vpop.f32.mrf.mxu0  ;;  %4668 = vmatmul.mubr.f32.gmra.mxu1 %v4536_v54  ;;  %9643 = vmatpush3.msra.mxu0 %v6146_v9  ;;  %v4996_v9 = vld [vmem:[%s12572_s1 + $0xe0] sm:$0xff] }
 0x43e   : > { %v4539_v59 = vmul.f32 %v11585_v31, %v11406_v21  ;;  %9644 = vmatprep.subr.mxu0 %v6145_v27  ;;  %8379 = vmatpush3.msra.mxu1 %v4982_v49  ;;  %v11598_v21 = vpop.f32.mrf.mxu1 }
 0x43f   : > { %v11591_v50 = vpop.f32.mrf.mxu0  ;;  %5831 = vmatmul.mubr.f32.gmra.mxu0 %v10351_v48  ;;  %8380 = vmatprep.subr.mxu1 %v4997_v7 }
 0x440   : > { %4672 = vmatprep.mubr.f32.mxu1 %v4539_v59  ;;  %5836 = vmatprep.mubr.f32.mxu0 %v12548_v17  ;;  %v4540_v49 = vmul.f32 %v11591_v50, %v11418_v36  ;;  %v6143_v59 = vld [vmem:[%s12585_s3 + $0x48] sm:$0xff] }
 0x441   : > { %v11600_v54 = vpop.f32.mrf.mxu0  ;;  %4673 = vmatmul.mubr.f32.gmra.mxu1 %v4538_v4  ;;  %9645 = vmatpush3.msra.mxu0 %v6145_v27  ;;  %v4995_v27 = vld [vmem:[%s12572_s1 + $0xd8] sm:$0xff] }
 0x442   : > { %v4541_v44 = vmul.f32 %v11600_v54, %v11430_v2  ;;  %9646 = vmatprep.subr.mxu0 %v6144_v37  ;;  %8381 = vmatpush3.msra.mxu1 %v4981_v46  ;;  %v11613_v2 = vpop.f32.mrf.mxu1 }
 0x443   : > { %v11606_v7 = vpop.f32.mrf.mxu0  ;;  %5837 = vmatmul.mubr.f32.gmra.mxu0 %v10365_v5  ;;  %8382 = vmatprep.subr.mxu1 %v4996_v9 }
 0x444   : > { %4677 = vmatprep.mubr.f32.mxu1 %v4541_v44  ;;  %5842 = vmatprep.mubr.f32.mxu0 %v12548_v17  ;;  %v4542_v46 = vmul.f32 %v11606_v7, %v11444_v19  ;;  %v6142_v44 = vld [vmem:[%s12585_s3 + $0x40] sm:$0xff] }
 0x445   : > { %v11615_v4 = vpop.f32.mrf.mxu0  ;;  %4678 = vmatmul.mubr.f32.gmra.mxu1 %v4540_v49  ;;  %9647 = vmatpush3.msra.mxu0 %v6144_v37  ;;  %v4994_v37 = vld [vmem:[%s12572_s1 + $0xd0] sm:$0xff] }
 0x446   : > { %v4543_v36 = vmul.f32 %v11615_v4, %v11458_v63  ;;  %9648 = vmatprep.subr.mxu0 %v6143_v59  ;;  %8383 = vmatpush3.msra.mxu1 %v4980_v56  ;;  %v11628_v63 = vpop.f32.mrf.mxu1 }
 0x447   : > { %v11621_v9 = vpop.f32.mrf.mxu0  ;;  %5843 = vmatmul.mubr.f32.gmra.mxu0 %v10371_v14  ;;  %8384 = vmatprep.subr.mxu1 %v4995_v27 }
 0x448   : > { %4682 = vmatprep.mubr.f32.mxu1 %v4543_v36  ;;  %5848 = vmatprep.mubr.f32.mxu0 %v12548_v17  ;;  %v4544_v49 = vmul.f32 %v11621_v9, %v11472_v40  ;;  %v6141_v36 = vld [vmem:[%s12585_s3 + $0x38] sm:$0xff] }
 0x449   : > { %v11630_v56 = vpop.f32.mrf.mxu0  ;;  %4683 = vmatmul.mubr.f32.gmra.mxu1 %v4542_v46  ;;  %9649 = vmatpush3.msra.mxu0 %v6143_v59  ;;  %v4993_v59 = vld [vmem:[%s12572_s1 + $0xc8] sm:$0xff] }
 0x44a   : > { %v4545_v19 = vmul.f32 %v11630_v56, %v11486_v33  ;;  %9650 = vmatprep.subr.mxu0 %v6142_v44  ;;  %8385 = vmatpush3.msra.mxu1 %v4979_v34  ;;  %v11643_v33 = vpop.f32.mrf.mxu1 }
 0x44b   : > { %v11636_v27 = vpop.f32.mrf.mxu0  ;;  %5849 = vmatmul.mubr.f32.gmra.mxu0 %v10375_v18  ;;  %8386 = vmatprep.subr.mxu1 %v4994_v37 }
 0x44c   : > { %4687 = vmatprep.mubr.f32.mxu1 %v4545_v19  ;;  %5854 = vmatprep.mubr.f32.mxu0 %v12548_v17  ;;  %v4546_v46 = vmul.f32 %v11636_v27, %v11500_v41  ;;  %v6140_v19 = vld [vmem:[%s12585_s3 + $0x30] sm:$0xff] }
 0x44d   : > { %v11645_v34 = vpop.f32.mrf.mxu0  ;;  %4688 = vmatmul.mubr.f32.gmra.mxu1 %v4544_v49  ;;  %9651 = vmatpush3.msra.mxu0 %v6142_v44  ;;  %v4992_v44 = vld [vmem:[%s12572_s1 + $0xc0] sm:$0xff] }
 0x44e   : > { %v4547_v40 = vmul.f32 %v11645_v34, %v11514_v51  ;;  %9652 = vmatprep.subr.mxu0 %v6141_v36  ;;  %8387 = vmatpush3.msra.mxu1 %v4978_v10  ;;  %v11658_v51 = vpop.f32.mrf.mxu1 }
 0x44f   : > { %v11651_v37 = vpop.f32.mrf.mxu0  ;;  %5855 = vmatmul.mubr.f32.gmra.mxu0 %v10384_v28  ;;  %8388 = vmatprep.subr.mxu1 %v4993_v59 }
 0x450   : > { %4692 = vmatprep.mubr.f32.mxu1 %v4547_v40  ;;  %5860 = vmatprep.mubr.f32.mxu0 %v12548_v17  ;;  %v4548_v49 = vmul.f32 %v11651_v37, %v11528_v22  ;;  %v6139_v40 = vld [vmem:[%s12585_s3 + $0x28] sm:$0xff] }
 0x451   : > { %v11660_v10 = vpop.f32.mrf.mxu0  ;;  %4693 = vmatmul.mubr.f32.gmra.mxu1 %v4546_v46  ;;  %9653 = vmatpush3.msra.mxu0 %v6141_v36  ;;  %v4991_v36 = vld [vmem:[%s12572_s1 + $0xb8] sm:$0xff] }
 0x452   : > { %v4549_v41 = vmul.f32 %v11660_v10, %v11542_v23  ;;  %9654 = vmatprep.subr.mxu0 %v6140_v19  ;;  %8389 = vmatpush3.msra.mxu1 %v4977_v32  ;;  %v11673_v23 = vpop.f32.mrf.mxu1 }
 0x453   : > { %v11666_v59 = vpop.f32.mrf.mxu0  ;;  %5861 = vmatmul.mubr.f32.gmra.mxu0 %v10392_v38  ;;  %8390 = vmatprep.subr.mxu1 %v4992_v44 }
 0x454   : > { %4697 = vmatprep.mubr.f32.mxu1 %v4549_v41  ;;  %5866 = vmatprep.mubr.f32.mxu0 %v12548_v17  ;;  %v4550_v46 = vmul.f32 %v11666_v59, %v11553_v16  ;;  %v6138_v41 = vld [vmem:[%s12585_s3 + $0x20] sm:$0xff] }
 0x455   : > { %v11675_v32 = vpop.f32.mrf.mxu0  ;;  %4698 = vmatmul.mubr.f32.gmra.mxu1 %v4548_v49  ;;  %9655 = vmatpush3.msra.mxu0 %v6140_v19  ;;  %v4990_v19 = vld [vmem:[%s12572_s1 + $0xb0] sm:$0xff] }
 0x456   : > { %v4551_v22 = vmul.f32 %v11675_v32, %v11568_v1  ;;  %9656 = vmatprep.subr.mxu0 %v6139_v40  ;;  %8391 = vmatpush3.msra.mxu1 %v4976_v29  ;;  %v4320_v1 = vpop.f32.mrf.mxu1 }
 0x457   : > { %v11681_v44 = vpop.f32.mrf.mxu0  ;;  %5867 = vmatmul.mubr.f32.gmra.mxu0 %v10402_v47  ;;  %8392 = vmatprep.subr.mxu1 %v4991_v36 }
 0x458   : > { %4702 = vmatprep.mubr.f32.mxu1 %v4551_v22  ;;  %5872 = vmatprep.mubr.f32.mxu0 %v12548_v17  ;;  %v4552_v16 = vmul.f32 %v11681_v44, %v11583_v55  ;;  %v6137_v22 = vld [vmem:[%s12585_s3 + $0x18] sm:$0xff] }
 0x459   : > { %v11688_v49 = vpop.f32.mrf.mxu0  ;;  %4703 = vmatmul.mubr.f32.gmra.mxu1 %v4550_v46  ;;  %9657 = vmatpush3.msra.mxu0 %v6139_v40  ;;  %v4989_v40 = vld [vmem:[%s12572_s1 + $0xa8] sm:$0xff] }
 0x45a   : > { %v4553_v29 = vmul.f32 %v11688_v49, %v11598_v21  ;;  %9658 = vmatprep.subr.mxu0 %v6138_v41  ;;  %8393 = vmatpush3.msra.mxu1 %v4975_v52  ;;  %v4324_v21 = vpop.f32.mrf.mxu1 }
 0x45b   : > { %v11694_v36 = vpop.f32.mrf.mxu0  ;;  %5873 = vmatmul.mubr.f32.gmra.mxu0 %v10413_v60  ;;  %8394 = vmatprep.subr.mxu1 %v4990_v19 }
 0x45c   : > { %4707 = vmatprep.mubr.f32.mxu1 %v4553_v29  ;;  %5878 = vmatprep.mubr.f32.mxu0 %v12548_v17  ;;  %v4554_v55 = vmul.f32 %v11694_v36, %v11613_v2  ;;  %v6136_v29 = vld [vmem:[%s12585_s3 + $0x10] sm:$0xff] }
 0x45d   : > { %v11701_v46 = vpop.f32.mrf.mxu0  ;;  %4708 = vmatmul.mubr.f32.gmra.mxu1 %v4552_v16  ;;  %9659 = vmatpush3.msra.mxu0 %v6138_v41  ;;  %v4988_v41 = vld [vmem:[%s12572_s1 + $0xa0] sm:$0xff] }
 0x45e   : > { %v4555_v52 = vmul.f32 %v11701_v46, %v11628_v63  ;;  %9660 = vmatprep.subr.mxu0 %v6137_v22  ;;  %8395 = vmatpush3.msra.mxu1 %v4974_v20  ;;  %v4326_v63 = vpop.f32.mrf.mxu1 }
 0x45f   : > { %v11707_v19 = vpop.f32.mrf.mxu0  ;;  %5879 = vmatmul.mubr.f32.gmra.mxu0 %v10419_v0  ;;  %8396 = vmatprep.subr.mxu1 %v4989_v40 }
 0x460   : > { %4712 = vmatprep.mubr.f32.mxu1 %v4555_v52  ;;  %5884 = vmatprep.mubr.f32.mxu0 %v12548_v17  ;;  %v4556_v2 = vmul.f32 %v11707_v19, %v11643_v33  ;;  %v6135_v52 = vld [vmem:[%s12585_s3 + $0x8] sm:$0xff] }
 0x461   : > { %v11714_v16 = vpop.f32.mrf.mxu0  ;;  %4713 = vmatmul.mubr.f32.gmra.mxu1 %v4554_v55  ;;  %9661 = vmatpush3.msra.mxu0 %v6137_v22  ;;  %v4987_v22 = vld [vmem:[%s12572_s1 + $0x98] sm:$0xff] }
 0x462   : > { %v4557_v20 = vmul.f32 %v11714_v16, %v11658_v51  ;;  %9662 = vmatprep.subr.mxu0 %v6136_v29  ;;  %8397 = vmatpush3.msra.mxu1 %v4973_v62  ;;  %v4330_v51 = vpop.f32.mrf.mxu1 }
 0x463   : > { %v11720_v40 = vpop.f32.mrf.mxu0  ;;  %5885 = vmatmul.mubr.f32.gmra.mxu0 %v10424_v6  ;;  %8398 = vmatprep.subr.mxu1 %v4988_v41 }
 0x464   : > { %4717 = vmatprep.mubr.f32.mxu1 %v4557_v20  ;;  %5890 = vmatprep.mubr.f32.mxu0 %v12548_v17  ;;  %v4558_v33 = vmul.f32 %v11720_v40, %v11673_v23  ;;  %v6134_v20 = vld [vmem:[%s12585_s3] sm:$0xff]  ;;  %s12590_s3 = sld [smem:[#allocation18_spill]] }
 0x465   : > { %v11727_v55 = vpop.f32.mrf.mxu0  ;;  %4718 = vmatmul.mubr.f32.gmra.mxu1 %v4556_v2  ;;  %9663 = vmatpush3.msra.mxu0 %v6136_v29  ;;  %v4986_v29 = vld [vmem:[%s12572_s1 + $0x90] sm:$0xff] }
 0x466   : > { %v4559_v62 = vmul.f32 %v11727_v55, %v4320_v1  ;;  %9664 = vmatprep.subr.mxu0 %v6135_v52  ;;  %8399 = vmatpush3.msra.mxu1 %v4972_v45  ;;  %v4332_v1 = vpop.f32.mrf.mxu1 }
 0x467   : > { %v11732_v41 = vpop.f32.mrf.mxu0  ;;  %5891 = vmatmul.mubr.f32.gmra.mxu0 %v10429_v8  ;;  %8400 = vmatprep.subr.mxu1 %v4987_v22  ;;  %v6543_v22 = vld [vmem:[%s12589_s2 + $0x78] sm:$0xff] }
 0x468   : > { %4722 = vmatprep.mubr.f32.mxu1 %v4559_v62  ;;  %5896 = vmatprep.mubr.f32.mxu0 %v12548_v17  ;;  %v4560_v23 = vmul.f32 %v11732_v41, %v4324_v21  ;;  %v4970_v62 = vld [vmem:[%s12572_s1 + $0x10] sm:$0xff] }
 0x469   : > { %v11739_v2 = vpop.f32.mrf.mxu0  ;;  %4723 = vmatmul.mubr.f32.gmra.mxu1 %v4558_v33  ;;  %9665 = vmatpush3.msra.mxu0 %v6135_v52  ;;  %v4985_v33 = vld [vmem:[%s12572_s1 + $0x88] sm:$0xff]  ;;  %v4336_v52 = vpop.f32.mrf.mxu1 }
 0x46a   : > { %v4561_v45 = vmul.f32 %v11739_v2, %v4326_v63  ;;  %9666 = vmatprep.subr.mxu0 %v6134_v20  ;;  %8401 = vmatpush3.msra.mxu1 %v4971_v58 }
 0x46b   : > { %v11743_v3 = vpop.f32.mrf.mxu0  ;;  %5897 = vmatmul.mubr.f32.gmra.mxu0 %v10433_v11  ;;  %8402 = vmatprep.subr.mxu1 %v4986_v29  ;;  %v4984_v29 = vld [vmem:[%s12572_s1 + $0x80] sm:$0xff] }
 0x46c   : > { %4727 = vmatprep.mubr.f32.mxu1 %v4561_v45  ;;  %5902 = vmatprep.mubr.f32.mxu0 %v12548_v17  ;;  %v4562_v21 = vmul.f32 %v11743_v3, %v4330_v51  ;;  %v4969_v17 = vld [vmem:[%s12572_s1 + $0x8] sm:$0xff]  ;;  %v4338_v45 = vpop.f32.mrf.mxu1 }
 0x46d   : > { %v11750_v53 = vpop.f32.mrf.mxu0  ;;  %4728 = vmatmul.mubr.f32.gmra.mxu1 %v4560_v23  ;;  %9667 = vmatpush3.msra.mxu0 %v6134_v20  ;;  %v6542_v23 = vld [vmem:[%s12589_s2 + $0x70] sm:$0xff] }
 0x46e   : > { %v4563_v58 = vmul.f32 %v11750_v53, %v4332_v1  ;;  %9732 = vmatprep.subr.mxu0 %v6543_v22  ;;  %8403 = vmatpush3.msra.mxu1 %v4970_v62 }
 0x46f   : > { %v11754_v63 = vpop.f32.mrf.mxu0  ;;  %5903 = vmatmul.mubr.f32.gmra.mxu0 %v10439_v13  ;;  %8404 = vmatprep.subr.mxu1 %v4985_v33  ;;  %v6541_v33 = vld [vmem:[%s12589_s2 + $0x68] sm:$0xff] }
 0x470   : > { %4732 = vmatprep.mubr.f32.mxu1 %v4563_v58  ;;  %9668 = vmatprep.mubr.f32.mxu0 %v10330_v26  ;;  %v4564_v62 = vmul.f32 %v11754_v63, %v4336_v52 }
 0x471   : > { %v11760_v20 = vpop.f32.mrf.mxu0  ;;  %4733 = vmatmul.mubr.f32.gmra.mxu1 %v4562_v21  ;;  %v4968_v21 = vld [vmem:[%s12572_s1] sm:$0xff]  ;;  %s12591_s1 = sld [smem:[#allocation19_spill]] }
 0x472   : > { %v4565_v1 = vmul.f32 %v11760_v20, %v4338_v45  ;;  %8405 = vmatpush3.msra.mxu1 %v4969_v17  ;;  %v11782_v45 = vld [vmem:[%s12590_s3 + $0x38] sm:$0xff] }
 0x473   : > { %v11764_v51 = vpop.f32.mrf.mxu0  ;;  %9669 = vmatmul.mubr.f32.vlgmr.msra.gmra.mxu0 %v10328_v25  ;;  %8406 = vmatprep.subr.mxu1 %v4984_v29 }
 0x474   : > { %9733 = vmatpush3.msra.mxu0 %v6543_v22  ;;  %4737 = vmatprep.mubr.f32.mxu1 %v4565_v1  ;;  %v6540_v22 = vld [vmem:[%s12589_s2 + $0x60] sm:$0xff]  ;;  %v4936_v52 = vmul.f32 %v11764_v51, %v11548_v12  ;;  %v6539_v1 = vld [vmem:[%s12589_s2 + $0x58] sm:$0xff]  ;;  %v6538_v12 = vld [vmem:[%s12589_s2 + $0x50] sm:$0xff] }
 0x475   : > { %9671 = vmatprep.mubr.f32.mxu0 %v10344_v43  ;;  %9734 = vmatprep.subr.mxu0 %v6542_v23  ;;  %v11770_v58 = vpop.f32.mrf.mxu0 }
 0x476   : > { %4738 = vmatmul.mubr.f32.gmra.mxu1 %v4564_v62  ;;  %v4937_v17 = vmul.f32 %v11770_v58, %v11555_v42  ;;  %9735 = vmatpush3.msra.mxu0 %v6542_v23 }
 0x477   : > { %9736 = vmatprep.subr.mxu0 %v6541_v33  ;;  %v11775_v29 = vpop.f32.mrf.mxu0  ;;  %9672 = vmatmul.mubr.f32.gmra.mxu0 %v10351_v48 }
 0x478   : > { %9737 = vmatpush3.msra.mxu0 %v6541_v33  ;;  %8407 = vmatpush3.msra.mxu1 %v4968_v21  ;;  %v4938_v33 = vmul.f32 %v11775_v29, %v11561_v30 }
 0x479   : > { %5064 = vmatprep.mubr.f32.mxu1 %v4937_v17  ;;  %9674 = vmatprep.mubr.f32.mxu0 %v10365_v5  ;;  %v11785_v42 = vpop.f32.mrf.mxu0 }
 0x47a   : > { %9738 = vmatprep.subr.mxu0 %v6540_v22  ;;  %v4939_v23 = vmul.f32 %v11785_v42, %v11570_v39  ;;  %5065 = vmatmul.mubr.f32.vlgmr.msra.gmra.mxu1 %v4936_v52  ;;  %v6537_v39 = vld [vmem:[%s12589_s2 + $0x48] sm:$0xff]  ;;  %v6536_v52 = vld [vmem:[%s12589_s2 + $0x40] sm:$0xff] }
 0x47b   : > { %9739 = vmatpush3.msra.mxu0 %v6540_v22  ;;  %v11790_v62 = vpop.f32.mrf.mxu0  ;;  %9596 = vmatprep.subr.mxu1 %v11782_v45 }
 0x47c   : > { %9740 = vmatprep.subr.mxu0 %v6539_v1  ;;  %9675 = vmatmul.mubr.f32.gmra.mxu0 %v10371_v14  ;;  %v4940_v30 = vmul.f32 %v11790_v62, %v11576_v35 }
 0x47d   : > { %9741 = vmatpush3.msra.mxu0 %v6539_v1  ;;  %5069 = vmatprep.mubr.f32.mxu1 %v4939_v23  ;;  %v11797_v21 = vpop.f32.mrf.mxu0  ;;  %v6535_v23 = vld [vmem:[%s12589_s2 + $0x38] sm:$0xff] }
 0x47e   : > { %9677 = vmatprep.mubr.f32.mxu0 %v10375_v18  ;;  %9742 = vmatprep.subr.mxu0 %v6538_v12  ;;  %v4941_v17 = vmul.f32 %v11797_v21, %v11585_v31 }
 0x47f   : > { %5070 = vmatmul.mubr.f32.gmra.mxu1 %v4938_v33  ;;  %9743 = vmatpush3.msra.mxu0 %v6538_v12  ;;  %v11803_v22 = vpop.f32.mrf.mxu0  ;;  %v6534_v33 = vld [vmem:[%s12589_s2 + $0x30] sm:$0xff] }
 0x480   : > { %9744 = vmatprep.subr.mxu0 %v6537_v39  ;;  %9678 = vmatmul.mubr.f32.gmra.mxu0 %v10384_v28  ;;  %v4942_v35 = vmul.f32 %v11803_v22, %v11591_v50 }
 0x481   : > { %9745 = vmatpush3.msra.mxu0 %v6537_v39  ;;  %5074 = vmatprep.mubr.f32.mxu1 %v4941_v17  ;;  %v11809_v1 = vpop.f32.mrf.mxu0  ;;  %v6533_v17 = vld [vmem:[%s12589_s2 + $0x28] sm:$0xff] }
 0x482   : > { %9680 = vmatprep.mubr.f32.mxu0 %v10392_v38  ;;  %9746 = vmatprep.subr.mxu0 %v6536_v52  ;;  %v4943_v31 = vmul.f32 %v11809_v1, %v11600_v54 }
 0x483   : > { %5075 = vmatmul.mubr.f32.gmra.mxu1 %v4940_v30  ;;  %9747 = vmatpush3.msra.mxu0 %v6536_v52  ;;  %v11815_v12 = vpop.f32.mrf.mxu0  ;;  %v6532_v30 = vld [vmem:[%s12589_s2 + $0x20] sm:$0xff] }
 0x484   : > { %9748 = vmatprep.subr.mxu0 %v6535_v23  ;;  %9681 = vmatmul.mubr.f32.gmra.mxu0 %v10402_v47  ;;  %v4944_v50 = vmul.f32 %v11815_v12, %v11606_v7 }
 0x485   : > { %9749 = vmatpush3.msra.mxu0 %v6535_v23  ;;  %5079 = vmatprep.mubr.f32.mxu1 %v4943_v31  ;;  %v11821_v39 = vpop.f32.mrf.mxu0  ;;  %v6531_v31 = vld [vmem:[%s12589_s2 + $0x18] sm:$0xff] }
 0x486   : > { %9683 = vmatprep.mubr.f32.mxu0 %v10413_v60  ;;  %9750 = vmatprep.subr.mxu0 %v6534_v33  ;;  %v4945_v54 = vmul.f32 %v11821_v39, %v11615_v4 }
 0x487   : > { %5080 = vmatmul.mubr.f32.gmra.mxu1 %v4942_v35  ;;  %9751 = vmatpush3.msra.mxu0 %v6534_v33  ;;  %v11827_v52 = vpop.f32.mrf.mxu0  ;;  %v6530_v35 = vld [vmem:[%s12589_s2 + $0x10] sm:$0xff] }
 0x488   : > { %9752 = vmatprep.subr.mxu0 %v6533_v17  ;;  %9684 = vmatmul.mubr.f32.gmra.mxu0 %v10419_v0  ;;  %v4946_v7 = vmul.f32 %v11827_v52, %v11621_v9 }
 0x489   : > { %9753 = vmatpush3.msra.mxu0 %v6533_v17  ;;  %5084 = vmatprep.mubr.f32.mxu1 %v4945_v54  ;;  %v11833_v23 = vpop.f32.mrf.mxu0  ;;  %v6529_v54 = vld [vmem:[%s12589_s2 + $0x8] sm:$0xff] }
 0x48a   : > { %9686 = vmatprep.mubr.f32.mxu0 %v10424_v6  ;;  %9754 = vmatprep.subr.mxu0 %v6532_v30  ;;  %v4947_v4 = vmul.f32 %v11833_v23, %v11630_v56 }
 0x48b   : > { %5085 = vmatmul.mubr.f32.gmra.mxu1 %v4944_v50  ;;  %9755 = vmatpush3.msra.mxu0 %v6532_v30  ;;  %v11839_v33 = vpop.f32.mrf.mxu0  ;;  %v6528_v50 = vld [vmem:[%s12589_s2] sm:$0xff]  ;;  %s12592_s2 = sld [smem:[#allocation20_spill]] }
 0x48c   : > { %9756 = vmatprep.subr.mxu0 %v6531_v31  ;;  %9687 = vmatmul.mubr.f32.gmra.mxu0 %v10429_v8  ;;  %v4948_v9 = vmul.f32 %v11839_v33, %v11636_v27 }
 0x48d   : > { %9757 = vmatpush3.msra.mxu0 %v6531_v31  ;;  %5089 = vmatprep.mubr.f32.mxu1 %v4947_v4  ;;  %v11845_v17 = vpop.f32.mrf.mxu0 }
 0x48e   : > { %9689 = vmatprep.mubr.f32.mxu0 %v10433_v11  ;;  %9758 = vmatprep.subr.mxu0 %v6530_v35  ;;  %v4949_v56 = vmul.f32 %v11845_v17, %v11645_v34 }
 0x48f   : > { %5090 = vmatmul.mubr.f32.gmra.mxu1 %v4946_v7  ;;  %9759 = vmatpush3.msra.mxu0 %v6530_v35  ;;  %v11851_v30 = vpop.f32.mrf.mxu0  ;;  %v5505_v35 = vld [vmem:[%s12590_s3 + $0x30] sm:$0xff] }
 0x490   : > { %9760 = vmatprep.subr.mxu0 %v6529_v54  ;;  %9690 = vmatmul.mubr.f32.gmra.mxu0 %v10439_v13  ;;  %v4950_v27 = vmul.f32 %v11851_v30, %v11651_v37 }
 0x491   : > { %9761 = vmatpush3.msra.mxu0 %v6529_v54  ;;  %5094 = vmatprep.mubr.f32.mxu1 %v4949_v56  ;;  %v11857_v31 = vpop.f32.mrf.mxu0  ;;  %v5504_v54 = vld [vmem:[%s12590_s3 + $0x28] sm:$0xff]  ;;  %v5502_v56 = vld [vmem:[%s12590_s3 + $0x18] sm:$0xff] }
 0x492   : > { %9762 = vmatprep.subr.mxu0 %v6528_v50  ;;  %9764 = vmatprep.mubr.f32.mxu0 %v10330_v26  ;;  %v4951_v34 = vmul.f32 %v11857_v31, %v11660_v10  ;;  %v6316_v24 = vld [vmem:[%s12592_s2 + $0x28] sm:$0xff] }
 0x493   : > { %5095 = vmatmul.mubr.f32.gmra.mxu1 %v4948_v9  ;;  %9763 = vmatpush3.msra.mxu0 %v6528_v50  ;;  %v11862_v4 = vpop.f32.mrf.mxu0  ;;  %v5501_v50 = vld [vmem:[%s12590_s3 + $0x10] sm:$0xff]  ;;  %v5500_v9 = vld [vmem:[%s12590_s3 + $0x8] sm:$0xff] }
 0x494   : > { %9765 = vmatmul.mubr.f32.vlgmr.msra.gmra.mxu0 %v10328_v25  ;;  %5099 = vmatprep.mubr.f32.mxu1 %v4951_v34  ;;  %v4952_v25 = vmul.f32 %v11862_v4, %v11666_v59  ;;  %v5499_v34 = vld [vmem:[%s12590_s3] sm:$0xff] }
 0x495   : > { %9767 = vmatprep.mubr.f32.mxu0 %v10344_v43  ;;  %v11869_v7 = vpop.f32.mrf.mxu0  ;;  %9597 = vmatpush3.msra.mxu1 %v11782_v45  ;;  %v5503_v45 = vld [vmem:[%s12590_s3 + $0x20] sm:$0xff] }
 0x496   : > { %v4953_v26 = vmul.f32 %v11869_v7, %v11675_v32  ;;  %9598 = vmatprep.subr.mxu1 %v5505_v35 }
 0x497   : > { %5100 = vmatmul.mubr.f32.gmra.mxu1 %v4950_v27  ;;  %v11874_v10 = vpop.f32.mrf.mxu0 }
 0x498   : > { %9768 = vmatmul.mubr.f32.gmra.mxu0 %v10351_v48  ;;  %5104 = vmatprep.mubr.f32.mxu1 %v4953_v26  ;;  %v4954_v48 = vmul.f32 %v11874_v10, %v11681_v44 }
 0x499   : > { %9770 = vmatprep.mubr.f32.mxu0 %v10365_v5  ;;  %v11881_v43 = vpop.f32.mrf.mxu0  ;;  %9599 = vmatpush3.msra.mxu1 %v5505_v35  ;;  %v5972_v35 = vld [vmem:[%s12591_s1 + $0xf8] sm:$0xff] }
 0x49a   : > { %v4955_v37 = vmul.f32 %v11881_v43, %v11688_v49  ;;  %9600 = vmatprep.subr.mxu1 %v5504_v54 }
 0x49b   : > { %5105 = vmatmul.mubr.f32.gmra.mxu1 %v4952_v25  ;;  %v11885_v32 = vpop.f32.mrf.mxu0 }
 0x49c   : > { %9771 = vmatmul.mubr.f32.gmra.mxu0 %v10371_v14  ;;  %5109 = vmatprep.mubr.f32.mxu1 %v4955_v37  ;;  %v4956_v14 = vmul.f32 %v11885_v32, %v11694_v36 }
 0x49d   : > { %9773 = vmatprep.mubr.f32.mxu0 %v10375_v18  ;;  %v11892_v5 = vpop.f32.mrf.mxu0  ;;  %9601 = vmatpush3.msra.mxu1 %v5504_v54 }
 0x49e   : > { %v4957_v59 = vmul.f32 %v11892_v5, %v11701_v46  ;;  %9602 = vmatprep.subr.mxu1 %v5503_v45 }
 0x49f   : > { %5110 = vmatmul.mubr.f32.gmra.mxu1 %v4954_v48  ;;  %v11896_v49 = vpop.f32.mrf.mxu0 }
 0x4a0   : > { %9774 = vmatmul.mubr.f32.gmra.mxu0 %v10384_v28  ;;  %5114 = vmatprep.mubr.f32.mxu1 %v4957_v59  ;;  %v4958_v28 = vmul.f32 %v11896_v49, %v11707_v19 }
 0x4a1   : > { %9776 = vmatprep.mubr.f32.mxu0 %v10392_v38  ;;  %v11903_v18 = vpop.f32.mrf.mxu0  ;;  %9603 = vmatpush3.msra.mxu1 %v5503_v45 }
 0x4a2   : > { %v4959_v44 = vmul.f32 %v11903_v18, %v11714_v16  ;;  %9604 = vmatprep.subr.mxu1 %v5502_v56 }
 0x4a3   : > { %5115 = vmatmul.mubr.f32.gmra.mxu1 %v4956_v14  ;;  %v11907_v46 = vpop.f32.mrf.mxu0 }
 0x4a4   : > { %9777 = vmatmul.mubr.f32.gmra.mxu0 %v10402_v47  ;;  %5119 = vmatprep.mubr.f32.mxu1 %v4959_v44  ;;  %v4960_v47 = vmul.f32 %v11907_v46, %v11720_v40 }
 0x4a5   : > { %9779 = vmatprep.mubr.f32.mxu0 %v10413_v60  ;;  %v11914_v38 = vpop.f32.mrf.mxu0  ;;  %9605 = vmatpush3.msra.mxu1 %v5502_v56 }
 0x4a6   : > { %v4961_v36 = vmul.f32 %v11914_v38, %v11727_v55  ;;  %9606 = vmatprep.subr.mxu1 %v5501_v50 }
 0x4a7   : > { %5120 = vmatmul.mubr.f32.gmra.mxu1 %v4958_v28  ;;  %v11918_v16 = vpop.f32.mrf.mxu0 }
 0x4a8   : > { %9780 = vmatmul.mubr.f32.gmra.mxu0 %v10419_v0  ;;  %5124 = vmatprep.mubr.f32.mxu1 %v4961_v36  ;;  %v4962_v0 = vmul.f32 %v11918_v16, %v11732_v41 }
 0x4a9   : > { %9782 = vmatprep.mubr.f32.mxu0 %v10424_v6  ;;  %v11925_v60 = vpop.f32.mrf.mxu0  ;;  %9607 = vmatpush3.msra.mxu1 %v5501_v50 }
 0x4aa   : > { %v4963_v19 = vmul.f32 %v11925_v60, %v11739_v2  ;;  %9608 = vmatprep.subr.mxu1 %v5500_v9 }
 0x4ab   : > { %5125 = vmatmul.mubr.f32.gmra.mxu1 %v4960_v47  ;;  %v11929_v55 = vpop.f32.mrf.mxu0 }
 0x4ac   : > { %9783 = vmatmul.mubr.f32.gmra.mxu0 %v10429_v8  ;;  %5129 = vmatprep.mubr.f32.mxu1 %v4963_v19  ;;  %v4964_v8 = vmul.f32 %v11929_v55, %v11743_v3 }
 0x4ad   : > { %9785 = vmatprep.mubr.f32.mxu0 %v10433_v11  ;;  %v11936_v6 = vpop.f32.mrf.mxu0  ;;  %9609 = vmatpush3.msra.mxu1 %v5500_v9 }
 0x4ae   : > { %v4965_v40 = vmul.f32 %v11936_v6, %v11750_v53  ;;  %9610 = vmatprep.subr.mxu1 %v5499_v34 }
 0x4af   : > { %5130 = vmatmul.mubr.f32.gmra.mxu1 %v4962_v0  ;;  %v11940_v2 = vpop.f32.mrf.mxu0  ;;  %v5971_v0 = vld [vmem:[%s12591_s1 + $0xf0] sm:$0xff] }
 0x4b0   : > { %9786 = vmatmul.mubr.f32.gmra.mxu0 %v10439_v13  ;;  %5134 = vmatprep.mubr.f32.mxu1 %v4965_v40  ;;  %v4966_v27 = vmul.f32 %v11940_v2, %v11754_v63 }
 0x4b1   : > { %v11946_v41 = vpop.f32.mrf.mxu0  ;;  %9611 = vmatpush3.msra.mxu1 %v5499_v34  ;;  %v5956_v34 = vld [vmem:[%s12591_s1 + $0x78] sm:$0xff] }
 0x4b2   : > { %v4967_v11 = vmul.f32 %v11946_v41, %v11760_v20  ;;  %8544 = vmatprep.subr.mxu1 %v5972_v35  ;;  %v5955_v35 = vld [vmem:[%s12591_s1 + $0x70] sm:$0xff] }
 0x4b3   : > { %5135 = vmatmul.mubr.f32.gmra.mxu1 %v4964_v8  ;;  %v11950_v53 = vpop.f32.mrf.mxu0 }
 0x4b4   : > { %5139 = vmatprep.mubr.f32.mxu1 %v4967_v11  ;;  %v5970_v11 = vld [vmem:[%s12591_s1 + $0xe8] sm:$0xff] }
 0x4b5   : > { %v11954_v26 = vpop.f32.mrf.mxu0 }
 0x4b7   : > { %5140 = vmatmul.mubr.f32.gmra.mxu1 %v4966_v27  ;;  %v11956_v13 = vpop.f32.mrf.mxu0 }
 0x4b9   : > { %v11958_v3 = vpop.f32.mrf.mxu0 }
 0x4bb   : > { %v11960_v54 = vpop.f32.mrf.mxu0 }
 0x4bd   : > { %v11962_v25 = vpop.f32.mrf.mxu0 }
 0x4bf   : > { %v11964_v20 = vpop.f32.mrf.mxu0 }
 0x4c1   : > { %v11966_v37 = vpop.f32.mrf.mxu0 }
 0x4c3   : > { %v11968_v45 = vpop.f32.mrf.mxu0 }
 0x4c5   : > { %v11970_v63 = vpop.f32.mrf.mxu0 }
 0x4c7   : > { %v11972_v48 = vpop.f32.mrf.mxu0 }
 0x4c9   : > { %v11974_v59 = vpop.f32.mrf.mxu0 }
 0x4cb   : > { %v11976_v56 = vpop.f32.mrf.mxu0 }
 0x4cd   : > { %v11978_v14 = vpop.f32.mrf.mxu0 }
 0x4cf   : > { %v11980_v44 = vpop.f32.mrf.mxu0 }
 0x4d1   : > { %v11982_v50 = vpop.f32.mrf.mxu0 }
 0x4d3   : > { %v9574_v28 = vpop.f32.mrf.mxu0 }
 0x4d4   : > { %v5484_v47 = vmul.f32 %v9574_v28, %v11950_v53 }
 0x4d5   : > { %v5404_v36 = vpop.f32.mrf.mxu0 }
 0x4d6   : > { %v5483_v9 = vmul.f32 %v5404_v36, %v11954_v26  ;;  %v5954_v36 = vld [vmem:[%s12591_s1 + $0x68] sm:$0xff] }
 0x4d7   : > { %v9577_v19 = vpop.f32.mrf.mxu0 }
 0x4d8   : > { %9612 = vmatprep.mubr.msk.f32.mxu1 %vm1832_vm1, %v5483_v9  ;;  %v5486_v27 = vmul.f32 %v9577_v19, %v11956_v13  ;;  %v5969_v9 = vld [vmem:[%s12591_s1 + $0xe0] sm:$0xff]  ;;  %v5968_v19 = vld [vmem:[%s12591_s1 + $0xd8] sm:$0xff] }
 0x4d9   : > { %v5414_v40 = vpop.f32.mrf.mxu0  ;;  %9613 = vmatmul.mubr.msk.f32.vlgmr.msra.gmra.mxu1 %vm1832_vm1, %v5484_v47  ;;  %v5953_v47 = vld [vmem:[%s12591_s1 + $0x60] sm:$0xff] }
 0x4da   : > { %v5485_v8 = vmul.f32 %v5414_v40, %v11958_v3  ;;  %8545 = vmatpush3.msra.mxu1 %v5956_v34 }
 0x4db   : > { %8546 = vmatprep.subr.mxu1 %v5971_v0  ;;  %v9580_v28 = vpop.f32.mrf.mxu0 }
 0x4dc   : > { %8547 = vmatpush3.msra.mxu1 %v5955_v35  ;;  %9615 = vmatprep.mubr.msk.f32.mxu1 %vm1832_vm1, %v5485_v8  ;;  %v5488_v0 = vmul.f32 %v9580_v28, %v11960_v54  ;;  %v5952_v35 = vld [vmem:[%s12591_s1 + $0x58] sm:$0xff]  ;;  %v5967_v8 = vld [vmem:[%s12591_s1 + $0xd0] sm:$0xff]  ;;  %v5966_v28 = vld [vmem:[%s12591_s1 + $0xc8] sm:$0xff] }
 0x4dd   : > { %8548 = vmatprep.subr.mxu1 %v5970_v11  ;;  %v5424_v57 = vpop.f32.mrf.mxu0  ;;  %9616 = vmatmul.mubr.msk.f32.gmra.mxu1 %vm1832_vm1, %v5486_v27 }
 0x4de   : > { %v5487_v34 = vmul.f32 %v5424_v57, %v11962_v25  ;;  %8549 = vmatpush3.msra.mxu1 %v5954_v36  ;;  %v5951_v57 = vld [vmem:[%s12591_s1 + $0x50] sm:$0xff] }
 0x4df   : > { %8550 = vmatprep.subr.mxu1 %v5969_v9  ;;  %v9583_v40 = vpop.f32.mrf.mxu0 }
 0x4e0   : > { %8551 = vmatpush3.msra.mxu1 %v5953_v47  ;;  %9618 = vmatprep.mubr.msk.f32.mxu1 %vm1832_vm1, %v5487_v34  ;;  %v5490_v36 = vmul.f32 %v9583_v40, %v11964_v20  ;;  %v5950_v47 = vld [vmem:[%s12591_s1 + $0x48] sm:$0xff]  ;;  %v5965_v34 = vld [vmem:[%s12591_s1 + $0xc0] sm:$0xff]  ;;  %v5964_v40 = vld [vmem:[%s12591_s1 + $0xb8] sm:$0xff] }
 0x4e1   : > { %8552 = vmatprep.subr.mxu1 %v5968_v19  ;;  %v5434_v11 = vpop.f32.mrf.mxu0  ;;  %9619 = vmatmul.mubr.msk.f32.gmra.mxu1 %vm1832_vm1, %v5488_v0  ;;  %v5949_v0 = vld [vmem:[%s12591_s1 + $0x40] sm:$0xff] }
 0x4e2   : > { %v5489_v27 = vmul.f32 %v5434_v11, %v11966_v37  ;;  %8553 = vmatpush3.msra.mxu1 %v5952_v35 }
 0x4e3   : > { %8554 = vmatprep.subr.mxu1 %v5967_v8  ;;  %v9586_v9 = vpop.f32.mrf.mxu0 }
 0x4e4   : > { %8555 = vmatpush3.msra.mxu1 %v5951_v57  ;;  %9621 = vmatprep.mubr.msk.f32.mxu1 %vm1832_vm1, %v5489_v27  ;;  %v5492_v8 = vmul.f32 %v9586_v9, %v11968_v45  ;;  %v5948_v57 = vld [vmem:[%s12591_s1 + $0x38] sm:$0xff]  ;;  %v5963_v27 = vld [vmem:[%s12591_s1 + $0xb0] sm:$0xff]  ;;  %v5962_v9 = vld [vmem:[%s12591_s1 + $0xa8] sm:$0xff] }
 0x4e5   : > { %8556 = vmatprep.subr.mxu1 %v5966_v28  ;;  %v5444_v19 = vpop.f32.mrf.mxu0  ;;  %9622 = vmatmul.mubr.msk.f32.gmra.mxu1 %vm1832_vm1, %v5490_v36  ;;  %v5947_v36 = vld [vmem:[%s12591_s1 + $0x30] sm:$0xff] }
 0x4e6   : > { %v5491_v35 = vmul.f32 %v5444_v19, %v11970_v63  ;;  %8557 = vmatpush3.msra.mxu1 %v5950_v47 }
 0x4e7   : > { %8558 = vmatprep.subr.mxu1 %v5965_v34  ;;  %v9589_v11 = vpop.f32.mrf.mxu0 }
 0x4e8   : > { %8559 = vmatpush3.msra.mxu1 %v5949_v0  ;;  %9624 = vmatprep.mubr.msk.f32.mxu1 %vm1832_vm1, %v5491_v35  ;;  %v5494_v34 = vmul.f32 %v9589_v11, %v11972_v48  ;;  %v5946_v0 = vld [vmem:[%s12591_s1 + $0x28] sm:$0xff]  ;;  %v5961_v35 = vld [vmem:[%s12591_s1 + $0xa0] sm:$0xff]  ;;  %v5960_v11 = vld [vmem:[%s12591_s1 + $0x98] sm:$0xff] }
 0x4e9   : > { %8560 = vmatprep.subr.mxu1 %v5964_v40  ;;  %v5454_v28 = vpop.f32.mrf.mxu0  ;;  %9625 = vmatmul.mubr.msk.f32.gmra.mxu1 %vm1832_vm1, %v5492_v8  ;;  %v5945_v8 = vld [vmem:[%s12591_s1 + $0x20] sm:$0xff] }
 0x4ea   : > { %v5493_v47 = vmul.f32 %v5454_v28, %v11974_v59  ;;  %8561 = vmatpush3.msra.mxu1 %v5948_v57 }
 0x4eb   : > { %8562 = vmatprep.subr.mxu1 %v5963_v27  ;;  %v9592_v19 = vpop.f32.mrf.mxu0 }
 0x4ec   : > { %8563 = vmatpush3.msra.mxu1 %v5947_v36  ;;  %9627 = vmatprep.mubr.msk.f32.mxu1 %vm1832_vm1, %v5493_v47  ;;  %v5496_v27 = vmul.f32 %v9592_v19, %v11976_v56  ;;  %v5944_v36 = vld [vmem:[%s12591_s1 + $0x18] sm:$0xff]  ;;  %v5959_v47 = vld [vmem:[%s12591_s1 + $0x90] sm:$0xff]  ;;  %v5958_v19 = vld [vmem:[%s12591_s1 + $0x88] sm:$0xff] }
 0x4ed   : > { %8564 = vmatprep.subr.mxu1 %v5962_v9  ;;  %v5464_v40 = vpop.f32.mrf.mxu0  ;;  %9628 = vmatmul.mubr.msk.f32.gmra.mxu1 %vm1832_vm1, %v5494_v34  ;;  %v5943_v34 = vld [vmem:[%s12591_s1 + $0x10] sm:$0xff] }
 0x4ee   : > { %v5495_v57 = vmul.f32 %v5464_v40, %v11978_v14  ;;  %8565 = vmatpush3.msra.mxu1 %v5946_v0 }
 0x4ef   : > { %8566 = vmatprep.subr.mxu1 %v5961_v35  ;;  %v9595_v28 = vpop.f32.mrf.mxu0 }
 0x4f0   : > { %8567 = vmatpush3.msra.mxu1 %v5945_v8  ;;  %9630 = vmatprep.mubr.msk.f32.mxu1 %vm1832_vm1, %v5495_v57  ;;  %v5498_v35 = vmul.f32 %v9595_v28, %v11980_v44  ;;  %v5942_v8 = vld [vmem:[%s12591_s1 + $0x8] sm:$0xff]  ;;  %v5957_v57 = vld [vmem:[%s12591_s1 + $0x80] sm:$0xff] }
 0x4f1   : > { %8568 = vmatprep.subr.mxu1 %v5960_v11  ;;  %v5474_v9 = vpop.f32.mrf.mxu0  ;;  %9631 = vmatmul.mubr.msk.f32.gmra.mxu1 %vm1832_vm1, %v5496_v27  ;;  %v5941_v27 = vld [vmem:[%s12591_s1] sm:$0xff]  ;;  %s12593_s1 = sld [smem:[#allocation21_spill]] }
 0x4f2   : > { %v5497_v0 = vmul.f32 %v5474_v9, %v11982_v50  ;;  %8569 = vmatpush3.msra.mxu1 %v5944_v36  ;;  %v6318_v36 = vld [vmem:[%s12592_s2 + $0x38] sm:$0xff] }
 0x4f3   : > { %8570 = vmatprep.subr.mxu1 %v5959_v47  ;;  %v5814_v40 = vpop.f32.mrf.mxu0 }
 0x4f4   : > { %8571 = vmatpush3.msra.mxu1 %v5943_v34  ;;  %9633 = vmatprep.mubr.msk.f32.mxu1 %vm1832_vm1, %v5497_v0  ;;  %v5909_v28 = vmul.f32 %v5814_v40, %v11764_v51  ;;  %v6317_v34 = vld [vmem:[%s12592_s2 + $0x30] sm:$0xff]  ;;  %v6315_v40 = vld [vmem:[%s12592_s2 + $0x20] sm:$0xff] }
 0x4f5   : > { %8572 = vmatprep.subr.mxu1 %v5958_v19  ;;  %9634 = vmatmul.mubr.msk.f32.gmra.mxu1 %vm1832_vm1, %v5498_v35  ;;  %v5816_v11 = vpop.f32.mrf.mxu0 }
 0x4f6   : > { %v5910_v9 = vmul.f32 %v5816_v11, %v11770_v58  ;;  %8573 = vmatpush3.msra.mxu1 %v5942_v8 }
 0x4f7   : > { %8574 = vmatprep.subr.mxu1 %v5957_v57  ;;  %v5820_v47 = vpop.f32.mrf.mxu0 }
 0x4f8   : > { %8575 = vmatpush3.msra.mxu1 %v5941_v27  ;;  %6037 = vmatprep.mubr.f32.mxu1 %v5910_v9  ;;  %v5911_v58 = vmul.f32 %v5820_v47, %v11775_v29  ;;  %v6314_v9 = vld [vmem:[%s12592_s2 + $0x18] sm:$0xff] }
 0x4f9   : > { %9692 = vmatprep.subr.mxu1 %v6318_v36  ;;  %v8328_v0 = vpop.f32.mrf.mxu1  ;;  %v5822_v19 = vpop.f32.mrf.mxu0  ;;  %6038 = vmatmul.mubr.f32.vlgmr.msra.gmra.mxu1 %v5909_v28 }
 0x4fa   : > { %v5912_v35 = vmul.f32 %v5822_v19, %v11785_v42  ;;  %9693 = vmatpush3.msra.mxu1 %v6318_v36 }
 0x4fb   : > { %v8329_v8 = vpop.f32.mrf.mxu1  ;;  %v5826_v11 = vpop.f32.mrf.mxu0  ;;  %9694 = vmatprep.subr.mxu1 %v6317_v34 }
 0x4fc   : > { %v12054_v51 = vadd.f32 %v8329_v8, %v8328_v0  ;;  %6042 = vmatprep.mubr.f32.mxu1 %v5912_v35  ;;  %9695 = vmatpush3.msra.mxu1 %v6317_v34  ;;  %v5913_v29 = vmul.f32 %v5826_v11, %v11790_v62  ;;  %v6313_v34 = vld [vmem:[%s12592_s2 + $0x10] sm:$0xff]  ;;  %v6311_v11 = vld [vmem:[%s12592_s2] sm:$0xff] }
 0x4fd   : > { %v8331_v57 = vpop.f32.mrf.mxu1  ;;  %v5828_v27 = vpop.f32.mrf.mxu0  ;;  %6043 = vmatmul.mubr.f32.gmra.mxu1 %v5911_v58  ;;  %9696 = vmatprep.subr.mxu1 %v6316_v24 }
 0x4fe   : > { %v5914_v42 = vmul.f32 %v5828_v27, %v11797_v21  ;;  %9697 = vmatpush3.msra.mxu1 %v6316_v24  ;;  %v6312_v24 = vld [vmem:[%s12592_s2 + $0x8] sm:$0xff]  ;;  %s12594_s2 = sld [smem:[#allocation22_spill]] }
 0x4ff   : > { %v8332_v36 = vpop.f32.mrf.mxu1  ;;  %v5832_v28 = vpop.f32.mrf.mxu0  ;;  %9698 = vmatprep.subr.mxu1 %v6315_v40 }
 0x500   : > { %v12060_v47 = vadd.f32 %v8332_v36, %v8331_v57  ;;  %6047 = vmatprep.mubr.f32.mxu1 %v5914_v42  ;;  %9699 = vmatpush3.msra.mxu1 %v6315_v40  ;;  %v5915_v62 = vmul.f32 %v5832_v28, %v11803_v22 }
 0x501   : > { %v8334_v0 = vpop.f32.mrf.mxu1  ;;  %v5834_v19 = vpop.f32.mrf.mxu0  ;;  %6048 = vmatmul.mubr.f32.gmra.mxu1 %v5913_v29  ;;  %9700 = vmatprep.subr.mxu1 %v6314_v9 }
 0x502   : > { %v5916_v21 = vmul.f32 %v5834_v19, %v11809_v1  ;;  %9701 = vmatpush3.msra.mxu1 %v6314_v9  ;;  %v12071_v1 = vld [vmem:[%s12593_s1 + $0x38] sm:$0xff] }
 0x503   : > { %v8335_v35 = vpop.f32.mrf.mxu1  ;;  %v5838_v58 = vpop.f32.mrf.mxu0  ;;  %9702 = vmatprep.subr.mxu1 %v6313_v34 }
 0x504   : > { %v12066_v8 = vadd.f32 %v8335_v35, %v8334_v0  ;;  %6052 = vmatprep.mubr.f32.mxu1 %v5916_v21  ;;  %9703 = vmatpush3.msra.mxu1 %v6313_v34  ;;  %v5917_v42 = vmul.f32 %v5838_v58, %v11815_v12 }
 0x505   : > { %v8337_v40 = vpop.f32.mrf.mxu1  ;;  %v5840_v57 = vpop.f32.mrf.mxu0  ;;  %6053 = vmatmul.mubr.f32.gmra.mxu1 %v5915_v62  ;;  %9704 = vmatprep.subr.mxu1 %v6312_v24 }
 0x506   : > { %v5918_v27 = vmul.f32 %v5840_v57, %v11821_v39  ;;  %9705 = vmatpush3.msra.mxu1 %v6312_v24 }
 0x507   : > { %v8338_v22 = vpop.f32.mrf.mxu1  ;;  %v5844_v9 = vpop.f32.mrf.mxu0  ;;  %9706 = vmatprep.subr.mxu1 %v6311_v11 }
 0x508   : > { %v12074_v29 = vadd.f32 %v8338_v22, %v8337_v40  ;;  %6057 = vmatprep.mubr.f32.mxu1 %v5918_v27  ;;  %9707 = vmatpush3.msra.mxu1 %v6311_v11  ;;  %v5919_v39 = vmul.f32 %v5844_v9, %v11827_v52 }
 0x509   : > { %v8340_v36 = vpop.f32.mrf.mxu1  ;;  %v5846_v28 = vpop.f32.mrf.mxu0  ;;  %6058 = vmatmul.mubr.f32.gmra.mxu1 %v5917_v42  ;;  %9788 = vmatprep.subr.mxu1 %v12071_v1 }
 0x50a   : > { %v5920_v34 = vmul.f32 %v5846_v28, %v11833_v23 }
 0x50b   : > { %v8341_v0 = vpop.f32.mrf.mxu1  ;;  %v5850_v19 = vpop.f32.mrf.mxu0 }
 0x50c   : > { %v12079_v21 = vadd.f32 %v8341_v0, %v8340_v36  ;;  %6062 = vmatprep.mubr.f32.mxu1 %v5920_v34  ;;  %v5921_v35 = vmul.f32 %v5850_v19, %v11839_v33 }
 0x50d   : > { %v8343_v12 = vpop.f32.mrf.mxu1  ;;  %v5852_v24 = vpop.f32.mrf.mxu0  ;;  %6063 = vmatmul.mubr.f32.gmra.mxu1 %v5919_v39 }
 0x50e   : > { %v5922_v62 = vmul.f32 %v5852_v24, %v11845_v17 }
 0x50f   : > { %v8344_v58 = vpop.f32.mrf.mxu1  ;;  %v5856_v11 = vpop.f32.mrf.mxu0 }
 0x510   : > { %v12083_v40 = vadd.f32 %v8344_v58, %v8343_v12  ;;  %6067 = vmatprep.mubr.f32.mxu1 %v5922_v62  ;;  %v5923_v27 = vmul.f32 %v5856_v11, %v11851_v30 }
 0x511   : > { %v8346_v23 = vpop.f32.mrf.mxu1  ;;  %v5858_v57 = vpop.f32.mrf.mxu0  ;;  %6068 = vmatmul.mubr.f32.gmra.mxu1 %v5921_v35 }
 0x512   : > { %v5924_v52 = vmul.f32 %v5858_v57, %v11857_v31 }
 0x513   : > { %v8347_v42 = vpop.f32.mrf.mxu1  ;;  %v5862_v22 = vpop.f32.mrf.mxu0 }
 0x514   : > { %v12087_v9 = vadd.f32 %v8347_v42, %v8346_v23  ;;  %6072 = vmatprep.mubr.f32.mxu1 %v5924_v52  ;;  %v5925_v28 = vmul.f32 %v5862_v22, %v11862_v4 }
 0x515   : > { %v8349_v17 = vpop.f32.mrf.mxu1  ;;  %v5864_v36 = vpop.f32.mrf.mxu0  ;;  %6073 = vmatmul.mubr.f32.gmra.mxu1 %v5923_v27 }
 0x516   : > { %v5926_v33 = vmul.f32 %v5864_v36, %v11869_v7 }
 0x517   : > { %v8350_v34 = vpop.f32.mrf.mxu1  ;;  %v5868_v39 = vpop.f32.mrf.mxu0 }
 0x518   : > { %v12091_v0 = vadd.f32 %v8350_v34, %v8349_v17  ;;  %6077 = vmatprep.mubr.f32.mxu1 %v5926_v33  ;;  %v5927_v12 = vmul.f32 %v5868_v39, %v11874_v10 }
 0x519   : > { %v8352_v31 = vpop.f32.mrf.mxu1  ;;  %v5870_v19 = vpop.f32.mrf.mxu0  ;;  %6078 = vmatmul.mubr.f32.gmra.mxu1 %v5925_v28 }
 0x51a   : > { %v5928_v30 = vmul.f32 %v5870_v19, %v11881_v43 }
 0x51b   : > { %v8353_v24 = vpop.f32.mrf.mxu1  ;;  %v5874_v62 = vpop.f32.mrf.mxu0 }
 0x51c   : > { %v12095_v35 = vadd.f32 %v8353_v24, %v8352_v31  ;;  %6082 = vmatprep.mubr.f32.mxu1 %v5928_v30  ;;  %v5929_v11 = vmul.f32 %v5874_v62, %v11885_v32 }
 0x51d   : > { %v8355_v7 = vpop.f32.mrf.mxu1  ;;  %v5876_v58 = vpop.f32.mrf.mxu0  ;;  %6083 = vmatmul.mubr.f32.gmra.mxu1 %v5927_v12 }
 0x51e   : > { %v5930_v4 = vmul.f32 %v5876_v58, %v11892_v5 }
 0x51f   : > { %v8356_v23 = vpop.f32.mrf.mxu1  ;;  %v5880_v57 = vpop.f32.mrf.mxu0 }
 0x520   : > { %v12099_v52 = vadd.f32 %v8356_v23, %v8355_v7  ;;  %6087 = vmatprep.mubr.f32.mxu1 %v5930_v4  ;;  %v5931_v42 = vmul.f32 %v5880_v57, %v11896_v49 }
 0x521   : > { %v8358_v43 = vpop.f32.mrf.mxu1  ;;  %v5882_v27 = vpop.f32.mrf.mxu0  ;;  %6088 = vmatmul.mubr.f32.gmra.mxu1 %v5929_v11 }
 0x522   : > { %v5932_v10 = vmul.f32 %v5882_v27, %v11903_v18 }
 0x523   : > { %v8359_v22 = vpop.f32.mrf.mxu1  ;;  %v5886_v17 = vpop.f32.mrf.mxu0 }
 0x524   : > { %v12103_v36 = vadd.f32 %v8359_v22, %v8358_v43  ;;  %6092 = vmatprep.mubr.f32.mxu1 %v5932_v10  ;;  %v5933_v28 = vmul.f32 %v5886_v17, %v11907_v46 }
 0x525   : > { %v8361_v5 = vpop.f32.mrf.mxu1  ;;  %v5888_v33 = vpop.f32.mrf.mxu0  ;;  %6093 = vmatmul.mubr.f32.gmra.mxu1 %v5931_v42 }
 0x526   : > { %v5934_v32 = vmul.f32 %v5888_v33, %v11914_v38 }
 0x527   : > { %v8362_v34 = vpop.f32.mrf.mxu1  ;;  %v5892_v39 = vpop.f32.mrf.mxu0 }
 0x528   : > { %v12107_v31 = vadd.f32 %v8362_v34, %v8361_v5  ;;  %6097 = vmatprep.mubr.f32.mxu1 %v5934_v32  ;;  %v5935_v30 = vmul.f32 %v5892_v39, %v11918_v16  ;;  %v6710_v39 = vld [vmem:[%s12593_s1 + $0x28] sm:$0xff] }
 0x529   : > { %v8364_v18 = vpop.f32.mrf.mxu1  ;;  %v5894_v19 = vpop.f32.mrf.mxu0  ;;  %6098 = vmatmul.mubr.f32.gmra.mxu1 %v5933_v28 }
 0x52a   : > { %v5936_v49 = vmul.f32 %v5894_v19, %v11925_v60 }
 0x52b   : > { %v8365_v12 = vpop.f32.mrf.mxu1  ;;  %v5898_v24 = vpop.f32.mrf.mxu0 }
 0x52c   : > { %v12111_v62 = vadd.f32 %v8365_v12, %v8364_v18  ;;  %6102 = vmatprep.mubr.f32.mxu1 %v5936_v49  ;;  %v5937_v58 = vmul.f32 %v5898_v24, %v11929_v55 }
 0x52d   : > { %v8367_v38 = vpop.f32.mrf.mxu1  ;;  %v5900_v7 = vpop.f32.mrf.mxu0  ;;  %6103 = vmatmul.mubr.f32.gmra.mxu1 %v5935_v30  ;;  %v6709_v30 = vld [vmem:[%s12593_s1 + $0x20] sm:$0xff] }
 0x52e   : > { %v5938_v46 = vmul.f32 %v5900_v7, %v11936_v6 }
 0x52f   : > { %v8368_v4 = vpop.f32.mrf.mxu1  ;;  %v5904_v11 = vpop.f32.mrf.mxu0 }
 0x530   : > { %v12115_v23 = vadd.f32 %v8368_v4, %v8367_v38  ;;  %6107 = vmatprep.mubr.f32.mxu1 %v5938_v46  ;;  %v5939_v43 = vmul.f32 %v5904_v11, %v11940_v2  ;;  %v6708_v38 = vld [vmem:[%s12593_s1 + $0x18] sm:$0xff] }
 0x531   : > { %v8370_v60 = vpop.f32.mrf.mxu1  ;;  %v5906_v57 = vpop.f32.mrf.mxu0  ;;  %6108 = vmatmul.mubr.f32.gmra.mxu1 %v5937_v58 }
 0x532   : > { %v5940_v16 = vmul.f32 %v5906_v57, %v11946_v41  ;;  %v6711_v41 = vld [vmem:[%s12593_s1 + $0x30] sm:$0xff] }
 0x533   : > { %v8371_v27 = vpop.f32.mrf.mxu1  ;;  %v9670_v10 = vpop.f32.mrf.mxu0 }
 0x534   : > { %v12119_v42 = vadd.f32 %v8371_v27, %v8370_v60  ;;  %6112 = vmatprep.mubr.f32.mxu1 %v5940_v16  ;;  %v6296_v17 = vmul.f32 %v9670_v10, %v11950_v53  ;;  %v6707_v60 = vld [vmem:[%s12593_s1 + $0x10] sm:$0xff] }
 0x535   : > { %6113 = vmatmul.mubr.f32.gmra.mxu1 %v5939_v43  ;;  %v6216_v55 = vpop.f32.mrf.mxu0 }
 0x536   : > { %v8373_v6 = vpop.f32.mrf.mxu1  ;;  %v6295_v22 = vmul.f32 %v6216_v55, %v11954_v26 }
 0x537   : > { %v9673_v5 = vpop.f32.mrf.mxu0 }
 0x538   : > { %v8374_v33 = vpop.f32.mrf.mxu1  ;;  %9708 = vmatprep.mubr.msk.f32.mxu1 %vm1832_vm1, %v6295_v22  ;;  %v6298_v18 = vmul.f32 %v9673_v5, %v11956_v13 }
 0x539   : > { %v12125_v2 = vadd.f32 %v8374_v33, %v8373_v6  ;;  %v6226_v32 = vpop.f32.mrf.mxu0  ;;  %9709 = vmatmul.mubr.msk.f32.vlgmr.msra.gmra.mxu1 %vm1832_vm1, %v6296_v17  ;;  %v6705_v17 = vld [vmem:[%s12593_s1] sm:$0xff] }
 0x53a   : > { %v8408_v28 = vpop.f32.mrf.mxu1  ;;  %v6297_v34 = vmul.f32 %v6226_v32, %v11958_v3  ;;  %9789 = vmatpush3.msra.mxu1 %v12071_v1 }
 0x53b   : > { %9790 = vmatprep.subr.mxu1 %v6711_v41 }
 0x53c   : > { %v8409_v19 = vpop.f32.mrf.mxu1  ;;  %v9676_v49 = vpop.f32.mrf.mxu0  ;;  %9711 = vmatprep.mubr.msk.f32.mxu1 %vm1832_vm1, %v6297_v34  ;;  %9791 = vmatpush3.msra.mxu1 %v6711_v41 }
 0x53d   : > { %v8410_v12 = vadd.f32 %v8409_v19, %v8408_v28  ;;  %9712 = vmatmul.mubr.msk.f32.gmra.mxu1 %vm1832_vm1, %v6298_v18  ;;  %9792 = vmatprep.subr.mxu1 %v6710_v39  ;;  %v6300_v58 = vmul.f32 %v9676_v49, %v11960_v54  ;;  %v4147_v28 = vld [vmem:[%s12594_s2 + $0x8] sm:$0xff] }
 0x53e   : > { %v6236_v24 = vpop.f32.mrf.mxu0  ;;  %9793 = vmatpush3.msra.mxu1 %v6710_v39 }
 0x53f   : > { %v8411_v7 = vpop.f32.mrf.mxu1  ;;  %v6299_v1 = vmul.f32 %v6236_v24, %v11962_v25  ;;  %9794 = vmatprep.subr.mxu1 %v6709_v30  ;;  %v12138_v46 = vmul.f32 %v8410_v12, %v12054_v51  ;;  %v6706_v51 = vld [vmem:[%s12593_s1 + $0x8] sm:$0xff]  ;;  %s12595_s1 = sld [smem:[#allocation23_spill]] }
 0x540   : > { %v9679_v4 = vpop.f32.mrf.mxu0  ;;  %9795 = vmatpush3.msra.mxu1 %v6709_v30 }
 0x541   : > { %v8412_v11 = vpop.f32.mrf.mxu1  ;;  %9714 = vmatprep.mubr.msk.f32.mxu1 %vm1832_vm1, %v6299_v1  ;;  %9796 = vmatprep.subr.mxu1 %v6708_v38  ;;  %v6302_v10 = vmul.f32 %v9679_v4, %v11964_v20 }
 0x542   : > { %v8413_v57 = vadd.f32 %v8412_v11, %v8411_v7  ;;  %v6246_v16 = vpop.f32.mrf.mxu0  ;;  %9715 = vmatmul.mubr.msk.f32.gmra.mxu1 %vm1832_vm1, %v6300_v58 }
 0x543   : > { %v8414_v43 = vpop.f32.mrf.mxu1  ;;  %v6301_v27 = vmul.f32 %v6246_v16, %v11966_v37  ;;  %9797 = vmatpush3.msra.mxu1 %v6708_v38 }
 0x544   : > { %v9682_v55 = vpop.f32.mrf.mxu0  ;;  %9798 = vmatprep.subr.mxu1 %v6707_v60  ;;  %v12148_v6 = vmul.f32 %v8413_v57, %v12060_v47 }
 0x545   : > { %v8415_v22 = vpop.f32.mrf.mxu1  ;;  %9717 = vmatprep.mubr.msk.f32.mxu1 %vm1832_vm1, %v6301_v27  ;;  %9799 = vmatpush3.msra.mxu1 %v6707_v60  ;;  %v6304_v34 = vmul.f32 %v9682_v55, %v11968_v45 }
 0x546   : > { %v8416_v5 = vadd.f32 %v8415_v22, %v8414_v43  ;;  %v6256_v33 = vpop.f32.mrf.mxu0  ;;  %9718 = vmatmul.mubr.msk.f32.gmra.mxu1 %vm1832_vm1, %v6302_v10  ;;  %9800 = vmatprep.subr.mxu1 %v6706_v51 }
 0x547   : > { %v8417_v41 = vpop.f32.mrf.mxu1  ;;  %v6303_v32 = vmul.f32 %v6256_v33, %v11970_v63  ;;  %9801 = vmatpush3.msra.mxu1 %v6706_v51 }
 0x548   : > { %v9685_v39 = vpop.f32.mrf.mxu0  ;;  %9802 = vmatprep.subr.mxu1 %v6705_v17  ;;  %v12157_v47 = vmul.f32 %v8416_v5, %v12066_v8 }
 0x549   : > { %v8418_v18 = vpop.f32.mrf.mxu1  ;;  %9720 = vmatprep.mubr.msk.f32.mxu1 %vm1832_vm1, %v6303_v32  ;;  %9803 = vmatpush3.msra.mxu1 %v6705_v17  ;;  %v6306_v24 = vmul.f32 %v9685_v39, %v11972_v48 }
 0x54a   : > { %v8419_v19 = vadd.f32 %v8418_v18, %v8417_v41  ;;  %v6266_v49 = vpop.f32.mrf.mxu0  ;;  %9721 = vmatmul.mubr.msk.f32.gmra.mxu1 %vm1832_vm1, %v6304_v34  ;;  %9856 = vmatprep.subr.mxu1 %v4147_v28 }
 0x54b   : > { %v8420_v30 = vpop.f32.mrf.mxu1  ;;  %v6305_v12 = vmul.f32 %v6266_v49, %v11974_v59 }
 0x54c   : > { %v9688_v38 = vpop.f32.mrf.mxu0  ;;  %v12164_v7 = vmul.f32 %v8419_v19, %v12074_v29 }
 0x54d   : > { %v8421_v8 = vpop.f32.mrf.mxu1  ;;  %9723 = vmatprep.mubr.msk.f32.mxu1 %vm1832_vm1, %v6305_v12  ;;  %v6308_v60 = vmul.f32 %v9688_v38, %v11976_v56 }
 0x54e   : > { %v8422_v1 = vadd.f32 %v8421_v8, %v8420_v30  ;;  %v6276_v58 = vpop.f32.mrf.mxu0  ;;  %9724 = vmatmul.mubr.msk.f32.gmra.mxu1 %vm1832_vm1, %v6306_v24 }
 0x54f   : > { %v8423_v4 = vpop.f32.mrf.mxu1  ;;  %v6307_v11 = vmul.f32 %v6276_v58, %v11978_v14 }
 0x550   : > { %v9691_v57 = vpop.f32.mrf.mxu0  ;;  %v12171_v16 = vmul.f32 %v8422_v1, %v12079_v21 }
 0x551   : > { %v8424_v43 = vpop.f32.mrf.mxu1  ;;  %9726 = vmatprep.mubr.msk.f32.mxu1 %vm1832_vm1, %v6307_v11  ;;  %v6310_v55 = vmul.f32 %v9691_v57, %v11980_v44 }
 0x552   : > { %v8425_v29 = vadd.f32 %v8424_v43, %v8423_v4  ;;  %v6286_v27 = vpop.f32.mrf.mxu0  ;;  %9727 = vmatmul.mubr.msk.f32.gmra.mxu1 %vm1832_vm1, %v6308_v60 }
 0x553   : > { %v8426_v51 = vpop.f32.mrf.mxu1  ;;  %v6309_v10 = vmul.f32 %v6286_v27, %v11982_v50 }
 0x554   : > { %v9766_v22 = vpop.f32.mrf.mxu0  ;;  %v12178_v17 = vmul.f32 %v8425_v29, %v12083_v40  ;;  %v4146_v40 = vld [vmem:[%s12594_s2] sm:$0xff] }
 0x555   : > { %v8427_v5 = vpop.f32.mrf.mxu1  ;;  %9729 = vmatprep.mubr.msk.f32.mxu1 %vm1832_vm1, %v6309_v10  ;;  %v6690_v34 = vmul.f32 %v9766_v22, %v11950_v53 }
 0x556   : > { %v8428_v21 = vadd.f32 %v8427_v5, %v8426_v51  ;;  %9730 = vmatmul.mubr.msk.f32.gmra.mxu1 %vm1832_vm1, %v6310_v55  ;;  %v6610_v33 = vpop.f32.mrf.mxu0 }
 0x557   : > { %v8429_v41 = vpop.f32.mrf.mxu1  ;;  %v6689_v32 = vmul.f32 %v6610_v33, %v11954_v26 }
 0x558   : > { %v9769_v39 = vpop.f32.mrf.mxu0  ;;  %v12185_v18 = vmul.f32 %v8428_v21, %v12087_v9 }
 0x559   : > { %v8430_v19 = vpop.f32.mrf.mxu1  ;;  %9804 = vmatprep.mubr.msk.f32.mxu1 %vm1832_vm1, %v6689_v32  ;;  %v6692_v26 = vmul.f32 %v9769_v39, %v11956_v13 }
 0x55a   : > { %v8431_v49 = vadd.f32 %v8430_v19, %v8429_v41  ;;  %v6620_v30 = vpop.f32.mrf.mxu0  ;;  %9805 = vmatmul.mubr.msk.f32.vlgmr.msra.gmra.mxu1 %vm1832_vm1, %v6690_v34 }
 0x55b   : > { %v8432_v12 = vpop.f32.mrf.mxu1  ;;  %v6691_v24 = vmul.f32 %v6620_v30, %v11958_v3  ;;  %9857 = vmatpush3.msra.mxu1 %v4147_v28 }
 0x55c   : > { %v9772_v38 = vpop.f32.mrf.mxu0  ;;  %9858 = vmatprep.subr.mxu1 %v4146_v40  ;;  %v12193_v53 = vmul.f32 %v8431_v49, %v12091_v0 }
 0x55d   : > { %v8433_v9 = vpop.f32.mrf.mxu1  ;;  %9807 = vmatprep.mubr.msk.f32.mxu1 %vm1832_vm1, %v6691_v24  ;;  %9859 = vmatpush3.msra.mxu1 %v4146_v40  ;;  %v6694_v3 = vmul.f32 %v9772_v38, %v11960_v54 }
 0x55e   : > { %v8434_v8 = vadd.f32 %v8433_v9, %v8432_v12  ;;  %v6630_v1 = vpop.f32.mrf.mxu0  ;;  %9808 = vmatmul.mubr.msk.f32.gmra.mxu1 %vm1832_vm1, %v6692_v26 }
 0x55f   : > { %v8435_v58 = vpop.f32.mrf.mxu1  ;;  %v6693_v4 = vmul.f32 %v6630_v1, %v11962_v25 }
 0x560   : > { %v9775_v28 = vpop.f32.mrf.mxu0  ;;  %v12200_v13 = vmul.f32 %v8434_v8, %v12095_v35 }
 0x561   : > { %v8436_v11 = vpop.f32.mrf.mxu1  ;;  %9810 = vmatprep.mubr.msk.f32.mxu1 %vm1832_vm1, %v6693_v4  ;;  %v6696_v29 = vmul.f32 %v9775_v28, %v11964_v20  ;;  %v6923_v4 = vld [vmem:[%s12595_s1 + $0x8] sm:$0xff]  ;;  %v12602_v28 = vld [vmem:[#allocation34_spill] sm:$0xff] }
 0x562   : > { %v8437_v0 = vadd.f32 %v8436_v11, %v8435_v58  ;;  %v6640_v60 = vpop.f32.mrf.mxu0  ;;  %9811 = vmatmul.mubr.msk.f32.gmra.mxu1 %vm1832_vm1, %v6694_v3  ;;  %v12597_v58 = vld [vmem:[#allocation31_spill] sm:$0xff]  ;;  %v12598_v3 = vld [vmem:[#allocation33_spill] sm:$0xff]  ;;  %9828 = vmatprep.subr.mxu0 %v6923_v4 }
 0x563   : > { %v8438_v57 = vpop.f32.mrf.mxu1  ;;  %v6695_v43 = vmul.f32 %v6640_v60, %v11966_v37  ;;  %9829 = vmatpush3.msra.mxu0 %v6923_v4  ;;  %v12604_v11 = vld [vmem:[#allocation37_spill] sm:$0xff]  ;;  %v12606_v60 = vld [vmem:[#allocation27_spill] sm:$0xff] }
 0x564   : > { %v9778_v27 = vpop.f32.mrf.mxu0  ;;  %v12207_v25 = vmul.f32 %v8437_v0, %v12099_v52  ;;  %v12605_v0 = vld [vmem:[#allocation26_spill] sm:$0xff] }
 0x565   : > { %v8439_v54 = vpop.f32.mrf.mxu1  ;;  %9813 = vmatprep.mubr.msk.f32.mxu1 %vm1832_vm1, %v6695_v43  ;;  %v6698_v22 = vmul.f32 %v9778_v27, %v11968_v45  ;;  %v12607_v43 = vld [vmem:[#allocation36_spill] sm:$0xff]  ;;  %v12609_v27 = vld [vmem:[#allocation39_spill] sm:$0xff] }
 0x566   : > { %v8440_v35 = vadd.f32 %v8439_v54, %v8438_v57  ;;  %v6650_v51 = vpop.f32.mrf.mxu0  ;;  %9814 = vmatmul.mubr.msk.f32.gmra.mxu1 %vm1832_vm1, %v6696_v29  ;;  %v6922_v57 = vld [vmem:[%s12595_s1] sm:$0xff]  ;;  %v12608_v29 = vld [vmem:[#allocation38_spill] sm:$0xff]  ;;  %s12610_s1 = sshll.u32 %s12612_s0, 3 }
 0x567   : > { %v8441_v10 = vpop.f32.mrf.mxu1  ;;  %v6697_v55 = vmul.f32 %v6650_v51, %v11970_v63  ;;  %9830 = vmatprep.subr.mxu0 %v6922_v57  ;;  %s12423_s2 = scalar_lea.vmem %s10212_s30, %s12610_s1 }
 0x568   : > { %v9781_v5 = vpop.f32.mrf.mxu0  ;;  %v12214_v37 = vmul.f32 %v8440_v35, %v12103_v36  ;;  %9831 = vmatpush3.msra.mxu0 %v6922_v57 }
 0x569   : > { %v8442_v20 = vpop.f32.mrf.mxu1  ;;  %9816 = vmatprep.mubr.msk.f32.mxu1 %vm1832_vm1, %v6697_v55  ;;  %v6700_v32 = vmul.f32 %v9781_v5, %v11972_v48 }
 0x56a   : > { %v8443_v52 = vadd.f32 %v8442_v20, %v8441_v10  ;;  %v6660_v21 = vpop.f32.mrf.mxu0  ;;  %9817 = vmatmul.mubr.msk.f32.gmra.mxu1 %vm1832_vm1, %v6698_v22 }
 0x56b   : > { %v8444_v33 = vpop.f32.mrf.mxu1  ;;  %v6699_v41 = vmul.f32 %v6660_v21, %v11974_v59 }
 0x56c   : > { %v9784_v34 = vpop.f32.mrf.mxu0  ;;  %v12221_v63 = vmul.f32 %v8443_v52, %v12107_v31 }
 0x56d   : > { %v8445_v45 = vpop.f32.mrf.mxu1  ;;  %9819 = vmatprep.mubr.msk.f32.mxu1 %vm1832_vm1, %v6699_v41  ;;  %v6702_v49 = vmul.f32 %v9784_v34, %v11976_v56 }
 0x56e   : > { %v8446_v36 = vadd.f32 %v8445_v45, %v8444_v33  ;;  %v6670_v39 = vpop.f32.mrf.mxu0  ;;  %9820 = vmatmul.mubr.msk.f32.gmra.mxu1 %vm1832_vm1, %v6700_v32 }
 0x56f   : > { %v8447_v19 = vpop.f32.mrf.mxu1  ;;  %v6701_v40 = vmul.f32 %v6670_v39, %v11978_v14 }
 0x570   : > { %v9787_v30 = vpop.f32.mrf.mxu0  ;;  %v12228_v59 = vmul.f32 %v8446_v36, %v12111_v62 }
 0x571   : > { %v8448_v48 = vpop.f32.mrf.mxu1  ;;  %9822 = vmatprep.mubr.msk.f32.mxu1 %vm1832_vm1, %v6701_v40  ;;  %v6704_v38 = vmul.f32 %v9787_v30, %v11980_v44  ;;  %v12596_v44 = vld [vmem:[#allocation30_spill] sm:$0xff] }
 0x572   : > { %v8449_v31 = vadd.f32 %v8448_v48, %v8447_v19  ;;  %v6680_v12 = vpop.f32.mrf.mxu0  ;;  %9823 = vmatmul.mubr.msk.f32.gmra.mxu1 %vm1832_vm1, %v6702_v49 }
 0x573   : > { %v8450_v24 = vpop.f32.mrf.mxu1  ;;  %v6703_v26 = vmul.f32 %v6680_v12, %v11982_v50 }
 0x574   : > { %v5158_v56 = vmul.f32 %v8449_v31, %v12115_v23 }
 0x575   : > { %v8451_v14 = vpop.f32.mrf.mxu1  ;;  %9825 = vmatprep.mubr.msk.f32.mxu1 %vm1832_vm1, %v6703_v26 }
 0x576   : > { %v8452_v62 = vadd.f32 %v8451_v14, %v8450_v24  ;;  %9826 = vmatmul.mubr.msk.f32.gmra.mxu1 %vm1832_vm1, %v6704_v38 }
 0x577   : > { %v8453_v9 = vpop.f32.mrf.mxu1  ;;  %9860 = vmatprep.mubr.msk.f32.mxu1 %vm6924_vm3, %v11448_v61  ;;  %v12599_v61 = vld [vmem:[#allocation24_spill] sm:$0xff] }
 0x578   : > { %v5159_v8 = vmul.f32 %v8452_v62, %v12119_v42  ;;  %v12600_v42 = vld [vmem:[#allocation25_spill] sm:$0xff] }
 0x579   : > { %v8454_v1 = vpop.f32.mrf.mxu1 }
 0x57a   : > { %v8455_v50 = vadd.f32 %v8454_v1, %v8453_v9  ;;  %9861 = vmatmul.mubr.msk.f32.vlgmr.msra.gmra.mxu1 %vm6924_vm3, %v11440_v15  ;;  %v12601_v15 = vld [vmem:[#allocation32_spill] sm:$0xff] }
 0x57b   : > { %9863 = vmatprep.mubr.msk.f32.mxu1 %vm6924_vm3, %v12596_v44 }
 0x57c   : > { %v5160_v23 = vmul.f32 %v8455_v50, %v12125_v2  ;;  %v12603_v2 = vld [vmem:[#allocation35_spill] sm:$0xff] }
 0x57e   : > { %9864 = vmatmul.mubr.msk.f32.gmra.mxu1 %vm6924_vm3, %v12597_v58 }
 0x57f   : > { %9866 = vmatprep.mubr.msk.f32.mxu1 %vm6924_vm3, %v12598_v3 }
 0x582   : > { %9867 = vmatmul.mubr.msk.f32.gmra.mxu1 %vm6924_vm3, %v12599_v61 }
 0x583   : > { %9869 = vmatprep.mubr.msk.f32.mxu1 %vm6924_vm3, %v12600_v42 }
 0x586   : > { %9870 = vmatmul.mubr.msk.f32.gmra.mxu1 %vm6924_vm3, %v12601_v15 }
 0x587   : > { %9872 = vmatprep.mubr.msk.f32.mxu1 %vm6924_vm3, %v12602_v28 }
 0x58a   : > { %9873 = vmatmul.mubr.msk.f32.gmra.mxu1 %vm6924_vm3, %v12603_v2 }
 0x58b   : > { %9875 = vmatprep.mubr.msk.f32.mxu1 %vm6924_vm3, %v12604_v11 }
 0x58e   : > { %9876 = vmatmul.mubr.msk.f32.gmra.mxu1 %vm6924_vm3, %v12605_v0 }
 0x58f   : > { %9878 = vmatprep.mubr.msk.f32.mxu1 %vm6924_vm3, %v12606_v60 }
 0x592   : > { %9879 = vmatmul.mubr.msk.f32.gmra.mxu1 %vm6924_vm3, %v12607_v43 }
 0x593   : > { %9881 = vmatprep.mubr.msk.f32.mxu1 %vm6924_vm3, %v12608_v29 }
 0x596   : > { %9882 = vmatmul.mubr.msk.f32.gmra.mxu1 %vm6924_vm3, %v12609_v27  ;;  %v12307_v27 = vld [vmem:[%s10202_s27 + $0x28] sm:$0xff] }
 0x597   : > { %9884 = vmatprep.subr.mxu0 %v12307_v27 }
 0x599   : > { %v9614_v54 = vpop.f32.mrf.mxu1 }
 0x59a   : > { %v5701_v35 = vmul.f32 %v9614_v54, %v12148_v6 }
 0x59b   : > { %v5621_v51 = vpop.f32.mrf.mxu1 }
 0x59c   : > { %v5700_v10 = vmul.f32 %v5621_v51, %v12138_v46 }
 0x59d   : > { %v9617_v55 = vpop.f32.mrf.mxu1 }
 0x59e   : > { %v5703_v22 = vmul.f32 %v9617_v55, %v12164_v7 }
 0x59f   : > { %v5631_v5 = vpop.f32.mrf.mxu1 }
 0x5a0   : > { %v5702_v20 = vmul.f32 %v5631_v5, %v12157_v47 }
 0x5a1   : > { %v9620_v52 = vpop.f32.mrf.mxu1 }
 0x5a2   : > { %v5705_v21 = vmul.f32 %v9620_v52, %v12178_v17 }
 0x5a3   : > { %v5641_v33 = vpop.f32.mrf.mxu1 }
 0x5a4   : > { %v5704_v41 = vmul.f32 %v5641_v33, %v12171_v16 }
 0x5a5   : > { %v9623_v32 = vpop.f32.mrf.mxu1 }
 0x5a6   : > { %v5707_v34 = vmul.f32 %v9623_v32, %v12193_v53 }
 0x5a7   : > { %v5651_v45 = vpop.f32.mrf.mxu1 }
 0x5a8   : > { %v5706_v6 = vmul.f32 %v5651_v45, %v12185_v18 }
 0x5a9   : > { %v9626_v36 = vpop.f32.mrf.mxu1 }
 0x5aa   : > { %v5709_v46 = vmul.f32 %v9626_v36, %v12207_v25 }
 0x5ab   : > { %v5661_v39 = vpop.f32.mrf.mxu1 }
 0x5ac   : > { %v5708_v7 = vmul.f32 %v5661_v39, %v12200_v13 }
 0x5ad   : > { %v9629_v19 = vpop.f32.mrf.mxu1 }
 0x5ae   : > { %v5711_v47 = vmul.f32 %v9629_v19, %v12221_v63 }
 0x5af   : > { %v5671_v40 = vpop.f32.mrf.mxu1 }
 0x5b0   : > { %v5710_v17 = vmul.f32 %v5671_v40, %v12214_v37 }
 0x5b1   : > { %v9632_v49 = vpop.f32.mrf.mxu1 }
 0x5b2   : > { %v12285_v16 = vmul.f32 %v9632_v49, %v5158_v56 }
 0x5b3   : > { %v5681_v30 = vpop.f32.mrf.mxu1 }
 0x5b4   : > { %v5712_v53 = vmul.f32 %v5681_v30, %v12228_v59 }
 0x5b5   : > { %v9635_v48 = vpop.f32.mrf.mxu1 }
 0x5b6   : > { %v12288_v18 = vmul.f32 %v9635_v48, %v5160_v23 }
 0x5b7   : > { %v5691_v31 = vpop.f32.mrf.mxu1 }
 0x5b8   : > { %v12290_v25 = vmul.f32 %v5691_v31, %v5159_v8 }
 0x5b9   : > { %v8576_v12 = vpop.f32.mrf.mxu1 }
 0x5bb   : > { %v8577_v13 = vpop.f32.mrf.mxu1 }
 0x5bc   : > { %v8578_v24 = vadd.f32 %v8577_v13, %v8576_v12 }
 0x5bd   : > { %v8579_v26 = vpop.f32.mrf.mxu1 }
 0x5be   : > { %v12292_v63 = vmul.f32 %v8578_v24, %v5700_v10 }
 0x5bf   : > { %v8580_v38 = vpop.f32.mrf.mxu1 }
 0x5c0   : > { %v8581_v37 = vadd.f32 %v8580_v38, %v8579_v26 }
 0x5c1   : > { %v8582_v14 = vpop.f32.mrf.mxu1 }
 0x5c2   : > { %v12294_v56 = vmul.f32 %v8581_v37, %v5701_v35 }
 0x5c3   : > { %v8583_v62 = vpop.f32.mrf.mxu1 }
 0x5c4   : > { %v8584_v9 = vadd.f32 %v8583_v62, %v8582_v14 }
 0x5c5   : > { %v8585_v59 = vpop.f32.mrf.mxu1 }
 0x5c6   : > { %v12296_v1 = vmul.f32 %v8584_v9, %v5702_v20 }
 0x5c7   : > { %v8586_v50 = vpop.f32.mrf.mxu1 }
 0x5c8   : > { %v8587_v44 = vadd.f32 %v8586_v50, %v8585_v59 }
 0x5c9   : > { %v8588_v8 = vpop.f32.mrf.mxu1 }
 0x5ca   : > { %v12298_v23 = vmul.f32 %v8587_v44, %v5703_v22 }
 0x5cb   : > { %v8589_v58 = vpop.f32.mrf.mxu1 }
 0x5cc   : > { %v8590_v4 = vadd.f32 %v8589_v58, %v8588_v8 }
 0x5cd   : > { %v8591_v3 = vpop.f32.mrf.mxu1 }
 0x5ce   : > { %v12300_v61 = vmul.f32 %v8590_v4, %v5704_v41 }
 0x5cf   : > { %v8592_v42 = vpop.f32.mrf.mxu1 }
 0x5d0   : > { %v8593_v15 = vadd.f32 %v8592_v42, %v8591_v3 }
 0x5d1   : > { %v8594_v28 = vpop.f32.mrf.mxu1 }
 0x5d2   : > { %v12302_v2 = vmul.f32 %v8593_v15, %v5705_v21 }
 0x5d3   : > { %v8595_v11 = vpop.f32.mrf.mxu1 }
 0x5d4   : > { %v8596_v0 = vadd.f32 %v8595_v11, %v8594_v28 }
 0x5d5   : > { %v8597_v60 = vpop.f32.mrf.mxu1 }
 0x5d6   : > { %v12304_v57 = vmul.f32 %v8596_v0, %v5706_v6 }
 0x5d7   : > { %v8598_v43 = vpop.f32.mrf.mxu1 }
 0x5d8   : > { %v8599_v29 = vadd.f32 %v8598_v43, %v8597_v60 }
 0x5d9   : > { %v8600_v54 = vpop.f32.mrf.mxu1 }
 0x5da   : > { %v12310_v35 = vmul.f32 %v8599_v29, %v5707_v34 }
 0x5db   : > { %v8601_v51 = vpop.f32.mrf.mxu1 }
 0x5dc   : > { %v8602_v10 = vadd.f32 %v8601_v51, %v8600_v54  ;;  %v7354_v54 = vld [vmem:[%s10202_s27 + $0x20] sm:$0xff] }
 0x5dd   : > { %v8603_v55 = vpop.f32.mrf.mxu1 }
 0x5de   : > { %v12312_v22 = vmul.f32 %v8602_v10, %v5708_v7 }
 0x5df   : > { %v8604_v5 = vpop.f32.mrf.mxu1 }
 0x5e0   : > { %v8605_v20 = vadd.f32 %v8604_v5, %v8603_v55 }
 0x5e1   : > { %v8606_v52 = vpop.f32.mrf.mxu1 }
 0x5e2   : > { %v12314_v21 = vmul.f32 %v8605_v20, %v5709_v46 }
 0x5e3   : > { %v8607_v33 = vpop.f32.mrf.mxu1 }
 0x5e4   : > { %v8608_v41 = vadd.f32 %v8607_v33, %v8606_v52 }
 0x5e5   : > { %v8609_v32 = vpop.f32.mrf.mxu1 }
 0x5e6   : > { %v12316_v45 = vmul.f32 %v8608_v41, %v5710_v17  ;;  %v7351_v41 = vld [vmem:[%s10202_s27 + $0x8] sm:$0xff] }
 0x5e7   : > { %v8610_v6 = vpop.f32.mrf.mxu1 }
 0x5e8   : > { %v8611_v36 = vadd.f32 %v8610_v6, %v8609_v32 }
 0x5e9   : > { %v8612_v39 = vpop.f32.mrf.mxu1 }
 0x5ea   : > { %v12318_v34 = vmul.f32 %v8611_v36, %v5711_v47 }
 0x5eb   : > { %v8613_v19 = vpop.f32.mrf.mxu1 }
 0x5ec   : > { %v8614_v40 = vadd.f32 %v8613_v19, %v8612_v39 }
 0x5ed   : > { %v8615_v49 = vpop.f32.mrf.mxu1 }
 0x5ee   : > { %v12320_v7 = vmul.f32 %v8614_v40, %v5712_v53 }
 0x5ef   : > { %v8616_v30 = vpop.f32.mrf.mxu1 }
 0x5f0   : > { %v8617_v48 = vadd.f32 %v8616_v30, %v8615_v49 }
 0x5f1   : > { %v8618_v31 = vpop.f32.mrf.mxu1 }
 0x5f2   : > { %v12323_v46 = vmul.f32 %v8617_v48, %v12285_v16 }
 0x5f3   : > { %v8619_v12 = vpop.f32.mrf.mxu1 }
 0x5f4   : > { %v8620_v13 = vadd.f32 %v8619_v12, %v8618_v31 }
 0x5f5   : > { %v12325_v17 = vpop.f32.mrf.mxu1 }
 0x5f6   : > { %v12328_v24 = vmul.f32 %v8620_v13, %v12290_v25 }
 0x5f7   : > { %v12330_v47 = vpop.f32.mrf.mxu1 }
 0x5f9   : > { %v9710_v26 = vpop.f32.mrf.mxu1 }
 0x5fa   : > { %v6513_v28 = vmul.f32 %v9710_v26, %v12294_v56  ;;  %v8623_v26 = vadd.f32 %v12330_v47, %v12325_v17 }
 0x5fb   : > { %v6433_v38 = vpop.f32.mrf.mxu1 }
 0x5fc   : > { %v6512_v15 = vmul.f32 %v6433_v38, %v12292_v63  ;;  %v7353_v63 = vld [vmem:[%s10202_s27 + $0x18] sm:$0xff] }
 0x5fd   : > { %v9713_v37 = vpop.f32.mrf.mxu1 }
 0x5fe   : > { %v6515_v51 = vmul.f32 %v9713_v37, %v12298_v23 }
 0x5ff   : > { %v6443_v53 = vpop.f32.mrf.mxu1 }
 0x600   : > { %v6514_v29 = vmul.f32 %v6443_v53, %v12296_v1  ;;  %v7352_v1 = vld [vmem:[%s10202_s27 + $0x10] sm:$0xff] }
 0x602   : > { %v9716_v14 = vpop.f32.mrf.mxu1 }
 0x603   : > { %v6517_v52 = vmul.f32 %v9716_v14, %v12302_v2  ;;  %v6133_v14 = vmul.f32 %v8623_v26, %v12288_v18  ;;  %v7350_v18 = vld [vmem:[%s10202_s27] sm:$0xff] }
 0x604   : > { %v6453_v62 = vpop.f32.mrf.mxu1 }
 0x605   : > { %v6516_v20 = vmul.f32 %v6453_v62, %v12300_v61 }
 0x606   : > { %v9719_v9 = vpop.f32.mrf.mxu1 }
 0x607   : > { %v6519_v61 = vmul.f32 %v9719_v9, %v12310_v35 }
 0x608   : > { %v6463_v59 = vpop.f32.mrf.mxu1 }
 0x609   : > { %v6518_v6 = vmul.f32 %v6463_v59, %v12304_v57 }
 0x60a   : > { %v9722_v50 = vpop.f32.mrf.mxu1 }
 0x60b   : > { %v6521_v49 = vmul.f32 %v9722_v50, %v12314_v21 }
 0x60c   : > { %v6473_v16 = vpop.f32.mrf.mxu1 }
 0x60d   : > { %v6520_v40 = vmul.f32 %v6473_v16, %v12312_v22 }
 0x60e   : > { %v9725_v44 = vpop.f32.mrf.mxu1 }
 0x60f   : > { %v6523_v12 = vmul.f32 %v9725_v44, %v12318_v34 }
 0x610   : > { %v6483_v8 = vpop.f32.mrf.mxu1 }
 0x611   : > { %v6522_v31 = vmul.f32 %v6483_v8, %v12316_v45 }
 0x612   : > { %v12332_v58 = vpop.f32.mrf.mxu1 }
 0x613   : > { %v6525_v45 = vmul.f32 %v12332_v58, %v12323_v46 }
 0x614   : > { %v12334_v4 = vpop.f32.mrf.mxu1 }
 0x615   : > { %v6524_v37 = vmul.f32 %v12334_v4, %v12320_v7 }
 0x616   : > { %v12336_v25 = vpop.f32.mrf.mxu1 }
 0x617   : > { %v6527_v7 = vmul.f32 %v12336_v25, %v6133_v14 }
 0x618   : > { %v12338_v3 = vpop.f32.mrf.mxu1 }
 0x619   : > { %v6526_v17 = vmul.f32 %v12338_v3, %v12328_v24 }
 0x61a   : > { %v9806_v42 = vpop.f32.mrf.mxu1 }
 0x61b   : > { %v6907_v60 = vmul.f32 %v9806_v42, %v6513_v28 }
 0x61c   : > { %v6827_v11 = vpop.f32.mrf.mxu1 }
 0x61d   : > { %v6906_v0 = vmul.f32 %v6827_v11, %v6512_v15  ;;  %v12385_v15 = vld [vmem:[%s10197_s20] ss:$0 sm:$0xff] }
 0x61e   : > { %v9809_v43 = vpop.f32.mrf.mxu1 }
 0x61f   : > { %9832 = vmatprep.mubr.msk.f32.mxu0 %vm6924_vm3, %v6906_v0  ;;  %v6909_v56 = vmul.f32 %v9809_v43, %v6515_v51 }
 0x620   : > { %v6837_v10 = vpop.f32.mrf.mxu1  ;;  %9833 = vmatmul.mubr.msk.f32.vlgmr.msra.gmra.mxu0 %vm6924_vm3, %v6907_v60 }
 0x621   : > { %v6908_v55 = vmul.f32 %v6837_v10, %v6514_v29  ;;  %9885 = vmatpush3.msra.mxu0 %v12307_v27 }
 0x622   : > { %v9812_v5 = vpop.f32.mrf.mxu1  ;;  %9886 = vmatprep.subr.mxu0 %v7354_v54 }
 0x623   : > { %9835 = vmatprep.mubr.msk.f32.mxu0 %vm6924_vm3, %v6908_v55  ;;  %9887 = vmatpush3.msra.mxu0 %v7354_v54  ;;  %v6911_v27 = vmul.f32 %v9812_v5, %v6517_v52 }
 0x624   : > { %v6847_v23 = vpop.f32.mrf.mxu1  ;;  %9836 = vmatmul.mubr.msk.f32.gmra.mxu0 %vm6924_vm3, %v6909_v56  ;;  %9888 = vmatprep.subr.mxu0 %v7353_v63 }
 0x625   : > { %v6910_v33 = vmul.f32 %v6847_v23, %v6516_v20  ;;  %9889 = vmatpush3.msra.mxu0 %v7353_v63 }
 0x626   : > { %v9815_v32 = vpop.f32.mrf.mxu1  ;;  %9890 = vmatprep.subr.mxu0 %v7352_v1 }
 0x627   : > { %9838 = vmatprep.mubr.msk.f32.mxu0 %vm6924_vm3, %v6910_v33  ;;  %9891 = vmatpush3.msra.mxu0 %v7352_v1  ;;  %v6913_v39 = vmul.f32 %v9815_v32, %v6519_v61 }
 0x628   : > { %v6857_v36 = vpop.f32.mrf.mxu1  ;;  %9839 = vmatmul.mubr.msk.f32.gmra.mxu0 %vm6924_vm3, %v6911_v27  ;;  %9892 = vmatprep.subr.mxu0 %v7351_v41 }
 0x629   : > { %v6912_v2 = vmul.f32 %v6857_v36, %v6518_v6  ;;  %9893 = vmatpush3.msra.mxu0 %v7351_v41 }
 0x62a   : > { %v9818_v19 = vpop.f32.mrf.mxu1  ;;  %9894 = vmatprep.subr.mxu0 %v7350_v18 }
 0x62b   : > { %9841 = vmatprep.mubr.msk.f32.mxu0 %vm6924_vm3, %v6912_v2  ;;  %v6915_v48 = vmul.f32 %v9818_v19, %v6521_v49  ;;  %9895 = vmatpush3.msra.mxu0 %v7350_v18 }
 0x62c   : > { %v6867_v57 = vpop.f32.mrf.mxu1  ;;  %9842 = vmatmul.mubr.msk.f32.gmra.mxu0 %vm6924_vm3, %v6913_v39 }
 0x62d   : > { %v6914_v30 = vmul.f32 %v6867_v57, %v6520_v40 }
 0x62e   : > { %v9821_v35 = vpop.f32.mrf.mxu1 }
 0x62f   : > { %9844 = vmatprep.mubr.msk.f32.mxu0 %vm6924_vm3, %v6914_v30  ;;  %v6917_v21 = vmul.f32 %v9821_v35, %v6523_v12 }
 0x630   : > { %v6877_v13 = vpop.f32.mrf.mxu1  ;;  %9845 = vmatmul.mubr.msk.f32.gmra.mxu0 %vm6924_vm3, %v6915_v48 }
 0x631   : > { %v6916_v22 = vmul.f32 %v6877_v13, %v6522_v31 }
 0x632   : > { %v9824_v38 = vpop.f32.mrf.mxu1 }
 0x633   : > { %9847 = vmatprep.mubr.msk.f32.mxu0 %vm6924_vm3, %v6916_v22  ;;  %v6919_v62 = vmul.f32 %v9824_v38, %v6525_v45 }
 0x634   : > { %v6887_v53 = vpop.f32.mrf.mxu1  ;;  %9848 = vmatmul.mubr.msk.f32.gmra.mxu0 %vm6924_vm3, %v6917_v21 }
 0x635   : > { %v6918_v34 = vmul.f32 %v6887_v53, %v6524_v37 }
 0x636   : > { %v9827_v9 = vpop.f32.mrf.mxu1 }
 0x637   : > { %9850 = vmatprep.mubr.msk.f32.mxu0 %vm6924_vm3, %v6918_v34  ;;  %v6921_v59 = vmul.f32 %v9827_v9, %v6527_v7 }
 0x638   : > { %v6897_v47 = vpop.f32.mrf.mxu1  ;;  %9851 = vmatmul.mubr.msk.f32.gmra.mxu0 %vm6924_vm3, %v6919_v62 }
 0x639   : > { %v6920_v46 = vmul.f32 %v6897_v47, %v6526_v17 }
 0x63a   : > { %v9862_v50 = vpop.f32.mrf.mxu1 }
 0x63b   : > { %9853 = vmatprep.mubr.msk.f32.mxu0 %vm6924_vm3, %v6920_v46 }
 0x63c   : > { %9854 = vmatmul.mubr.msk.f32.gmra.mxu0 %vm6924_vm3, %v6921_v59  ;;  %v7232_v16 = vpop.f32.mrf.mxu1 }
 0x63e   : > { %v9865_v24 = vpop.f32.mrf.mxu1 }
 0x640   : > { %v7242_v44 = vpop.f32.mrf.mxu1 }
 0x642   : > { %v9868_v8 = vpop.f32.mrf.mxu1 }
 0x644   : > { %v7252_v58 = vpop.f32.mrf.mxu1 }
 0x646   : > { %v9871_v4 = vpop.f32.mrf.mxu1 }
 0x648   : > { %v7262_v25 = vpop.f32.mrf.mxu1 }
 0x64a   : > { %v9874_v28 = vpop.f32.mrf.mxu1 }
 0x64c   : > { %v7272_v51 = vpop.f32.mrf.mxu1 }
 0x64e   : > { %v9877_v23 = vpop.f32.mrf.mxu1 }
 0x650   : > { %v7282_v39 = vpop.f32.mrf.mxu1 }
 0x652   : > { %v9880_v12 = vpop.f32.mrf.mxu1 }
 0x654   : > { %v7292_v34 = vpop.f32.mrf.mxu1 }
 0x656   : > { %v9883_v18 = vpop.f32.mrf.mxu1 }
 0x6e0   : > { %v9834_v3 = vpop.f32.mrf.mxu0 }
 0x6e1   : > { %v7238_v42 = vadd.f32 %v9862_v50, %v9834_v3  ;;  %v7302_v3 = vpop.f32.mrf.mxu1 }
 0x6e2   : > { %v7039_v11 = vpop.f32.mrf.mxu0 }
 0x6e3   : > { %v7233_v0 = vadd.f32 %v7232_v16, %v7039_v11  ;;  %v7319_v60 = vadd.f32 %v12385_v15, %v7238_v42 }
 0x6e4   : > { %v9837_v43 = vpop.f32.mrf.mxu0 }
 0x6e5   : > { %v7318_v29 = vadd.f32 %v12385_v15, %v7233_v0  ;;  %v7248_v54 = vadd.f32 %v9865_v24, %v9837_v43  ;;  %v7335_v56 = vmax.f32 %v7319_v60, 0.0 }
 0x6e6   : > { %v7049_v10 = vpop.f32.mrf.mxu0 }
 0x6e7   : > { %v7334_v55 = vmax.f32 %v7318_v29, 0.0  ;;  %v7243_v63 = vadd.f32 %v7242_v44, %v7049_v10  ;;  %v7321_v5 = vadd.f32 %v12385_v15, %v7248_v54 }
 0x6e8   : > { %v9840_v20 = vpop.f32.mrf.mxu0 }
 0x6e9   : > { %v7320_v1 = vadd.f32 %v12385_v15, %v7243_v63  ;;  %v7258_v52 = vadd.f32 %v9868_v8, %v9840_v20  ;;  %9896 = vmatprep.mubr.msk.f32.mxu0 %vm7363_vm4, %v7334_v55  ;;  %v7337_v32 = vmax.f32 %v7321_v5, 0.0 }
 0x6ea   : > { %v7059_v33 = vpop.f32.mrf.mxu0  ;;  %9897 = vmatmul.mubr.msk.f32.vlgmr.msra.gmra.mxu0 %vm7363_vm4, %v7335_v56 }
 0x6eb   : > { %v7336_v41 = vmax.f32 %v7320_v1, 0.0  ;;  %v7253_v27 = vadd.f32 %v7252_v58, %v7059_v33  ;;  %v7323_v6 = vadd.f32 %v12385_v15, %v7258_v52 }
 0x6ec   : > { %v9843_v61 = vpop.f32.mrf.mxu0 }
 0x6ed   : > { %v7322_v36 = vadd.f32 %v12385_v15, %v7253_v27  ;;  %v7268_v2 = vadd.f32 %v9871_v4, %v9843_v61  ;;  %9899 = vmatprep.mubr.msk.f32.mxu0 %vm7363_vm4, %v7336_v41  ;;  %v7339_v57 = vmax.f32 %v7323_v6, 0.0 }
 0x6ee   : > { %v7069_v19 = vpop.f32.mrf.mxu0  ;;  %9900 = vmatmul.mubr.msk.f32.gmra.mxu0 %vm7363_vm4, %v7337_v32 }
 0x6ef   : > { %v7338_v40 = vmax.f32 %v7322_v36, 0.0  ;;  %v7263_v49 = vadd.f32 %v7262_v25, %v7069_v19  ;;  %v7325_v30 = vadd.f32 %v12385_v15, %v7268_v2 }
 0x6f0   : > { %v9846_v48 = vpop.f32.mrf.mxu0 }
 0x6f1   : > { %v7324_v35 = vadd.f32 %v12385_v15, %v7263_v49  ;;  %v7278_v31 = vadd.f32 %v9874_v28, %v9846_v48  ;;  %9902 = vmatprep.mubr.msk.f32.mxu0 %vm7363_vm4, %v7338_v40  ;;  %v7341_v21 = vmax.f32 %v7325_v30, 0.0 }
 0x6f2   : > { %v7079_v13 = vpop.f32.mrf.mxu0  ;;  %9903 = vmatmul.mubr.msk.f32.gmra.mxu0 %vm7363_vm4, %v7339_v57 }
 0x6f3   : > { %v7340_v22 = vmax.f32 %v7324_v35, 0.0  ;;  %v7273_v26 = vadd.f32 %v7272_v51, %v7079_v13  ;;  %v7327_v38 = vadd.f32 %v12385_v15, %v7278_v31  ;;  %v7872_v51 = vld [vmem:[%s10207_s6] ss:$0 sm:$0xff] }
 0x6f4   : > { %v9849_v37 = vpop.f32.mrf.mxu0 }
 0x6f5   : > { %v7326_v45 = vadd.f32 %v12385_v15, %v7273_v26  ;;  %v7288_v53 = vadd.f32 %v9877_v23, %v9849_v37  ;;  %9905 = vmatprep.mubr.msk.f32.mxu0 %vm7363_vm4, %v7340_v22  ;;  %v7343_v17 = vmax.f32 %v7327_v38, 0.0 }
 0x6f6   : > { %v7089_v14 = vpop.f32.mrf.mxu0  ;;  %9906 = vmatmul.mubr.msk.f32.gmra.mxu0 %vm7363_vm4, %v7341_v21 }
 0x6f7   : > { %v7342_v62 = vmax.f32 %v7326_v45, 0.0  ;;  %v7283_v9 = vadd.f32 %v7282_v39, %v7089_v14  ;;  %v7329_v7 = vadd.f32 %v12385_v15, %v7288_v53 }
 0x6f8   : > { %v9852_v47 = vpop.f32.mrf.mxu0 }
 0x6f9   : > { %v7328_v46 = vadd.f32 %v12385_v15, %v7283_v9  ;;  %v7298_v59 = vadd.f32 %v9880_v12, %v9852_v47  ;;  %9908 = vmatprep.mubr.msk.f32.mxu0 %vm7363_vm4, %v7342_v62  ;;  %v7345_v44 = vmax.f32 %v7329_v7, 0.0 }
 0x6fa   : > { %v7099_v50 = vpop.f32.mrf.mxu0  ;;  %9909 = vmatmul.mubr.msk.f32.gmra.mxu0 %vm7363_vm4, %v7343_v17 }
 0x6fb   : > { %v7344_v16 = vmax.f32 %v7328_v46, 0.0  ;;  %v7293_v24 = vadd.f32 %v7292_v34, %v7099_v50  ;;  %v7331_v8 = vadd.f32 %v12385_v15, %v7298_v59 }
 0x6fc   : > { %v9855_v58 = vpop.f32.mrf.mxu0 }
 0x6fd   : > { %v7330_v4 = vadd.f32 %v12385_v15, %v7293_v24  ;;  %v7308_v25 = vadd.f32 %v9883_v18, %v9855_v58  ;;  %9911 = vmatprep.mubr.msk.f32.mxu0 %vm7363_vm4, %v7344_v16  ;;  %v7347_v0 = vmax.f32 %v7331_v8, 0.0 }
 0x6fe   : > { %v7109_v42 = vpop.f32.mrf.mxu0  ;;  %9912 = vmatmul.mubr.msk.f32.gmra.mxu0 %vm7363_vm4, %v7345_v44 }
 0x6ff   : > { %v7346_v28 = vmax.f32 %v7330_v4, 0.0  ;;  %v7303_v11 = vadd.f32 %v7302_v3, %v7109_v42  ;;  %v7333_v60 = vadd.f32 %v12385_v15, %v7308_v25 }
 0x701   : > { %v7332_v43 = vadd.f32 %v12385_v15, %v7303_v11  ;;  %9914 = vmatprep.mubr.msk.f32.mxu0 %vm7363_vm4, %v7346_v28  ;;  %v7349_v54 = vmax.f32 %v7333_v60, 0.0 }
 0x702   : > { %9915 = vmatmul.mubr.msk.f32.gmra.mxu0 %vm7363_vm4, %v7347_v0 }
 0x703   : > { %v7348_v29 = vmax.f32 %v7332_v43, 0.0 }
 0x705   : > { %9917 = vmatprep.mubr.msk.f32.mxu0 %vm7363_vm4, %v7348_v29 }
 0x706   : > { %9918 = vmatmul.mubr.msk.f32.gmra.mxu0 %vm7363_vm4, %v7349_v54 }
 0x7aa   : > { %v9898_v15 = vpop.f32.mrf.mxu0 }
 0x7ab   : > { %v7484_v10 = vadd.f32 %v9898_v15, %v7872_v51 }
 0x7ac   : > { %v7478_v55 = vpop.f32.mrf.mxu0 }
 0x7ad   : > { %7558 = vst.msk [vmem:[%s12423_s2 + $0x8] sm:$0xff] %vm6924_vm3, %v7484_v10  ;;  %v7479_v63 = vadd.f32 %v7872_v51, %v7478_v55 }
 0x7ae   : > { %v9901_v56 = vpop.f32.mrf.mxu0 }
 0x7af   : > { %7557 = vst.msk [vmem:[%s12423_s2] sm:$0xff] %vm6924_vm3, %v7479_v63  ;;  %v7494_v5 = vadd.f32 %v9901_v56, %v7872_v51 }
 0x7b0   : > { %v7488_v20 = vpop.f32.mrf.mxu0 }
 0x7b1   : > { %7560 = vst.msk [vmem:[%s12423_s2 + $0x18] sm:$0xff] %vm6924_vm3, %v7494_v5  ;;  %v7489_v1 = vadd.f32 %v7872_v51, %v7488_v20 }
 0x7b2   : > { %v9904_v52 = vpop.f32.mrf.mxu0 }
 0x7b3   : > { %7559 = vst.msk [vmem:[%s12423_s2 + $0x10] sm:$0xff] %vm6924_vm3, %v7489_v1  ;;  %v7504_v23 = vadd.f32 %v9904_v52, %v7872_v51 }
 0x7b4   : > { %v7498_v33 = vpop.f32.mrf.mxu0 }
 0x7b5   : > { %7562 = vst.msk [vmem:[%s12423_s2 + $0x28] sm:$0xff] %vm6924_vm3, %v7504_v23  ;;  %v7499_v41 = vadd.f32 %v7872_v51, %v7498_v33 }
 0x7b6   : > { %v9907_v27 = vpop.f32.mrf.mxu0 }
 0x7b7   : > { %7561 = vst.msk [vmem:[%s12423_s2 + $0x20] sm:$0xff] %vm6924_vm3, %v7499_v41  ;;  %v7514_v32 = vadd.f32 %v9907_v27, %v7872_v51 }
 0x7b8   : > { %v7508_v6 = vpop.f32.mrf.mxu0 }
 0x7b9   : > { %7564 = vst.msk [vmem:[%s12423_s2 + $0x38] sm:$0xff] %vm6924_vm3, %v7514_v32  ;;  %v7509_v61 = vadd.f32 %v7872_v51, %v7508_v6 }
 0x7ba   : > { %v9910_v36 = vpop.f32.mrf.mxu0 }
 0x7bb   : > { %7563 = vst.msk [vmem:[%s12423_s2 + $0x30] sm:$0xff] %vm6924_vm3, %v7509_v61  ;;  %v7524_v2 = vadd.f32 %v9910_v36, %v7872_v51 }
 0x7bc   : > { %v7518_v39 = vpop.f32.mrf.mxu0 }
 0x7bd   : > { %7566 = vst.msk [vmem:[%s12423_s2 + $0x48] sm:$0xff] %vm6924_vm3, %v7524_v2  ;;  %v7519_v19 = vadd.f32 %v7872_v51, %v7518_v39 }
 0x7be   : > { %v9913_v40 = vpop.f32.mrf.mxu0 }
 0x7bf   : > { %7565 = vst.msk [vmem:[%s12423_s2 + $0x40] sm:$0xff] %vm6924_vm3, %v7519_v19  ;;  %v7534_v49 = vadd.f32 %v9913_v40, %v7872_v51 }
 0x7c0   : > { %v7528_v57 = vpop.f32.mrf.mxu0 }
 0x7c1   : > { %7568 = vst.msk [vmem:[%s12423_s2 + $0x58] sm:$0xff] %vm6924_vm3, %v7534_v49  ;;  %v7529_v30 = vadd.f32 %v7872_v51, %v7528_v57 }
 0x7c2   : > { %v9916_v48 = vpop.f32.mrf.mxu0 }
 0x7c3   : > { %7567 = vst.msk [vmem:[%s12423_s2 + $0x50] sm:$0xff] %vm6924_vm3, %v7529_v30  ;;  %v7544_v35 = vadd.f32 %v9916_v48, %v7872_v51 }
 0x7c4   : > { %v7538_v31 = vpop.f32.mrf.mxu0 }
 0x7c5   : > { %7570 = vst.msk [vmem:[%s12423_s2 + $0x68] sm:$0xff] %vm6924_vm3, %v7544_v35  ;;  %v7539_v12 = vadd.f32 %v7872_v51, %v7538_v31 }
 0x7c6   : > { %v9919_v13 = vpop.f32.mrf.mxu0 }
 0x7c7   : > { %7569 = vst.msk [vmem:[%s12423_s2 + $0x60] sm:$0xff] %vm6924_vm3, %v7539_v12  ;;  %v7554_v22 = vadd.f32 %v9919_v13, %v7872_v51 }
 0x7c8   : > { %v7548_v26 = vpop.f32.mrf.mxu0 }
 0x7c9   : > { %7572 = vst.msk [vmem:[%s12423_s2 + $0x78] sm:$0xff] %vm6924_vm3, %v7554_v22  ;;  %v7549_v21 = vadd.f32 %v7872_v51, %v7548_v26 }
 0x7cb   : > { %7571 = vst.msk [vmem:[%s12423_s2 + $0x70] sm:$0xff] %vm6924_vm3, %v7549_v21 }
 0x7cc PF: > { %s87_s15 = sadd.s32 1, %s9973_s15  }
 0x7cd   : > { %p84_p4 = scmp.ge.s32.totalorder %s87_s15, 10  }
 0x7cf   :  { %86 = sbr.rel (!%p84_p4) target bundleno = 63 (0x3f), region = 240 }

</bundles_post_ra>
